<compile_context>
chip_gen: v7x
topology: tpu7x:2x2x1
jax: 0.10.0
libtpu: 0.0.40
codegen_flags: <defaults>
</compile_context>

<pallas_src>
import functools

import jax
import jax.numpy as jnp
from jax import lax
from jax.experimental import pallas as pl
from jax.experimental.pallas import tpu as pltpu

FC_HIDDEN = 512
LANE = 128
FC1_TK = 1664                      # fc1 K tile: multiple of 128; K padded 3136 -> 3328 (2 steps)
CONV_TM = 512                      # max lane tile for the conv matmul M = B*Ho*Wo axis
VMEM_LIMIT = 48 * 1024 * 1024      # > 16/32 MiB scoped defaults, < v7x 64 MiB physical


def _round_up(x, m):
    return ((x + m - 1) // m) * m


# ----------------------------- Pallas kernels ------------------------------

def _conv_matmul_kernel(w_ref, p_ref, b_ref, o_ref):
    """One (Cout, K) @ (K, TM) tile of the im2col conv matmul, + bias + ReLU.

    The weight/bias blocks are resident (constant index_map) while patch and
    output tiles stream over the M grid axis, so patch DMA overlaps the MXU.
    """
    acc = jnp.dot(w_ref[...], p_ref[...], preferred_element_type=jnp.float32)
    acc = acc + b_ref[...]                        # (Cout, 1) broadcast over lanes
    o_ref[...] = jnp.maximum(acc, 0.0).astype(o_ref.dtype)


def _fc_fused_kernel(x_ref, w1_ref, b1_ref, w2_ref, b2_ref, o_ref, acc_ref):
    """fc1 (K-tiled reduction into an f32 VMEM accumulator) + ReLU + fc2."""
    k = pl.program_id(1)                          # K axis: innermost, "arbitrary"

    @pl.when(k == 0)
    def _():
        acc_ref[...] = jnp.zeros_like(acc_ref)

    acc_ref[...] += jnp.dot(x_ref[...], w1_ref[...],
                            preferred_element_type=jnp.float32)

    @pl.when(k == pl.num_programs(1) - 1)
    def _():
        h = jnp.maximum(acc_ref[...] + b1_ref[...], 0.0)           # (TB, 512) f32
        q = jnp.dot(h.astype(w2_ref.dtype), w2_ref[...],
                    preferred_element_type=jnp.float32)
        o_ref[...] = q + b2_ref[...]


# ----------------------------- layer wrappers -------------------------------

def _im2col_t(x, k, s):
    """x: (Cin, B, H, W) -> (Cin*k*k, B*Ho*Wo); K-row order is (c, kh, kw)."""
    C, B, H, W = x.shape
    Ho = (H - k) // s + 1
    Wo = (W - k) // s + 1
    taps = []
    for i in range(k):
        for j in range(k):
            taps.append(x[:, :, i:i + s * (Ho - 1) + 1:s,
                              j:j + s * (Wo - 1) + 1:s])           # (C, B, Ho, Wo)
    cols = jnp.stack(taps, axis=1)                                 # (C, k*k, B, Ho, Wo)
    return cols.reshape(C * k * k, B * Ho * Wo), Ho, Wo


def conv2d_relu(x_cbhw, w_mat, b_col, *, k, s):
    """Conv + ReLU in channel-major (C, B, H, W) layout; bf16 in/out, f32 accumulate.

    The im2col matmul is tiled over M = B*Ho*Wo (lane axis, padded to a
    multiple of 128): bounded VMEM per step, pipelined patch DMA, lane-dense
    output stores, and a "parallel" grid axis for v7x's two TensorCores.
    """
    Cin, B, H, W = x_cbhw.shape
    Cout, Kw = w_mat.shape
    patches, Ho, Wo = _im2col_t(x_cbhw, k, s)                      # (K, M) bf16
    K, M = patches.shape
    if Kw != K:                                   # conv3: K 576 -> 640 (zeros; numerically free)
        patches = jnp.pad(patches, ((0, Kw - K), (0, 0)))
    TM = min(CONV_TM, _round_up(M, LANE))
    Mp = _round_up(M, TM)
    if Mp != M:                                   # lane-dense (128-multiple) output tiles
        patches = jnp.pad(patches, ((0, 0), (0, Mp - M)))
    out = pl.pallas_call(
        _conv_matmul_kernel,
        out_shape=jax.ShapeDtypeStruct((Cout, Mp), jnp.bfloat16),
        grid=(Mp // TM,),
        in_specs=[
            pl.BlockSpec((Cout, Kw), lambda m: (0, 0)),     # weight: resident
            pl.BlockSpec((Kw, TM), lambda m: (0, m)),       # patches: stream M tiles
            pl.BlockSpec((Cout, 1), lambda m: (0, 0)),      # bias: resident
        ],
        out_specs=pl.BlockSpec((Cout, TM), lambda m: (0, m)),
        compiler_params=pltpu.CompilerParams(
            dimension_semantics=("parallel",),
            vmem_limit_bytes=VMEM_LIMIT),
    )(w_mat, patches, b_col)
    return out[:, :M].reshape(Cout, B, Ho, Wo)


def fc_fused(flat, w1, b1, w2, b2):
    """relu(flat @ w1 + b1) @ w2 + b2; fc1 K-tiled (2 steps), fc2 fused in VMEM."""
    Bsz, K = flat.shape
    Kp, Hd = w1.shape
    Ap = w2.shape[1]
    assert Kp % FC1_TK == 0 and FC1_TK % LANE == 0, "fc1 K tiling must stay 128-aligned"
    if Kp != K:                                   # 3136 -> 3328; XLA fuses with the flatten transpose
        flat = jnp.pad(flat, ((0, 0), (0, Kp - K)))
    nk = Kp // FC1_TK
    TB = Bsz                                      # single batch tile at small B (see TODO above)
    nb = Bsz // TB
    return pl.pallas_call(
        _fc_fused_kernel,
        out_shape=jax.ShapeDtypeStruct((Bsz, Ap), jnp.float32),
        grid=(nb, nk),                            # K reduction innermost + "arbitrary"
        in_specs=[
            pl.BlockSpec((TB, FC1_TK), lambda b, k: (b, k)),   # x: stream K tiles
            pl.BlockSpec((FC1_TK, Hd), lambda b, k: (k, 0)),   # w1: stream K tiles
            pl.BlockSpec((1, Hd), lambda b, k: (0, 0)),        # b1: resident
            pl.BlockSpec((Hd, Ap), lambda b, k: (0, 0)),       # w2: resident
            pl.BlockSpec((1, Ap), lambda b, k: (0, 0)),        # b2: resident (pre-padded)
        ],
        out_specs=pl.BlockSpec((TB, Ap), lambda b, k: (b, 0)),
        scratch_shapes=[pltpu.VMEM((TB, Hd), jnp.float32)],
        compiler_params=pltpu.CompilerParams(
            dimension_semantics=("parallel", "arbitrary"),
            vmem_limit_bytes=VMEM_LIMIT),
    )(flat, w1, b1, w2, b2)


# ------------------------------- parameters --------------------------------

def init_params(key, d, a):
    """PyTorch-native shapes, uniform(-1/sqrt(fan_in), +1/sqrt(fan_in))."""
    ks = jax.random.split(key, 10)

    def u(k, shape, fan_in):
        bound = 1.0 / jnp.sqrt(jnp.float32(fan_in))
        return jax.random.uniform(k, shape, jnp.float32, -bound, bound)

    return {
        "w1": u(ks[0], (32, d, 8, 8), d * 8 * 8),   "b1": u(ks[1], (32,), d * 8 * 8),
        "w2": u(ks[2], (64, 32, 4, 4), 32 * 4 * 4), "b2": u(ks[3], (64,), 32 * 4 * 4),
        "w3": u(ks[4], (64, 64, 3, 3), 64 * 3 * 3), "b3": u(ks[5], (64,), 64 * 3 * 3),
        "fw1": u(ks[6], (512, 3136), 3136),         "fb1": u(ks[7], (512,), 3136),
        "fw2": u(ks[8], (a, 512), 512),             "fb2": u(ks[9], (a,), 512),
    }


def prepare_params(raw):
    """One-time re-layout (and padding) of PyTorch-shaped params into kernel layouts."""
    bf, f32 = jnp.bfloat16, jnp.float32

    def conv_wb(w, b):
        cout = w.shape[0]
        wm = w.reshape(cout, -1)
        kp = _round_up(wm.shape[1], LANE)          # full-width weight loads / MXU passes
        wm = jnp.pad(wm, ((0, 0), (0, kp - wm.shape[1])))
        return wm.astype(bf), b.reshape(cout, 1).astype(f32)

    w1m, b1c = conv_wb(raw["w1"], raw["b1"])       # (32, 256)
    w2m, b2c = conv_wb(raw["w2"], raw["b2"])       # (64, 512)
    w3m, b3c = conv_wb(raw["w3"], raw["b3"])       # (64, 640) — 576 zero-padded

    K = raw["fw1"].shape[1]                        # 3136, PyTorch (c, h, w) flatten order
    Kp = _round_up(K, FC1_TK)                      # 3328 = 2 x 1664
    fw1m = jnp.zeros((Kp, FC_HIDDEN), f32).at[:K].set(raw["fw1"].T).astype(bf)

    a = raw["fw2"].shape[0]
    Ap = _round_up(a, LANE)                        # lane-dense Q-value store; sliced to `a` outside
    fw2m = jnp.zeros((FC_HIDDEN, Ap), f32).at[:, :a].set(raw["fw2"].T).astype(bf)
    fb2r = jnp.zeros((1, Ap), f32).at[:, :a].set(raw["fb2"])   # padded ONCE here, not per forward

    return {
        "w1m": w1m, "b1c": b1c, "w2m": w2m, "b2c": b2c, "w3m": w3m, "b3c": b3c,
        "fw1m": fw1m, "fb1r": raw["fb1"].reshape(1, -1).astype(f32),
        "fw2m": fw2m, "fb2r": fb2r,
    }


# --------------------------------- forward ---------------------------------

@functools.partial(jax.jit, static_argnames=("num_actions",))
def dqn_forward(params, x, *, num_actions):
    """x: (B, d, 84, 84) NCHW f32 -> (B, num_actions) f32 Q-values."""
    B = x.shape[0]
    # Single channel-major layout through the conv stack; bf16 activations.
    h = jnp.transpose(x, (1, 0, 2, 3)).astype(jnp.bfloat16)        # (d, B, 84, 84)
    h = conv2d_relu(h, params["w1m"], params["b1c"], k=8, s=4)     # (32, B, 20, 20)
    h = conv2d_relu(h, params["w2m"], params["b2c"], k=4, s=2)     # (64, B, 9, 9)
    h = conv2d_relu(h, params["w3m"], params["b3c"], k=3, s=1)     # (64, B, 7, 7)
    # Flatten in PyTorch (C, H, W) order (tiny tensor, one cheap transpose).
    flat = jnp.transpose(h, (1, 0, 2, 3)).reshape(B, -1)           # (B, 3136) bf16
    q_pad = fc_fused(flat, params["fw1m"], params["fb1r"],
                     params["fw2m"], params["fb2r"])               # (B, 128) f32
    return q_pad[:, :num_actions]


def dqn_reference(raw, x):
    """Pure-jnp f32 reference matching the PyTorch module."""
    def conv(h, w, b, s):
        out = lax.conv_general_dilated(
            h, w, window_strides=(s, s), padding="VALID",
            dimension_numbers=("NCHW", "OIHW", "NCHW"))
        return jax.nn.relu(out + b.reshape(1, -1, 1, 1))

    h = conv(x, raw["w1"], raw["b1"], 4)
    h = conv(h, raw["w2"], raw["b2"], 2)
    h = conv(h, raw["w3"], raw["b3"], 1)
    flat = h.reshape(x.shape[0], -1)
    h = jax.nn.relu(flat @ raw["fw1"].T + raw["fb1"])
    return h @ raw["fw2"].T + raw["fb2"]


if __name__ == "__main__":
    B, d, a = 2, 4, 6            # spatial 84x84 is fixed by the fc(3136) input
    key = jax.random.PRNGKey(0)
    kx, kp = jax.random.split(key)
    x = jax.random.normal(kx, (B, d, 84, 84), jnp.float32)

    raw = init_params(kp, d, a)
    params = prepare_params(raw)             # one-time weight re-layout + padding

    q = dqn_forward(params, x, num_actions=a)
    q = jax.block_until_ready(q)
    assert q.shape == (B, a) and q.dtype == jnp.float32
    assert bool(jnp.all(jnp.isfinite(q)))

    q_ref = dqn_reference(raw, x)            # loose tolerance: bf16 operands, f32 accum
    assert bool(jnp.allclose(q, q_ref, atol=3e-2, rtol=3e-2))

    print("KERNEL_OK")
</pallas_src>

<mosaic_0001>
module attributes {stable_mosaic.version = 11 : i64} {
  func.func @_conv_matmul_kernel(%arg0: i32, %arg1: memref<32x256xbf16, #tpu.memory_space<vmem>>, %arg2: memref<256x512xbf16, #tpu.memory_space<vmem>>, %arg3: memref<32x1xf32, #tpu.memory_space<vmem>>, %arg4: memref<32x512xbf16, #tpu.memory_space<vmem>>) attributes {dimension_semantics = [#tpu.dimension_semantics<parallel>], iteration_bounds = array<i64: 2>, scalar_prefetch = 0 : i64, scratch_operands = 0 : i64, tpu.core_type = #tpu.core_type<tc>, window_params = [{pipeline_mode = #tpu.pipeline_mode<synchronous>, transform_indices = @transform_0, window_bounds = array<i64: 32, 256>}, {transform_indices = @transform_1, window_bounds = array<i64: 256, 512>}, {pipeline_mode = #tpu.pipeline_mode<synchronous>, transform_indices = @transform_2, window_bounds = array<i64: 32, 1>}, {transform_indices = @transform_3, window_bounds = array<i64: 32, 512>}]} {
    %c0 = arith.constant 0 : index
    %c0_0 = arith.constant 0 : index
    %0 = vector.load %arg1[%c0, %c0_0] : memref<32x256xbf16, #tpu.memory_space<vmem>>, vector<32x256xbf16>
    %c0_1 = arith.constant 0 : index
    %c0_2 = arith.constant 0 : index
    %1 = vector.load %arg2[%c0_1, %c0_2] : memref<256x512xbf16, #tpu.memory_space<vmem>>, vector<256x512xbf16>
    %cst = arith.constant dense<0.000000e+00> : vector<32x512xf32>
    %2 = tpu.matmul %0, %1, %cst {dimension_numbers = #tpu.dot_dimension_numbers<[1], [0], [0], [1], [0, 0, 1, 1], [], []>} : vector<32x256xbf16>, vector<256x512xbf16>, vector<32x512xf32> -> vector<32x512xf32>
    %c0_3 = arith.constant 0 : index
    %c0_4 = arith.constant 0 : index
    %3 = vector.load %arg3[%c0_3, %c0_4] : memref<32x1xf32, #tpu.memory_space<vmem>>, vector<32x1xf32>
    %4 = vector.broadcast %3 : vector<32x1xf32> to vector<32x512xf32>
    %5 = arith.addf %2, %4 : vector<32x512xf32>
    %cst_5 = arith.constant 0.000000e+00 : f32
    %6 = vector.broadcast %cst_5 : f32 to vector<32x512xf32>
    %7 = arith.maximumf %5, %6 : vector<32x512xf32>
    %8 = arith.truncf %7 : vector<32x512xf32> to vector<32x512xbf16>
    %c0_6 = arith.constant 0 : index
    %c0_7 = arith.constant 0 : index
    %9 = vector.load %arg4[%c0_6, %c0_7] : memref<32x512xbf16, #tpu.memory_space<vmem>>, vector<32x512xbf16>
    tpu.vector_store %arg4[%c0_6, %c0_7], %8 {strides = array<i32>} : memref<32x512xbf16, #tpu.memory_space<vmem>>, vector<32x512xbf16>,
    return
  }
  func.func @transform_0(%arg0: i32) -> (i32, i32) {
    %c0_i32 = arith.constant 0 : i32
    %c0_i32_0 = arith.constant 0 : i32
    %c0_i32_1 = arith.constant 0 : i32
    return %c0_i32, %c0_i32_0 : i32, i32
  }
  func.func @transform_1(%arg0: i32) -> (i32, i32) {
    %c0_i32 = arith.constant 0 : i32
    %c0_i32_0 = arith.constant 0 : i32
    return %c0_i32, %arg0 : i32, i32
  }
  func.func @transform_2(%arg0: i32) -> (i32, i32) {
    %c0_i32 = arith.constant 0 : i32
    %c0_i32_0 = arith.constant 0 : i32
    %c0_i32_1 = arith.constant 0 : i32
    return %c0_i32, %c0_i32_0 : i32, i32
  }
  func.func @transform_3(%arg0: i32) -> (i32, i32) {
    %c0_i32 = arith.constant 0 : i32
    %c0_i32_0 = arith.constant 0 : i32
    return %c0_i32, %arg0 : i32, i32
  }
}

module attributes {stable_mosaic.version = 11 : i64} {
  func.func @_conv_matmul_kernel(%arg0: i32, %arg1: memref<64x512xbf16, #tpu.memory_space<vmem>>, %arg2: memref<512x256xbf16, #tpu.memory_space<vmem>>, %arg3: memref<64x1xf32, #tpu.memory_space<vmem>>, %arg4: memref<64x256xbf16, #tpu.memory_space<vmem>>) attributes {dimension_semantics = [#tpu.dimension_semantics<parallel>], iteration_bounds = array<i64: 1>, scalar_prefetch = 0 : i64, scratch_operands = 0 : i64, tpu.core_type = #tpu.core_type<tc>, window_params = [{pipeline_mode = #tpu.pipeline_mode<synchronous>, transform_indices = @transform_0, window_bounds = array<i64: 64, 512>}, {transform_indices = @transform_1, window_bounds = array<i64: 512, 256>}, {pipeline_mode = #tpu.pipeline_mode<synchronous>, transform_indices = @transform_2, window_bounds = array<i64: 64, 1>}, {transform_indices = @transform_3, window_bounds = array<i64: 64, 256>}]} {
    %c0 = arith.constant 0 : index
    %c0_0 = arith.constant 0 : index
    %0 = vector.load %arg1[%c0, %c0_0] : memref<64x512xbf16, #tpu.memory_space<vmem>>, vector<64x512xbf16>
    %c0_1 = arith.constant 0 : index
    %c0_2 = arith.constant 0 : index
    %1 = vector.load %arg2[%c0_1, %c0_2] : memref<512x256xbf16, #tpu.memory_space<vmem>>, vector<512x256xbf16>
    %cst = arith.constant dense<0.000000e+00> : vector<64x256xf32>
    %2 = tpu.matmul %0, %1, %cst {dimension_numbers = #tpu.dot_dimension_numbers<[1], [0], [0], [1], [0, 0, 1, 1], [], []>} : vector<64x512xbf16>, vector<512x256xbf16>, vector<64x256xf32> -> vector<64x256xf32>
    %c0_3 = arith.constant 0 : index
    %c0_4 = arith.constant 0 : index
    %3 = vector.load %arg3[%c0_3, %c0_4] : memref<64x1xf32, #tpu.memory_space<vmem>>, vector<64x1xf32>
    %4 = vector.broadcast %3 : vector<64x1xf32> to vector<64x256xf32>
    %5 = arith.addf %2, %4 : vector<64x256xf32>
    %cst_5 = arith.constant 0.000000e+00 : f32
    %6 = vector.broadcast %cst_5 : f32 to vector<64x256xf32>
    %7 = arith.maximumf %5, %6 : vector<64x256xf32>
    %8 = arith.truncf %7 : vector<64x256xf32> to vector<64x256xbf16>
    %c0_6 = arith.constant 0 : index
    %c0_7 = arith.constant 0 : index
    %9 = vector.load %arg4[%c0_6, %c0_7] : memref<64x256xbf16, #tpu.memory_space<vmem>>, vector<64x256xbf16>
    tpu.vector_store %arg4[%c0_6, %c0_7], %8 {strides = array<i32>} : memref<64x256xbf16, #tpu.memory_space<vmem>>, vector<64x256xbf16>,
    return
  }
  func.func @transform_0(%arg0: i32) -> (i32, i32) {
    %c0_i32 = arith.constant 0 : i32
    %c0_i32_0 = arith.constant 0 : i32
    %c0_i32_1 = arith.constant 0 : i32
    return %c0_i32, %c0_i32_0 : i32, i32
  }
  func.func @transform_1(%arg0: i32) -> (i32, i32) {
    %c0_i32 = arith.constant 0 : i32
    %c0_i32_0 = arith.constant 0 : i32
    return %c0_i32, %arg0 : i32, i32
  }
  func.func @transform_2(%arg0: i32) -> (i32, i32) {
    %c0_i32 = arith.constant 0 : i32
    %c0_i32_0 = arith.constant 0 : i32
    %c0_i32_1 = arith.constant 0 : i32
    return %c0_i32, %c0_i32_0 : i32, i32
  }
  func.func @transform_3(%arg0: i32) -> (i32, i32) {
    %c0_i32 = arith.constant 0 : i32
    %c0_i32_0 = arith.constant 0 : i32
    return %c0_i32, %arg0 : i32, i32
  }
}

module attributes {stable_mosaic.version = 11 : i64} {
  func.func @_conv_matmul_kernel(%arg0: i32, %arg1: memref<64x640xbf16, #tpu.memory_space<vmem>>, %arg2: memref<640x128xbf16, #tpu.memory_space<vmem>>, %arg3: memref<64x1xf32, #tpu.memory_space<vmem>>, %arg4: memref<64x128xbf16, #tpu.memory_space<vmem>>) attributes {dimension_semantics = [#tpu.dimension_semantics<parallel>], iteration_bounds = array<i64: 1>, scalar_prefetch = 0 : i64, scratch_operands = 0 : i64, tpu.core_type = #tpu.core_type<tc>, window_params = [{pipeline_mode = #tpu.pipeline_mode<synchronous>, transform_indices = @transform_0, window_bounds = array<i64: 64, 640>}, {transform_indices = @transform_1, window_bounds = array<i64: 640, 128>}, {pipeline_mode = #tpu.pipeline_mode<synchronous>, transform_indices = @transform_2, window_bounds = array<i64: 64, 1>}, {transform_indices = @transform_3, window_bounds = array<i64: 64, 128>}]} {
    %c0 = arith.constant 0 : index
    %c0_0 = arith.constant 0 : index
    %0 = vector.load %arg1[%c0, %c0_0] : memref<64x640xbf16, #tpu.memory_space<vmem>>, vector<64x640xbf16>
    %c0_1 = arith.constant 0 : index
    %c0_2 = arith.constant 0 : index
    %1 = vector.load %arg2[%c0_1, %c0_2] : memref<640x128xbf16, #tpu.memory_space<vmem>>, vector<640x128xbf16>
    %cst = arith.constant dense<0.000000e+00> : vector<64x128xf32>
    %2 = tpu.matmul %0, %1, %cst {dimension_numbers = #tpu.dot_dimension_numbers<[1], [0], [0], [1], [0, 0, 1, 1], [], []>} : vector<64x640xbf16>, vector<640x128xbf16>, vector<64x128xf32> -> vector<64x128xf32>
    %c0_3 = arith.constant 0 : index
    %c0_4 = arith.constant 0 : index
    %3 = vector.load %arg3[%c0_3, %c0_4] : memref<64x1xf32, #tpu.memory_space<vmem>>, vector<64x1xf32>
    %4 = vector.broadcast %3 : vector<64x1xf32> to vector<64x128xf32>
    %5 = arith.addf %2, %4 : vector<64x128xf32>
    %cst_5 = arith.constant 0.000000e+00 : f32
    %6 = vector.broadcast %cst_5 : f32 to vector<64x128xf32>
    %7 = arith.maximumf %5, %6 : vector<64x128xf32>
    %8 = arith.truncf %7 : vector<64x128xf32> to vector<64x128xbf16>
    %c0_6 = arith.constant 0 : index
    %c0_7 = arith.constant 0 : index
    %9 = vector.load %arg4[%c0_6, %c0_7] : memref<64x128xbf16, #tpu.memory_space<vmem>>, vector<64x128xbf16>
    tpu.vector_store %arg4[%c0_6, %c0_7], %8 {strides = array<i32>} : memref<64x128xbf16, #tpu.memory_space<vmem>>, vector<64x128xbf16>,
    return
  }
  func.func @transform_0(%arg0: i32) -> (i32, i32) {
    %c0_i32 = arith.constant 0 : i32
    %c0_i32_0 = arith.constant 0 : i32
    %c0_i32_1 = arith.constant 0 : i32
    return %c0_i32, %c0_i32_0 : i32, i32
  }
  func.func @transform_1(%arg0: i32) -> (i32, i32) {
    %c0_i32 = arith.constant 0 : i32
    %c0_i32_0 = arith.constant 0 : i32
    return %c0_i32, %arg0 : i32, i32
  }
  func.func @transform_2(%arg0: i32) -> (i32, i32) {
    %c0_i32 = arith.constant 0 : i32
    %c0_i32_0 = arith.constant 0 : i32
    %c0_i32_1 = arith.constant 0 : i32
    return %c0_i32, %c0_i32_0 : i32, i32
  }
  func.func @transform_3(%arg0: i32) -> (i32, i32) {
    %c0_i32 = arith.constant 0 : i32
    %c0_i32_0 = arith.constant 0 : i32
    return %c0_i32, %arg0 : i32, i32
  }
}

module attributes {stable_mosaic.version = 11 : i64} {
  func.func @_fc_fused_kernel(%arg0: i32, %arg1: i32, %arg2: memref<2x1664xbf16, #tpu.memory_space<vmem>>, %arg3: memref<1664x512xbf16, #tpu.memory_space<vmem>>, %arg4: memref<1x512xf32, #tpu.memory_space<vmem>>, %arg5: memref<512x128xbf16, #tpu.memory_space<vmem>>, %arg6: memref<1x128xf32, #tpu.memory_space<vmem>>, %arg7: memref<2x128xf32, #tpu.memory_space<vmem>>, %arg8: memref<2x512xf32, #tpu.memory_space<vmem>>) attributes {dimension_semantics = [#tpu.dimension_semantics<parallel>, #tpu.dimension_semantics<arbitrary>], iteration_bounds = array<i64: 1, 2>, scalar_prefetch = 0 : i64, scratch_operands = 1 : i64, tpu.core_type = #tpu.core_type<tc>, window_params = [{transform_indices = @transform_0, window_bounds = array<i64: 2, 1664>}, {transform_indices = @transform_1, window_bounds = array<i64: 1664, 512>}, {pipeline_mode = #tpu.pipeline_mode<synchronous>, transform_indices = @transform_2, window_bounds = array<i64: 1, 512>}, {pipeline_mode = #tpu.pipeline_mode<synchronous>, transform_indices = @transform_3, window_bounds = array<i64: 512, 128>}, {pipeline_mode = #tpu.pipeline_mode<synchronous>, transform_indices = @transform_4, window_bounds = array<i64: 1, 128>}, {transform_indices = @transform_5, window_bounds = array<i64: 2, 128>}]} {
    %c0_i32 = arith.constant 0 : i32
    %0 = arith.cmpi eq, %arg1, %c0_i32 : i32
    %1 = arith.extui %0 : i1 to i32
    %c0_i32_0 = arith.constant 0 : i32
    %2 = arith.cmpi ne, %1, %c0_i32_0 : i32
    scf.if %2 {
      %cst_9 = arith.constant 0.000000e+00 : f32
      %12 = vector.broadcast %cst_9 : f32 to vector<2x512xf32>
      %c0_10 = arith.constant 0 : index
      %c0_11 = arith.constant 0 : index
      %13 = vector.load %arg8[%c0_10, %c0_11] : memref<2x512xf32, #tpu.memory_space<vmem>>, vector<2x512xf32>
      tpu.vector_store %arg8[%c0_10, %c0_11], %12 {strides = array<i32>} : memref<2x512xf32, #tpu.memory_space<vmem>>, vector<2x512xf32>,
    } else {
    }
    %c0 = arith.constant 0 : index
    %c0_1 = arith.constant 0 : index
    %3 = vector.load %arg8[%c0, %c0_1] : memref<2x512xf32, #tpu.memory_space<vmem>>, vector<2x512xf32>
    %c0_2 = arith.constant 0 : index
    %c0_3 = arith.constant 0 : index
    %4 = vector.load %arg2[%c0_2, %c0_3] : memref<2x1664xbf16, #tpu.memory_space<vmem>>, vector<2x1664xbf16>
    %c0_4 = arith.constant 0 : index
    %c0_5 = arith.constant 0 : index
    %5 = vector.load %arg3[%c0_4, %c0_5] : memref<1664x512xbf16, #tpu.memory_space<vmem>>, vector<1664x512xbf16>
    %cst = arith.constant dense<0.000000e+00> : vector<2x512xf32>
    %6 = tpu.matmul %4, %5, %cst {dimension_numbers = #tpu.dot_dimension_numbers<[1], [0], [0], [1], [0, 0, 1, 1], [], []>} : vector<2x1664xbf16>, vector<1664x512xbf16>, vector<2x512xf32> -> vector<2x512xf32>
    %7 = arith.addf %3, %6 : vector<2x512xf32>
    %c0_6 = arith.constant 0 : index
    %c0_7 = arith.constant 0 : index
    %8 = vector.load %arg8[%c0_6, %c0_7] : memref<2x512xf32, #tpu.memory_space<vmem>>, vector<2x512xf32>
    tpu.vector_store %arg8[%c0_6, %c0_7], %7 {strides = array<i32>} : memref<2x512xf32, #tpu.memory_space<vmem>>, vector<2x512xf32>,
    %c1_i32 = arith.constant 1 : i32
    %9 = arith.cmpi eq, %arg1, %c1_i32 : i32
    %10 = arith.extui %9 : i1 to i32
    %c0_i32_8 = arith.constant 0 : i32
    %11 = arith.cmpi ne, %10, %c0_i32_8 : i32
    scf.if %11 {
      %c0_9 = arith.constant 0 : index
      %c0_10 = arith.constant 0 : index
      %12 = vector.load %arg8[%c0_9, %c0_10] : memref<2x512xf32, #tpu.memory_space<vmem>>, vector<2x512xf32>
      %c0_11 = arith.constant 0 : index
      %c0_12 = arith.constant 0 : index
      %13 = vector.load %arg4[%c0_11, %c0_12] : memref<1x512xf32, #tpu.memory_space<vmem>>, vector<1x512xf32>
      %14 = vector.broadcast %13 : vector<1x512xf32> to vector<2x512xf32>
      %15 = arith.addf %12, %14 : vector<2x512xf32>
      %cst_13 = arith.constant 0.000000e+00 : f32
      %16 = vector.broadcast %cst_13 : f32 to vector<2x512xf32>
      %17 = arith.maximumf %15, %16 : vector<2x512xf32>
      %18 = arith.truncf %17 : vector<2x512xf32> to vector<2x512xbf16>
      %c0_14 = arith.constant 0 : index
      %c0_15 = arith.constant 0 : index
      %19 = vector.load %arg5[%c0_14, %c0_15] : memref<512x128xbf16, #tpu.memory_space<vmem>>, vector<512x128xbf16>
      %cst_16 = arith.constant dense<0.000000e+00> : vector<2x128xf32>
      %20 = tpu.matmul %18, %19, %cst_16 {dimension_numbers = #tpu.dot_dimension_numbers<[1], [0], [0], [1], [0, 0, 1, 1], [], []>} : vector<2x512xbf16>, vector<512x128xbf16>, vector<2x128xf32> -> vector<2x128xf32>
      %c0_17 = arith.constant 0 : index
      %c0_18 = arith.constant 0 : index
      %21 = vector.load %arg6[%c0_17, %c0_18] : memref<1x128xf32, #tpu.memory_space<vmem>>, vector<1x128xf32>
      %22 = vector.broadcast %21 : vector<1x128xf32> to vector<2x128xf32>
      %23 = arith.addf %20, %22 : vector<2x128xf32>
      %c0_19 = arith.constant 0 : index
      %c0_20 = arith.constant 0 : index
      %24 = vector.load %arg7[%c0_19, %c0_20] : memref<2x128xf32, #tpu.memory_space<vmem>>, vector<2x128xf32>
      tpu.vector_store %arg7[%c0_19, %c0_20], %23 {strides = array<i32>} : memref<2x128xf32, #tpu.memory_space<vmem>>, vector<2x128xf32>,
    } else {
    }
    return
  }
  func.func @transform_0(%arg0: i32, %arg1: i32) -> (i32, i32) {
    %c0_i32 = arith.constant 0 : i32
    return %arg0, %arg1 : i32, i32
  }
  func.func @transform_1(%arg0: i32, %arg1: i32) -> (i32, i32) {
    %c0_i32 = arith.constant 0 : i32
    %c0_i32_0 = arith.constant 0 : i32
    return %arg1, %c0_i32 : i32, i32
  }
  func.func @transform_2(%arg0: i32, %arg1: i32) -> (i32, i32) {
    %c0_i32 = arith.constant 0 : i32
    %c0_i32_0 = arith.constant 0 : i32
    %c0_i32_1 = arith.constant 0 : i32
    return %c0_i32, %c0_i32_0 : i32, i32
  }
  func.func @transform_3(%arg0: i32, %arg1: i32) -> (i32, i32) {
    %c0_i32 = arith.constant 0 : i32
    %c0_i32_0 = arith.constant 0 : i32
    %c0_i32_1 = arith.constant 0 : i32
    return %c0_i32, %c0_i32_0 : i32, i32
  }
  func.func @transform_4(%arg0: i32, %arg1: i32) -> (i32, i32) {
    %c0_i32 = arith.constant 0 : i32
    %c0_i32_0 = arith.constant 0 : i32
    %c0_i32_1 = arith.constant 0 : i32
    return %c0_i32, %c0_i32_0 : i32, i32
  }
  func.func @transform_5(%arg0: i32, %arg1: i32) -> (i32, i32) {
    %c0_i32 = arith.constant 0 : i32
    %c0_i32_0 = arith.constant 0 : i32
    return %arg0, %c0_i32 : i32, i32
  }
}

</mosaic_0001>

<bundles_post_ra>
// kernel: dqn_forward.4
= control target key start
LH: loop header
LB: loop body
LE: loop exit
PB: predicated region body
PF: predicated region fallthrough
CT: control target
= control target key end

     0   :  { %s1295_s12 = smov 0   ;;  %s1297_s13 = smov 0   ;;  %s1599_s0 = inlined_call_operand.vmem [shape: bf16[32,256], index: 0, kind: input, shape index: {}]   ;;  %s1600_s1 = inlined_call_operand.vmem [shape: bf16[256,1024], index: 1, kind: input, shape index: {}]   ;;  %s1601_s2 = inlined_call_operand.vmem [shape: f32[32,1], index: 2, kind: input, shape index: {}]   ;;  %s1602_s3 = inlined_call_operand.vmem [shape: bf16[32,1024], index: 3, kind: output, shape index: {}]  }
   0x1   :  { %s1299_s14 = smov 0  }
   0x2 LB: > { %s1020_s15 = sadd.s32 4294967295, %s1272_s14   ;;  %s1312_s16 = sadd.s32 1, %s1272_s14   ;;  %s1272_s14 = sphi %s1299_s14, %s1606_s14   ;;  %s1268_s13 = sphi %s1297_s13, %s1605_s13   ;;  %s1264_s12 = sphi %s1295_s12, %s1604_s12  }
   0x3   : > { %s38_s17 = ssub.s32 %s1272_s14, %s1312_s16  ;;  %s41_s18 = sadd.s32 1, %s1268_s13 }
   0x4   : > { %p39_p0 = scmp.eq.s32.totalorder %s38_s17, 0  ;;  %p48_p1 = scmp.ne.s32.totalorder %s1268_s13, %s1264_s12 }
   0x5   : > { %p49_p2 = scmp.eq.s32.totalorder %s1272_s14, 0  ;;  %p99_p3 = scmp.eq.s32.totalorder %s1020_s15, 1 }
   0x6   : > { %s1323_s19 = scalar_select %p39_p0, %s1268_s13, %s41_s18  }
   0x7   : > { %p50_p4 = por %p49_p2, %p48_p1  ;;  %p1325_p5 = por %p99_p3, %p48_p1 }
   0x8   : > { %p1023_p6 = scmp.ge.s32.totalorder %s1272_s14, 2 }
   0xa   : > { %127 = sbr.rel (%p1023_p6) target bundleno = 53 (0x35), region = 24 }
  0x11   : > { %130 = sbr.rel (!%p50_p4) target bundleno = 53 (0x35), region = 28  ;;  %s132_s21 = sand.u32 (%p50_p4), 1, %s1268_s13  }
  0x12   : > { %s1111_s22 = sshll.u32 (%p50_p4), %s1272_s14, 4  ;;  %s1024_s23 = sshll.u32 (%p50_p4), %s132_s21, 9 }
  0x13   : > { %s1335_s26 = scalar_lea.vmem (%p50_p4), %s1600_s1, %s1111_s22  ;;  %s1340_s27 = scalar_lea.vmem (%p50_p4), [#allocation2], %s1024_s23 }
  0x14   : > { %v150_v0 = vld [vmem:[%s1335_s26] sm:$0xff] (%p50_p4)  ;;  %v152_v1 = vld [vmem:[%s1335_s26 + $0x8] sm:$0xff] (%p50_p4) }
  0x15   : > { %v154_v2 = vld [vmem:[%s1335_s26 + $0x20] sm:$0xff] (%p50_p4)  ;;  %151 = vst [vmem:[%s1340_s27] sm:$0xff] (%p50_p4), %v150_v0  ;;  %153 = vst [vmem:[%s1340_s27 + $0x8] sm:$0xff] (%p50_p4), %v152_v1  ;;  %v156_v3 = vld [vmem:[%s1335_s26 + $0x28] sm:$0xff] (%p50_p4) }
  0x16   : > { %155 = vst [vmem:[%s1340_s27 + $0x10] sm:$0xff] (%p50_p4), %v154_v2  ;;  %v158_v4 = vld [vmem:[%s1335_s26 + $0x40] sm:$0xff] (%p50_p4)  ;;  %v160_v5 = vld [vmem:[%s1335_s26 + $0x48] sm:$0xff] (%p50_p4)  ;;  %157 = vst [vmem:[%s1340_s27 + $0x18] sm:$0xff] (%p50_p4), %v156_v3 }
  0x17   : > { %159 = vst [vmem:[%s1340_s27 + $0x20] sm:$0xff] (%p50_p4), %v158_v4  ;;  %161 = vst [vmem:[%s1340_s27 + $0x28] sm:$0xff] (%p50_p4), %v160_v5  ;;  %v162_v6 = vld [vmem:[%s1335_s26 + $0x60] sm:$0xff] (%p50_p4)  ;;  %v164_v7 = vld [vmem:[%s1335_s26 + $0x68] sm:$0xff] (%p50_p4) }
  0x18   : > { %v166_v8 = vld [vmem:[%s1335_s26 + $0x80] sm:$0xff]  ;;  %163 = vst [vmem:[%s1340_s27 + $0x30] sm:$0xff] %v162_v6  ;;  %165 = vst [vmem:[%s1340_s27 + $0x38] sm:$0xff] %v164_v7  ;;  %v168_v9 = vld [vmem:[%s1335_s26 + $0x88] sm:$0xff] }
  0x19   : > { %167 = vst [vmem:[%s1340_s27 + $0x40] sm:$0xff] %v166_v8  ;;  %v170_v10 = vld [vmem:[%s1335_s26 + $0xa0] sm:$0xff]  ;;  %v172_v11 = vld [vmem:[%s1335_s26 + $0xa8] sm:$0xff]  ;;  %169 = vst [vmem:[%s1340_s27 + $0x48] sm:$0xff] %v168_v9 }
  0x1a   : > { %171 = vst [vmem:[%s1340_s27 + $0x50] sm:$0xff] %v170_v10  ;;  %173 = vst [vmem:[%s1340_s27 + $0x58] sm:$0xff] %v172_v11  ;;  %v174_v12 = vld [vmem:[%s1335_s26 + $0xc0] sm:$0xff]  ;;  %v176_v13 = vld [vmem:[%s1335_s26 + $0xc8] sm:$0xff] }
  0x1b   : > { %v178_v14 = vld [vmem:[%s1335_s26 + $0xe0] sm:$0xff]  ;;  %175 = vst [vmem:[%s1340_s27 + $0x60] sm:$0xff] %v174_v12  ;;  %177 = vst [vmem:[%s1340_s27 + $0x68] sm:$0xff] %v176_v13  ;;  %v180_v15 = vld [vmem:[%s1335_s26 + $0xe8] sm:$0xff] }
  0x1c   : > { %179 = vst [vmem:[%s1340_s27 + $0x70] sm:$0xff] %v178_v14  ;;  %v182_v16 = vld [vmem:[%s1335_s26 + $0x100] sm:$0xff]  ;;  %v184_v17 = vld [vmem:[%s1335_s26 + $0x108] sm:$0xff]  ;;  %181 = vst [vmem:[%s1340_s27 + $0x78] sm:$0xff] %v180_v15 }
  0x1d   : > { %183 = vst [vmem:[%s1340_s27 + $0x80] sm:$0xff] %v182_v16  ;;  %185 = vst [vmem:[%s1340_s27 + $0x88] sm:$0xff] %v184_v17  ;;  %v186_v18 = vld [vmem:[%s1335_s26 + $0x120] sm:$0xff]  ;;  %v188_v19 = vld [vmem:[%s1335_s26 + $0x128] sm:$0xff] }
  0x1e   : > { %v190_v20 = vld [vmem:[%s1335_s26 + $0x140] sm:$0xff]  ;;  %187 = vst [vmem:[%s1340_s27 + $0x90] sm:$0xff] %v186_v18  ;;  %189 = vst [vmem:[%s1340_s27 + $0x98] sm:$0xff] %v188_v19  ;;  %v192_v21 = vld [vmem:[%s1335_s26 + $0x148] sm:$0xff] }
  0x1f   : > { %191 = vst [vmem:[%s1340_s27 + $0xa0] sm:$0xff] %v190_v20  ;;  %v194_v22 = vld [vmem:[%s1335_s26 + $0x160] sm:$0xff]  ;;  %v196_v23 = vld [vmem:[%s1335_s26 + $0x168] sm:$0xff]  ;;  %193 = vst [vmem:[%s1340_s27 + $0xa8] sm:$0xff] %v192_v21 }
  0x20   : > { %195 = vst [vmem:[%s1340_s27 + $0xb0] sm:$0xff] %v194_v22  ;;  %197 = vst [vmem:[%s1340_s27 + $0xb8] sm:$0xff] %v196_v23  ;;  %v198_v24 = vld [vmem:[%s1335_s26 + $0x180] sm:$0xff]  ;;  %v200_v25 = vld [vmem:[%s1335_s26 + $0x188] sm:$0xff] }
  0x21   : > { %v202_v26 = vld [vmem:[%s1335_s26 + $0x1a0] sm:$0xff]  ;;  %199 = vst [vmem:[%s1340_s27 + $0xc0] sm:$0xff] %v198_v24  ;;  %201 = vst [vmem:[%s1340_s27 + $0xc8] sm:$0xff] %v200_v25  ;;  %v204_v27 = vld [vmem:[%s1335_s26 + $0x1a8] sm:$0xff] }
  0x22   : > { %203 = vst [vmem:[%s1340_s27 + $0xd0] sm:$0xff] %v202_v26  ;;  %v206_v28 = vld [vmem:[%s1335_s26 + $0x1c0] sm:$0xff]  ;;  %v208_v29 = vld [vmem:[%s1335_s26 + $0x1c8] sm:$0xff]  ;;  %205 = vst [vmem:[%s1340_s27 + $0xd8] sm:$0xff] %v204_v27 }
  0x23   : > { %207 = vst [vmem:[%s1340_s27 + $0xe0] sm:$0xff] %v206_v28  ;;  %209 = vst [vmem:[%s1340_s27 + $0xe8] sm:$0xff] %v208_v29  ;;  %v210_v30 = vld [vmem:[%s1335_s26 + $0x1e0] sm:$0xff]  ;;  %v212_v31 = vld [vmem:[%s1335_s26 + $0x1e8] sm:$0xff] }
  0x24   : > { %v214_v32 = vld [vmem:[%s1335_s26 + $0x200] sm:$0xff]  ;;  %211 = vst [vmem:[%s1340_s27 + $0xf0] sm:$0xff] %v210_v30  ;;  %213 = vst [vmem:[%s1340_s27 + $0xf8] sm:$0xff] %v212_v31  ;;  %v216_v33 = vld [vmem:[%s1335_s26 + $0x208] sm:$0xff] }
  0x25   : > { %215 = vst [vmem:[%s1340_s27 + $0x100] sm:$0xff] %v214_v32  ;;  %v218_v34 = vld [vmem:[%s1335_s26 + $0x220] sm:$0xff]  ;;  %v220_v35 = vld [vmem:[%s1335_s26 + $0x228] sm:$0xff]  ;;  %217 = vst [vmem:[%s1340_s27 + $0x108] sm:$0xff] %v216_v33 }
  0x26   : > { %219 = vst [vmem:[%s1340_s27 + $0x110] sm:$0xff] %v218_v34  ;;  %221 = vst [vmem:[%s1340_s27 + $0x118] sm:$0xff] %v220_v35  ;;  %v222_v36 = vld [vmem:[%s1335_s26 + $0x240] sm:$0xff]  ;;  %v224_v37 = vld [vmem:[%s1335_s26 + $0x248] sm:$0xff] }
  0x27   : > { %v226_v38 = vld [vmem:[%s1335_s26 + $0x260] sm:$0xff]  ;;  %223 = vst [vmem:[%s1340_s27 + $0x120] sm:$0xff] %v222_v36  ;;  %225 = vst [vmem:[%s1340_s27 + $0x128] sm:$0xff] %v224_v37  ;;  %v228_v39 = vld [vmem:[%s1335_s26 + $0x268] sm:$0xff] }
  0x28   : > { %227 = vst [vmem:[%s1340_s27 + $0x130] sm:$0xff] %v226_v38  ;;  %v230_v40 = vld [vmem:[%s1335_s26 + $0x280] sm:$0xff]  ;;  %v232_v41 = vld [vmem:[%s1335_s26 + $0x288] sm:$0xff]  ;;  %229 = vst [vmem:[%s1340_s27 + $0x138] sm:$0xff] %v228_v39 }
  0x29   : > { %231 = vst [vmem:[%s1340_s27 + $0x140] sm:$0xff] %v230_v40  ;;  %233 = vst [vmem:[%s1340_s27 + $0x148] sm:$0xff] %v232_v41  ;;  %v234_v42 = vld [vmem:[%s1335_s26 + $0x2a0] sm:$0xff]  ;;  %v236_v43 = vld [vmem:[%s1335_s26 + $0x2a8] sm:$0xff] }
  0x2a   : > { %v238_v44 = vld [vmem:[%s1335_s26 + $0x2c0] sm:$0xff]  ;;  %235 = vst [vmem:[%s1340_s27 + $0x150] sm:$0xff] %v234_v42  ;;  %237 = vst [vmem:[%s1340_s27 + $0x158] sm:$0xff] %v236_v43  ;;  %v240_v45 = vld [vmem:[%s1335_s26 + $0x2c8] sm:$0xff] }
  0x2b   : > { %239 = vst [vmem:[%s1340_s27 + $0x160] sm:$0xff] %v238_v44  ;;  %v242_v46 = vld [vmem:[%s1335_s26 + $0x2e0] sm:$0xff]  ;;  %v244_v47 = vld [vmem:[%s1335_s26 + $0x2e8] sm:$0xff]  ;;  %241 = vst [vmem:[%s1340_s27 + $0x168] sm:$0xff] %v240_v45 }
  0x2c   : > { %243 = vst [vmem:[%s1340_s27 + $0x170] sm:$0xff] %v242_v46  ;;  %245 = vst [vmem:[%s1340_s27 + $0x178] sm:$0xff] %v244_v47  ;;  %v246_v48 = vld [vmem:[%s1335_s26 + $0x300] sm:$0xff]  ;;  %v248_v49 = vld [vmem:[%s1335_s26 + $0x308] sm:$0xff] }
  0x2d   : > { %v250_v50 = vld [vmem:[%s1335_s26 + $0x320] sm:$0xff]  ;;  %247 = vst [vmem:[%s1340_s27 + $0x180] sm:$0xff] %v246_v48  ;;  %249 = vst [vmem:[%s1340_s27 + $0x188] sm:$0xff] %v248_v49  ;;  %v252_v51 = vld [vmem:[%s1335_s26 + $0x328] sm:$0xff] }
  0x2e   : > { %251 = vst [vmem:[%s1340_s27 + $0x190] sm:$0xff] %v250_v50  ;;  %v254_v52 = vld [vmem:[%s1335_s26 + $0x340] sm:$0xff]  ;;  %v256_v53 = vld [vmem:[%s1335_s26 + $0x348] sm:$0xff]  ;;  %253 = vst [vmem:[%s1340_s27 + $0x198] sm:$0xff] %v252_v51 }
  0x2f   : > { %255 = vst [vmem:[%s1340_s27 + $0x1a0] sm:$0xff] %v254_v52  ;;  %257 = vst [vmem:[%s1340_s27 + $0x1a8] sm:$0xff] %v256_v53  ;;  %v258_v54 = vld [vmem:[%s1335_s26 + $0x360] sm:$0xff]  ;;  %v260_v55 = vld [vmem:[%s1335_s26 + $0x368] sm:$0xff] }
  0x30   : > { %v262_v56 = vld [vmem:[%s1335_s26 + $0x380] sm:$0xff]  ;;  %259 = vst [vmem:[%s1340_s27 + $0x1b0] sm:$0xff] %v258_v54  ;;  %261 = vst [vmem:[%s1340_s27 + $0x1b8] sm:$0xff] %v260_v55  ;;  %v264_v57 = vld [vmem:[%s1335_s26 + $0x388] sm:$0xff] }
  0x31   : > { %263 = vst [vmem:[%s1340_s27 + $0x1c0] sm:$0xff] %v262_v56  ;;  %v266_v58 = vld [vmem:[%s1335_s26 + $0x3a0] sm:$0xff]  ;;  %v268_v59 = vld [vmem:[%s1335_s26 + $0x3a8] sm:$0xff]  ;;  %265 = vst [vmem:[%s1340_s27 + $0x1c8] sm:$0xff] %v264_v57 }
  0x32   : > { %267 = vst [vmem:[%s1340_s27 + $0x1d0] sm:$0xff] %v266_v58  ;;  %269 = vst [vmem:[%s1340_s27 + $0x1d8] sm:$0xff] %v268_v59  ;;  %v270_v60 = vld [vmem:[%s1335_s26 + $0x3c0] sm:$0xff]  ;;  %v272_v61 = vld [vmem:[%s1335_s26 + $0x3c8] sm:$0xff] }
  0x33   : > { %v274_v62 = vld [vmem:[%s1335_s26 + $0x3e0] sm:$0xff]  ;;  %271 = vst [vmem:[%s1340_s27 + $0x1e0] sm:$0xff] %v270_v60  ;;  %273 = vst [vmem:[%s1340_s27 + $0x1e8] sm:$0xff] %v272_v61  ;;  %v276_v63 = vld [vmem:[%s1335_s26 + $0x3e8] sm:$0xff] }
  0x34   : > { %275 = vst [vmem:[%s1340_s27 + $0x1f0] sm:$0xff] %v274_v62  ;;  %277 = vst [vmem:[%s1340_s27 + $0x1f8] sm:$0xff] %v276_v63 }
  0x35 PF: > { %p1027_p7 = scmp.ge.s32.totalorder %s1272_s14, 1  ;;  %p282_p8 = scmp.lt.s32.totalorder %s1272_s14, 3 }
  0x37   : > { %p283_p9 = pnand %p1027_p7, %p282_p8 }
  0x38   : > { %s289_s28 = sand.u32 (!%p283_p9), 1, %s1264_s12   ;;  %v1246_v0 = vld [vmem:[%s1599_s0 + $0x4] ss:$8 sps:$4 sm:$0xff] (!%p283_p9)   ;;  %v1274_v1 = vmov (!%p283_p9), 0   ;;  %v383_v50 = vld [vmem:[%s1601_s2 + $0x10] sm:$0xff] (!%p283_p9)  ;;  %v384_v55 = vld [vmem:[%s1601_s2 + $0x18] sm:$0xff] (!%p283_p9) }
  0x39   : > { %286 = sbr.rel (%p283_p9) target bundleno = 362 (0x16a), region = 51  ;;  %s1028_s29 = sshll.u32 (!%p283_p9), %s289_s28, 9  ;;  %1146 = vset.pattern.permute.xlu0 (!%p283_p9), %v1274_v1  ;;  %1147 = vset.pattern.permute.xlu1 (!%p283_p9), %v1274_v1  ;;  %v381_v2 = vld [vmem:[%s1601_s2] sm:$0xff] (!%p283_p9)  ;;  %v382_v49 = vld [vmem:[%s1601_s2 + $0x8] sm:$0xff] (!%p283_p9) }
  0x3a   : > { %s1478_s7 = scalar_lea.vmem (!%p283_p9), [#allocation2], %s1028_s29  ;;  %777 = vmatprep.mubr.bf16.mxu0 (!%p283_p9), %v1246_v0  ;;  %830 = vmatprep.mubr.bf16.mxu1 (!%p283_p9), %v1246_v0  ;;  %s1029_s27 = sshll.u32 (!%p283_p9), %s289_s28, 6 }
  0x3b   : > { %v1148_v3 = vld [vmem:[%s1478_s7 + $0x4] ss:$16 sps:$4 sm:$0xff] (!%p283_p9)   ;;  %v1150_v4 = vld [vmem:[%s1478_s7 + $0xc] ss:$16 sps:$4 sm:$0xff] (!%p283_p9)   ;;  %387 = vperm.xlu0 (!%p283_p9), %1146, %v381_v2   ;;  %v1152_v5 = vld [vmem:[%s1478_s7] ss:$16 sps:$4 sm:$0xff] (!%p283_p9)   ;;  %397 = vperm.xlu1 (!%p283_p9), %1147, %v383_v50  }
  0x3c   : > { %745 = vmatprep.subr.bf16.mxu0 (!%p283_p9), %v1148_v3  ;;  %v1153_v6 = vld [vmem:[%s1478_s7 + $0x8] ss:$16 sps:$4 sm:$0xff] (!%p283_p9)   ;;  %798 = vmatprep.subr.bf16.mxu1 (!%p283_p9), %v1150_v4  ;;  %v1154_v7 = vld [vmem:[%s1478_s7 + $0x24] ss:$16 sps:$4 sm:$0xff] (!%p283_p9)   ;;  %v1156_v8 = vld [vmem:[%s1478_s7 + $0x2c] ss:$16 sps:$4 sm:$0xff] (!%p283_p9)  }
  0x3d   : > { %746 = vmatpush1.bf16.msra.mxu0 (!%p283_p9), %v1152_v5  ;;  %799 = vmatpush1.bf16.msra.mxu1 (!%p283_p9), %v1153_v6  ;;  %v1158_v9 = vld [vmem:[%s1478_s7 + $0x20] ss:$16 sps:$4 sm:$0xff] (!%p283_p9)   ;;  %v1159_v10 = vld [vmem:[%s1478_s7 + $0x28] ss:$16 sps:$4 sm:$0xff] (!%p283_p9)   ;;  %v1160_v11 = vld [vmem:[%s1478_s7 + $0x44] ss:$16 sps:$4 sm:$0xff] (!%p283_p9)  }
  0x3e   : > { %747 = vmatprep.subr.bf16.mxu0 (!%p283_p9), %v1154_v7  ;;  %800 = vmatprep.subr.bf16.mxu1 (!%p283_p9), %v1156_v8  ;;  %v1162_v12 = vld [vmem:[%s1478_s7 + $0x4c] ss:$16 sps:$4 sm:$0xff] (!%p283_p9)   ;;  %v1164_v13 = vld [vmem:[%s1478_s7 + $0x40] ss:$16 sps:$4 sm:$0xff] (!%p283_p9)   ;;  %v1165_v14 = vld [vmem:[%s1478_s7 + $0x48] ss:$16 sps:$4 sm:$0xff] (!%p283_p9)  }
  0x3f   : > { %v1166_v15 = vld [vmem:[%s1478_s7 + $0x64] ss:$16 sps:$4 sm:$0xff] (!%p283_p9)   ;;  %v1168_v16 = vld [vmem:[%s1478_s7 + $0x6c] ss:$16 sps:$4 sm:$0xff] (!%p283_p9)   ;;  %v1170_v17 = vld [vmem:[%s1478_s7 + $0x60] ss:$16 sps:$4 sm:$0xff] (!%p283_p9)   ;;  %392 = vperm.xlu0 (!%p283_p9), %1146, %v382_v49   ;;  %402 = vperm.xlu1 (!%p283_p9), %1147, %v384_v55  }
  0x40   : > { %v1171_v18 = vld [vmem:[%s1478_s7 + $0x68] ss:$16 sps:$4 sm:$0xff]   ;;  %v1172_v19 = vld [vmem:[%s1478_s7 + $0x84] ss:$16 sps:$4 sm:$0xff]   ;;  %v1174_v20 = vld [vmem:[%s1478_s7 + $0x8c] ss:$16 sps:$4 sm:$0xff]  }
  0x41   : > { %748 = vmatpush1.bf16.msra.mxu0 %v1158_v9  ;;  %801 = vmatpush1.bf16.msra.mxu1 %v1159_v10  ;;  %v1176_v21 = vld [vmem:[%s1478_s7 + $0x80] ss:$16 sps:$4 sm:$0xff]   ;;  %v1177_v22 = vld [vmem:[%s1478_s7 + $0x88] ss:$16 sps:$4 sm:$0xff]   ;;  %v1178_v23 = vld [vmem:[%s1478_s7 + $0xa4] ss:$16 sps:$4 sm:$0xff]  }
  0x42   : > { %749 = vmatprep.subr.bf16.mxu0 %v1160_v11  ;;  %802 = vmatprep.subr.bf16.mxu1 %v1162_v12  ;;  %v1180_v24 = vld [vmem:[%s1478_s7 + $0xac] ss:$16 sps:$4 sm:$0xff]   ;;  %v1182_v25 = vld [vmem:[%s1478_s7 + $0xa0] ss:$16 sps:$4 sm:$0xff]   ;;  %v1183_v26 = vld [vmem:[%s1478_s7 + $0xa8] ss:$16 sps:$4 sm:$0xff]  }
  0x43   : > { %v1184_v27 = vld [vmem:[%s1478_s7 + $0xc4] ss:$16 sps:$4 sm:$0xff]   ;;  %v1186_v28 = vld [vmem:[%s1478_s7 + $0xcc] ss:$16 sps:$4 sm:$0xff]   ;;  %v1188_v29 = vld [vmem:[%s1478_s7 + $0xc0] ss:$16 sps:$4 sm:$0xff]  }
  0x44   : > { %v1189_v30 = vld [vmem:[%s1478_s7 + $0xc8] ss:$16 sps:$4 sm:$0xff]   ;;  %v1190_v31 = vld [vmem:[%s1478_s7 + $0xe4] ss:$16 sps:$4 sm:$0xff]   ;;  %v1192_v32 = vld [vmem:[%s1478_s7 + $0xec] ss:$16 sps:$4 sm:$0xff]  }
  0x45   : > { %750 = vmatpush1.bf16.msra.mxu0 %v1164_v13  ;;  %803 = vmatpush1.bf16.msra.mxu1 %v1165_v14  ;;  %v1194_v33 = vld [vmem:[%s1478_s7 + $0xe0] ss:$16 sps:$4 sm:$0xff]   ;;  %v1195_v34 = vld [vmem:[%s1478_s7 + $0xe8] ss:$16 sps:$4 sm:$0xff]   ;;  %v1196_v35 = vld [vmem:[%s1478_s7 + $0x104] ss:$16 sps:$4 sm:$0xff]  }
  0x46   : > { %751 = vmatprep.subr.bf16.mxu0 %v1166_v15  ;;  %804 = vmatprep.subr.bf16.mxu1 %v1168_v16  ;;  %v1198_v36 = vld [vmem:[%s1478_s7 + $0x10c] ss:$16 sps:$4 sm:$0xff]   ;;  %v1200_v37 = vld [vmem:[%s1478_s7 + $0x100] ss:$16 sps:$4 sm:$0xff]   ;;  %v1201_v38 = vld [vmem:[%s1478_s7 + $0x108] ss:$16 sps:$4 sm:$0xff]  }
  0x47   : > { %v1202_v39 = vld [vmem:[%s1478_s7 + $0x124] ss:$16 sps:$4 sm:$0xff]   ;;  %v1204_v40 = vld [vmem:[%s1478_s7 + $0x12c] ss:$16 sps:$4 sm:$0xff]   ;;  %v1206_v41 = vld [vmem:[%s1478_s7 + $0x120] ss:$16 sps:$4 sm:$0xff]  }
  0x48   : > { %v1207_v42 = vld [vmem:[%s1478_s7 + $0x128] ss:$16 sps:$4 sm:$0xff]   ;;  %v1208_v43 = vld [vmem:[%s1478_s7 + $0x144] ss:$16 sps:$4 sm:$0xff]   ;;  %v1210_v44 = vld [vmem:[%s1478_s7 + $0x14c] ss:$16 sps:$4 sm:$0xff]  }
  0x49   : > { %752 = vmatpush1.bf16.msra.mxu0 %v1170_v17  ;;  %805 = vmatpush1.bf16.msra.mxu1 %v1171_v18  ;;  %v1212_v45 = vld [vmem:[%s1478_s7 + $0x140] ss:$16 sps:$4 sm:$0xff]   ;;  %v1213_v46 = vld [vmem:[%s1478_s7 + $0x148] ss:$16 sps:$4 sm:$0xff]   ;;  %v1214_v47 = vld [vmem:[%s1478_s7 + $0x164] ss:$16 sps:$4 sm:$0xff]  }
  0x4a   : > { %753 = vmatprep.subr.bf16.mxu0 %v1172_v19  ;;  %806 = vmatprep.subr.bf16.mxu1 %v1174_v20  ;;  %v1216_v48 = vld [vmem:[%s1478_s7 + $0x16c] ss:$16 sps:$4 sm:$0xff]   ;;  %v1218_v51 = vld [vmem:[%s1478_s7 + $0x160] ss:$16 sps:$4 sm:$0xff]   ;;  %v1219_v52 = vld [vmem:[%s1478_s7 + $0x168] ss:$16 sps:$4 sm:$0xff]  }
  0x4b   : > { %v1220_v53 = vld [vmem:[%s1478_s7 + $0x184] ss:$16 sps:$4 sm:$0xff]   ;;  %v1222_v54 = vld [vmem:[%s1478_s7 + $0x18c] ss:$16 sps:$4 sm:$0xff]   ;;  %v1224_v56 = vld [vmem:[%s1478_s7 + $0x180] ss:$16 sps:$4 sm:$0xff]  }
  0x4c   : > { %v1225_v57 = vld [vmem:[%s1478_s7 + $0x188] ss:$16 sps:$4 sm:$0xff]   ;;  %v1226_v58 = vld [vmem:[%s1478_s7 + $0x1a4] ss:$16 sps:$4 sm:$0xff]   ;;  %v1228_v59 = vld [vmem:[%s1478_s7 + $0x1ac] ss:$16 sps:$4 sm:$0xff]  }
  0x4d   : > { %754 = vmatpush1.bf16.msra.mxu0 %v1176_v21  ;;  %807 = vmatpush1.bf16.msra.mxu1 %v1177_v22  ;;  %v1230_v60 = vld [vmem:[%s1478_s7 + $0x1a0] ss:$16 sps:$4 sm:$0xff]   ;;  %v1231_v61 = vld [vmem:[%s1478_s7 + $0x1a8] ss:$16 sps:$4 sm:$0xff]   ;;  %v1232_v62 = vld [vmem:[%s1478_s7 + $0x1c4] ss:$16 sps:$4 sm:$0xff]  }
  0x4e   : > { %755 = vmatprep.subr.bf16.mxu0 %v1178_v23  ;;  %808 = vmatprep.subr.bf16.mxu1 %v1180_v24  ;;  %v1234_v63 = vld [vmem:[%s1478_s7 + $0x1cc] ss:$16 sps:$4 sm:$0xff]   ;;  %v1236_v0 = vld [vmem:[%s1478_s7 + $0x1c0] ss:$16 sps:$4 sm:$0xff]   ;;  %v1237_v1 = vld [vmem:[%s1478_s7 + $0x1c8] ss:$16 sps:$4 sm:$0xff]  }
  0x4f   : > { %v1238_v2 = vld [vmem:[%s1478_s7 + $0x1e4] ss:$16 sps:$4 sm:$0xff]   ;;  %v1240_v3 = vld [vmem:[%s1478_s7 + $0x1ec] ss:$16 sps:$4 sm:$0xff]   ;;  %v1242_v4 = vld [vmem:[%s1478_s7 + $0x1e0] ss:$16 sps:$4 sm:$0xff]  }
  0x50   : > { %v1243_v5 = vld [vmem:[%s1478_s7 + $0x1e8] ss:$16 sps:$4 sm:$0xff]   ;;  %v1247_v7 = vld [vmem:[%s1599_s0 + $0x14] ss:$8 sps:$4 sm:$0xff]   ;;  %s1564_s12 = scalar_lea.vmem [#allocation3], %s1029_s27  ;;  %s1120_s28 = sshll.u32 (%p1325_p5), %s1020_s15, 4 }
  0x51   : > { %756 = vmatpush1.bf16.msra.mxu0 %v1182_v25  ;;  %809 = vmatpush1.bf16.msra.mxu1 %v1183_v26  ;;  %v1244_v6 = vld [vmem:[%s1599_s0] ss:$8 sps:$4 sm:$0xff]   ;;  %v1249_v8 = vld [vmem:[%s1599_s0 + $0x10] ss:$8 sps:$4 sm:$0xff]   ;;  %s932_s4 = scalar_lea.vmem (%p1325_p5), %s1602_s3, %s1120_s28 }
  0x52   : > { %757 = vmatprep.subr.bf16.mxu0 %v1184_v27  ;;  %810 = vmatprep.subr.bf16.mxu1 %v1186_v28 }
  0x55   : > { %758 = vmatpush1.bf16.msra.mxu0 %v1188_v29  ;;  %811 = vmatpush1.bf16.msra.mxu1 %v1189_v30 }
  0x56   : > { %759 = vmatprep.subr.bf16.mxu0 %v1190_v31  ;;  %812 = vmatprep.subr.bf16.mxu1 %v1192_v32 }
  0x59   : > { %760 = vmatpush1.bf16.msra.mxu0 %v1194_v33  ;;  %813 = vmatpush1.bf16.msra.mxu1 %v1195_v34 }
  0x5a   : > { %761 = vmatprep.subr.bf16.mxu0 %v1196_v35  ;;  %814 = vmatprep.subr.bf16.mxu1 %v1198_v36 }
  0x5d   : > { %762 = vmatpush1.bf16.msra.mxu0 %v1200_v37  ;;  %815 = vmatpush1.bf16.msra.mxu1 %v1201_v38 }
  0x5e   : > { %763 = vmatprep.subr.bf16.mxu0 %v1202_v39  ;;  %816 = vmatprep.subr.bf16.mxu1 %v1204_v40 }
  0x61   : > { %764 = vmatpush1.bf16.msra.mxu0 %v1206_v41  ;;  %817 = vmatpush1.bf16.msra.mxu1 %v1207_v42 }
  0x62   : > { %765 = vmatprep.subr.bf16.mxu0 %v1208_v43  ;;  %818 = vmatprep.subr.bf16.mxu1 %v1210_v44 }
  0x65   : > { %766 = vmatpush1.bf16.msra.mxu0 %v1212_v45  ;;  %819 = vmatpush1.bf16.msra.mxu1 %v1213_v46 }
  0x66   : > { %767 = vmatprep.subr.bf16.mxu0 %v1214_v47  ;;  %820 = vmatprep.subr.bf16.mxu1 %v1216_v48 }
  0x69   : > { %768 = vmatpush1.bf16.msra.mxu0 %v1218_v51  ;;  %821 = vmatpush1.bf16.msra.mxu1 %v1219_v52 }
  0x6a   : > { %769 = vmatprep.subr.bf16.mxu0 %v1220_v53  ;;  %822 = vmatprep.subr.bf16.mxu1 %v1222_v54 }
  0x6d   : > { %770 = vmatpush1.bf16.msra.mxu0 %v1224_v56  ;;  %823 = vmatpush1.bf16.msra.mxu1 %v1225_v57 }
  0x6e   : > { %771 = vmatprep.subr.bf16.mxu0 %v1226_v58  ;;  %824 = vmatprep.subr.bf16.mxu1 %v1228_v59 }
  0x71   : > { %772 = vmatpush1.bf16.msra.mxu0 %v1230_v60  ;;  %825 = vmatpush1.bf16.msra.mxu1 %v1231_v61 }
  0x72   : > { %773 = vmatprep.subr.bf16.mxu0 %v1232_v62  ;;  %826 = vmatprep.subr.bf16.mxu1 %v1234_v63 }
  0x75   : > { %774 = vmatpush1.bf16.msra.mxu0 %v1236_v0  ;;  %827 = vmatpush1.bf16.msra.mxu1 %v1237_v1 }
  0x76   : > { %775 = vmatprep.subr.bf16.mxu0 %v1238_v2  ;;  %828 = vmatprep.subr.bf16.mxu1 %v1240_v3 }
  0x79   : > { %776 = vmatpush1.bf16.msra.mxu0 %v1242_v4  ;;  %829 = vmatpush1.bf16.msra.mxu1 %v1243_v5 }
  0x7c   : > { %778 = vmatmul.mubr.bf16.vlgmr.msra.gmra.mrb[0].mxu0 %v1244_v6  ;;  %831 = vmatmul.mubr.bf16.vlgmr.msra.gmra.mrb[0].mxu1 %v1244_v6 }
  0x7d   : > { %787 = vmatprep.mubr.bf16.mxu0 %v1247_v7  ;;  %840 = vmatprep.mubr.bf16.mxu1 %v1247_v7 }
  0x84   : > { %788 = vmatmul.mubr.bf16.gmra.mrb[4].mxu0 %v1249_v8  ;;  %841 = vmatmul.mubr.bf16.gmra.mrb[4].mxu1 %v1249_v8 }
  0xba   : > { %v388_v9 = vpop.permute.xlu0 %387  ;;  %v398_v11 = vpop.permute.xlu1 %397 }
  0xbe   : > { %v393_v10 = vpop.permute.xlu0 %392  ;;  %v403_v38 = vpop.permute.xlu1 %402 }
 0x14f   : > { %v779_v12 = vpop.f32.mrb[0].mxu0  ;;  %v832_v13 = vpop.f32.mrb[0].mxu1 }
 0x150   : > { %v780_v14 = vadd.f32 %v779_v12, %v388_v9  ;;  %v833_v15 = vadd.f32 %v832_v13, %v388_v9  ;;  %v781_v16 = vpop.f32.mrb[1].mxu0  ;;  %v834_v17 = vpop.f32.mrb[1].mxu1 }
 0x151   : > { %v782_v18 = vadd.f32 %v781_v16, %v388_v9  ;;  %v835_v19 = vadd.f32 %v834_v17, %v388_v9  ;;  %v783_v20 = vpop.f32.mrb[2].mxu0  ;;  %v836_v21 = vpop.f32.mrb[2].mxu1 }
 0x152   : > { %v851_v22 = vmax.f32 %v780_v14, 0.0  ;;  %v853_v23 = vmax.f32 %v833_v15, 0.0  ;;  %v784_v24 = vadd.f32 %v783_v20, %v393_v10  ;;  %v837_v25 = vadd.f32 %v836_v21, %v393_v10  ;;  %v785_v26 = vpop.f32.mrb[3].mxu0  ;;  %v838_v27 = vpop.f32.mrb[3].mxu1 }
 0x153   : > { %v852_v28 = vmax.f32 %v782_v18, 0.0  ;;  %v854_v29 = vmax.f32 %v835_v19, 0.0  ;;  %v786_v30 = vadd.f32 %v785_v26, %v393_v10  ;;  %v839_v31 = vadd.f32 %v838_v27, %v393_v10 }
 0x154   : > { %v855_v32 = vmax.f32 %v784_v24, 0.0  ;;  %v857_v33 = vmax.f32 %v837_v25, 0.0 }
 0x155   : > { %v1112_v34 = vpack.c.bf16 %v852_v28, %v851_v22  ;;  %v1113_v35 = vpack.c.bf16 %v854_v29, %v853_v23  ;;  %v856_v36 = vmax.f32 %v786_v30, 0.0  ;;  %v858_v37 = vmax.f32 %v839_v31, 0.0 }
 0x157   : > { %915 = vst [vmem:[%s1564_s12] sm:$0xff] %v1112_v34  ;;  %916 = vst [vmem:[%s1564_s12 + $0x8] sm:$0xff] %v1113_v35  ;;  %v1114_v39 = vpack.c.bf16 %v856_v36, %v855_v32  ;;  %v1115_v40 = vpack.c.bf16 %v858_v37, %v857_v33  ;;  %v789_v41 = vpop.f32.mrb[4].mxu0  ;;  %v842_v42 = vpop.f32.mrb[4].mxu1 }
 0x158   : > { %v790_v43 = vadd.f32 %v789_v41, %v398_v11  ;;  %v843_v44 = vadd.f32 %v842_v42, %v398_v11  ;;  %v791_v45 = vpop.f32.mrb[5].mxu0  ;;  %v844_v46 = vpop.f32.mrb[5].mxu1 }
 0x159   : > { %917 = vst [vmem:[%s1564_s12 + $0x10] sm:$0xff] %v1114_v39  ;;  %918 = vst [vmem:[%s1564_s12 + $0x18] sm:$0xff] %v1115_v40  ;;  %v792_v47 = vadd.f32 %v791_v45, %v398_v11  ;;  %v845_v48 = vadd.f32 %v844_v46, %v398_v11  ;;  %v793_v49 = vpop.f32.mrb[6].mxu0  ;;  %v846_v50 = vpop.f32.mrb[6].mxu1 }
 0x15a   : > { %v859_v51 = vmax.f32 %v790_v43, 0.0  ;;  %v861_v52 = vmax.f32 %v843_v44, 0.0  ;;  %v794_v53 = vadd.f32 %v793_v49, %v403_v38  ;;  %v847_v54 = vadd.f32 %v846_v50, %v403_v38  ;;  %v795_v55 = vpop.f32.mrb[7].mxu0  ;;  %v848_v56 = vpop.f32.mrb[7].mxu1 }
 0x15b   : > { %v860_v57 = vmax.f32 %v792_v47, 0.0  ;;  %v862_v58 = vmax.f32 %v845_v48, 0.0  ;;  %v796_v59 = vadd.f32 %v795_v55, %v403_v38  ;;  %v849_v60 = vadd.f32 %v848_v56, %v403_v38  ;;  %929 = sbr.rel (!%p1325_p5) target bundleno = 362 (0x16a), region = 59 }
 0x15c   : > { %v863_v61 = vmax.f32 %v794_v53, 0.0  ;;  %v865_v62 = vmax.f32 %v847_v54, 0.0 }
 0x15d   : > { %v1116_v63 = vpack.c.bf16 %v860_v57, %v859_v51  ;;  %v1117_v0 = vpack.c.bf16 %v862_v58, %v861_v52  ;;  %v864_v1 = vmax.f32 %v796_v59, 0.0  ;;  %v866_v2 = vmax.f32 %v849_v60, 0.0 }
 0x15e   : > { %v945_v5 = vld [vmem:[%s1564_s12] sm:$0xff] (%p1325_p5)  ;;  %v947_v6 = vld [vmem:[%s1564_s12 + $0x8] sm:$0xff] (%p1325_p5) }
 0x15f   : > { %919 = vst [vmem:[%s1564_s12 + $0x20] sm:$0xff] %v1116_v63  ;;  %920 = vst [vmem:[%s1564_s12 + $0x28] sm:$0xff] %v1117_v0  ;;  %v1118_v3 = vpack.c.bf16 %v864_v1, %v863_v61  ;;  %v1119_v4 = vpack.c.bf16 %v866_v2, %v865_v62 }
 0x160   : > { %v949_v7 = vld [vmem:[%s1564_s12 + $0x10] sm:$0xff] (%p1325_p5)  ;;  %v951_v8 = vld [vmem:[%s1564_s12 + $0x18] sm:$0xff] (%p1325_p5)  ;;  %946 = vst [vmem:[%s932_s4] sm:$0xff] (%p1325_p5), %v945_v5  ;;  %948 = vst [vmem:[%s932_s4 + $0x8] sm:$0xff] (%p1325_p5), %v947_v6 }
 0x161   : > { %921 = vst [vmem:[%s1564_s12 + $0x30] sm:$0xff] %v1118_v3  ;;  %922 = vst [vmem:[%s1564_s12 + $0x38] sm:$0xff] %v1119_v4 }
 0x162   : > { %950 = vst [vmem:[%s932_s4 + $0x20] sm:$0xff] %v949_v7  ;;  %952 = vst [vmem:[%s932_s4 + $0x28] sm:$0xff] %v951_v8 }
 0x166   : > { %v953_v9 = vld [vmem:[%s1564_s12 + $0x20] sm:$0xff]  ;;  %v955_v10 = vld [vmem:[%s1564_s12 + $0x28] sm:$0xff] }
 0x167   : > { %954 = vst [vmem:[%s932_s4 + $0x40] sm:$0xff] %v953_v9  ;;  %956 = vst [vmem:[%s932_s4 + $0x48] sm:$0xff] %v955_v10 }
 0x168   : > { %v957_v11 = vld [vmem:[%s1564_s12 + $0x30] sm:$0xff]  ;;  %v959_v12 = vld [vmem:[%s1564_s12 + $0x38] sm:$0xff] }
 0x169   : > { %958 = vst [vmem:[%s932_s4 + $0x60] sm:$0xff] %v957_v11  ;;  %960 = vst [vmem:[%s932_s4 + $0x68] sm:$0xff] %v959_v12 }
 0x16a PF: > { %p10_p10 = scmp.ge.s32.totalorder %s1312_s16, 4   ;;  %s1604_s12 = smov %s1268_s13 }
 0x16b   : > { %s1605_s13 = smov %s1323_s19  ;;  %s1606_s14 = smov %s1312_s16 }
 0x16c   :  { %12 = sbr.rel (!%p10_p10) target bundleno = 2 (0x2), region = 113 }

// kernel: dqn_forward.5
= control target key start
LH: loop header
LB: loop body
LE: loop exit
PB: predicated region body
PF: predicated region fallthrough
CT: control target
= control target key end

     0   :  { %v1015_v1 = vmov 0   ;;  %s1324_s1 = inlined_call_operand.vmem [shape: bf16[512,256], index: 1, kind: input, shape index: {}]   ;;  %s1325_s0 = inlined_call_operand.vmem [shape: bf16[64,512], index: 0, kind: input, shape index: {}]   ;;  %s1326_s2 = inlined_call_operand.vmem [shape: f32[64,1], index: 2, kind: input, shape index: {}]   ;;  %s1327_s3 = inlined_call_operand.vmem [shape: bf16[64,256], index: 3, kind: output, shape index: {}]  }
   0x1   :  { %v895_v0 = vld [vmem:[%s1324_s1 + $0x4] ss:$8 sps:$4 sm:$0xff]   ;;  %893 = vset.pattern.permute.xlu0 %v1015_v1  ;;  %894 = vset.pattern.permute.xlu1 %v1015_v1  ;;  %v899_v3 = vld [vmem:[%s1324_s1] ss:$8 sps:$4 sm:$0xff]   ;;  %v901_v5 = vld [vmem:[%s1324_s1 + $0x14] ss:$8 sps:$4 sm:$0xff]  }
   0x2   :  { %v897_v2 = vld [vmem:[%s1324_s1 + $0x104] ss:$8 sps:$4 sm:$0xff]   ;;  %542 = vmatprep.subr.bf16.mxu1 %v895_v0  ;;  %v900_v4 = vld [vmem:[%s1324_s1 + $0x100] ss:$8 sps:$4 sm:$0xff]   ;;  %v903_v6 = vld [vmem:[%s1324_s1 + $0x114] ss:$8 sps:$4 sm:$0xff]  }
   0x3   :  { %615 = vmatprep.subr.bf16.mxu0 %v897_v2  ;;  %543 = vmatpush1.bf16.msra.mxu1 %v899_v3  ;;  %v905_v7 = vld [vmem:[%s1324_s1 + $0x10] ss:$8 sps:$4 sm:$0xff]   ;;  %v907_v9 = vld [vmem:[%s1324_s1 + $0x24] ss:$8 sps:$4 sm:$0xff]   ;;  %v911_v11 = vld [vmem:[%s1324_s1 + $0x20] ss:$8 sps:$4 sm:$0xff]  }
   0x4   :  { %616 = vmatpush1.bf16.msra.mxu0 %v900_v4  ;;  %544 = vmatprep.subr.bf16.mxu1 %v901_v5  ;;  %v906_v8 = vld [vmem:[%s1324_s1 + $0x110] ss:$8 sps:$4 sm:$0xff]   ;;  %v909_v10 = vld [vmem:[%s1324_s1 + $0x124] ss:$8 sps:$4 sm:$0xff]   ;;  %v912_v12 = vld [vmem:[%s1324_s1 + $0x120] ss:$8 sps:$4 sm:$0xff]  }
   0x5   :  { %617 = vmatprep.subr.bf16.mxu0 %v903_v6  ;;  %v913_v13 = vld [vmem:[%s1324_s1 + $0x34] ss:$8 sps:$4 sm:$0xff]   ;;  %v917_v15 = vld [vmem:[%s1324_s1 + $0x30] ss:$8 sps:$4 sm:$0xff]   ;;  %v919_v17 = vld [vmem:[%s1324_s1 + $0x44] ss:$8 sps:$4 sm:$0xff]  }
   0x6   :  { %v915_v14 = vld [vmem:[%s1324_s1 + $0x134] ss:$8 sps:$4 sm:$0xff]   ;;  %v918_v16 = vld [vmem:[%s1324_s1 + $0x130] ss:$8 sps:$4 sm:$0xff]   ;;  %v921_v18 = vld [vmem:[%s1324_s1 + $0x144] ss:$8 sps:$4 sm:$0xff]  }
   0x7   :  { %545 = vmatpush1.bf16.msra.mxu1 %v905_v7  ;;  %v923_v19 = vld [vmem:[%s1324_s1 + $0x40] ss:$8 sps:$4 sm:$0xff]   ;;  %v925_v21 = vld [vmem:[%s1324_s1 + $0x54] ss:$8 sps:$4 sm:$0xff]   ;;  %v929_v23 = vld [vmem:[%s1324_s1 + $0x50] ss:$8 sps:$4 sm:$0xff]  }
   0x8   :  { %618 = vmatpush1.bf16.msra.mxu0 %v906_v8  ;;  %546 = vmatprep.subr.bf16.mxu1 %v907_v9  ;;  %v924_v20 = vld [vmem:[%s1324_s1 + $0x140] ss:$8 sps:$4 sm:$0xff]   ;;  %v927_v22 = vld [vmem:[%s1324_s1 + $0x154] ss:$8 sps:$4 sm:$0xff]   ;;  %v930_v24 = vld [vmem:[%s1324_s1 + $0x150] ss:$8 sps:$4 sm:$0xff]  }
   0x9   :  { %619 = vmatprep.subr.bf16.mxu0 %v909_v10  ;;  %v931_v25 = vld [vmem:[%s1324_s1 + $0x64] ss:$8 sps:$4 sm:$0xff]   ;;  %v935_v27 = vld [vmem:[%s1324_s1 + $0x60] ss:$8 sps:$4 sm:$0xff]   ;;  %v937_v29 = vld [vmem:[%s1324_s1 + $0x74] ss:$8 sps:$4 sm:$0xff]  }
   0xa   :  { %v933_v26 = vld [vmem:[%s1324_s1 + $0x164] ss:$8 sps:$4 sm:$0xff]   ;;  %v936_v28 = vld [vmem:[%s1324_s1 + $0x160] ss:$8 sps:$4 sm:$0xff]   ;;  %v939_v30 = vld [vmem:[%s1324_s1 + $0x174] ss:$8 sps:$4 sm:$0xff]  }
   0xb   :  { %547 = vmatpush1.bf16.msra.mxu1 %v911_v11  ;;  %v941_v31 = vld [vmem:[%s1324_s1 + $0x70] ss:$8 sps:$4 sm:$0xff]   ;;  %v943_v33 = vld [vmem:[%s1324_s1 + $0x84] ss:$8 sps:$4 sm:$0xff]   ;;  %v947_v35 = vld [vmem:[%s1324_s1 + $0x80] ss:$8 sps:$4 sm:$0xff]  }
   0xc   :  { %620 = vmatpush1.bf16.msra.mxu0 %v912_v12  ;;  %548 = vmatprep.subr.bf16.mxu1 %v913_v13  ;;  %v942_v32 = vld [vmem:[%s1324_s1 + $0x170] ss:$8 sps:$4 sm:$0xff]   ;;  %v945_v34 = vld [vmem:[%s1324_s1 + $0x184] ss:$8 sps:$4 sm:$0xff]   ;;  %v948_v36 = vld [vmem:[%s1324_s1 + $0x180] ss:$8 sps:$4 sm:$0xff]  }
   0xd   :  { %621 = vmatprep.subr.bf16.mxu0 %v915_v14  ;;  %v949_v37 = vld [vmem:[%s1324_s1 + $0x94] ss:$8 sps:$4 sm:$0xff]   ;;  %v953_v39 = vld [vmem:[%s1324_s1 + $0x90] ss:$8 sps:$4 sm:$0xff]   ;;  %v955_v41 = vld [vmem:[%s1324_s1 + $0xa4] ss:$8 sps:$4 sm:$0xff]  }
   0xe   :  { %v951_v38 = vld [vmem:[%s1324_s1 + $0x194] ss:$8 sps:$4 sm:$0xff]   ;;  %v954_v40 = vld [vmem:[%s1324_s1 + $0x190] ss:$8 sps:$4 sm:$0xff]   ;;  %v957_v42 = vld [vmem:[%s1324_s1 + $0x1a4] ss:$8 sps:$4 sm:$0xff]  }
   0xf   :  { %549 = vmatpush1.bf16.msra.mxu1 %v917_v15  ;;  %v959_v43 = vld [vmem:[%s1324_s1 + $0xa0] ss:$8 sps:$4 sm:$0xff]   ;;  %v961_v45 = vld [vmem:[%s1324_s1 + $0xb4] ss:$8 sps:$4 sm:$0xff]   ;;  %v965_v47 = vld [vmem:[%s1324_s1 + $0xb0] ss:$8 sps:$4 sm:$0xff]  }
  0x10   :  { %622 = vmatpush1.bf16.msra.mxu0 %v918_v16  ;;  %550 = vmatprep.subr.bf16.mxu1 %v919_v17  ;;  %v960_v44 = vld [vmem:[%s1324_s1 + $0x1a0] ss:$8 sps:$4 sm:$0xff]   ;;  %v963_v46 = vld [vmem:[%s1324_s1 + $0x1b4] ss:$8 sps:$4 sm:$0xff]   ;;  %v966_v48 = vld [vmem:[%s1324_s1 + $0x1b0] ss:$8 sps:$4 sm:$0xff]  }
  0x11   :  { %623 = vmatprep.subr.bf16.mxu0 %v921_v18  ;;  %v967_v49 = vld [vmem:[%s1324_s1 + $0xc4] ss:$8 sps:$4 sm:$0xff]   ;;  %v971_v53 = vld [vmem:[%s1324_s1 + $0xc0] ss:$8 sps:$4 sm:$0xff]   ;;  %v973_v55 = vld [vmem:[%s1324_s1 + $0xd4] ss:$8 sps:$4 sm:$0xff]  }
  0x12   :  { %v993_v50 = vld [vmem:[%s1325_s0 + $0x4] ss:$16 sps:$4 sm:$0xff]   ;;  %v996_v52 = vld [vmem:[%s1325_s0 + $0xc] ss:$16 sps:$4 sm:$0xff]   ;;  %v972_v54 = vld [vmem:[%s1324_s1 + $0x1c0] ss:$8 sps:$4 sm:$0xff]  }
  0x13   :  { %551 = vmatpush1.bf16.msra.mxu1 %v923_v19  ;;  %v969_v51 = vld [vmem:[%s1324_s1 + $0x1c4] ss:$8 sps:$4 sm:$0xff]   ;;  %574 = vmatprep.mubr.bf16.mxu1 %v993_v50  ;;  %v975_v56 = vld [vmem:[%s1324_s1 + $0x1d4] ss:$8 sps:$4 sm:$0xff]   ;;  %v977_v57 = vld [vmem:[%s1324_s1 + $0xd0] ss:$8 sps:$4 sm:$0xff]  }
  0x14   :  { %624 = vmatpush1.bf16.msra.mxu0 %v924_v20  ;;  %552 = vmatprep.subr.bf16.mxu1 %v925_v21  ;;  %v978_v58 = vld [vmem:[%s1324_s1 + $0x1d0] ss:$8 sps:$4 sm:$0xff]   ;;  %v979_v59 = vld [vmem:[%s1324_s1 + $0xe4] ss:$8 sps:$4 sm:$0xff]   ;;  %v983_v0 = vld [vmem:[%s1324_s1 + $0xe0] ss:$8 sps:$4 sm:$0xff]  }
  0x15   :  { %625 = vmatprep.subr.bf16.mxu0 %v927_v22  ;;  %647 = vmatprep.mubr.bf16.mxu0 %v996_v52  ;;  %v981_v60 = vld [vmem:[%s1324_s1 + $0x1e4] ss:$8 sps:$4 sm:$0xff]   ;;  %v96_v62 = vld [vmem:[%s1326_s2 + $0x10] sm:$0xff]  ;;  %v984_v1 = vld [vmem:[%s1324_s1 + $0x1e0] ss:$8 sps:$4 sm:$0xff]  }
  0x16   :  { %v94_v61 = vld [vmem:[%s1326_s2] sm:$0xff]  ;;  %v95_v63 = vld [vmem:[%s1326_s2 + $0x8] sm:$0xff]  ;;  %114 = vperm.xlu1 %894, %v96_v62   ;;  %v97_v2 = vld [vmem:[%s1326_s2 + $0x18] sm:$0xff] }
  0x17   :  { %553 = vmatpush1.bf16.msra.mxu1 %v929_v23  ;;  %104 = vperm.xlu0 %893, %v94_v61   ;;  %v985_v3 = vld [vmem:[%s1324_s1 + $0xf4] ss:$8 sps:$4 sm:$0xff]   ;;  %v98_v5 = vld [vmem:[%s1326_s2 + $0x20] sm:$0xff]  ;;  %v989_v6 = vld [vmem:[%s1324_s1 + $0xf0] ss:$8 sps:$4 sm:$0xff]  }
  0x18   :  { %626 = vmatpush1.bf16.msra.mxu0 %v930_v24  ;;  %554 = vmatprep.subr.bf16.mxu1 %v931_v25  ;;  %v987_v4 = vld [vmem:[%s1324_s1 + $0x1f4] ss:$8 sps:$4 sm:$0xff]   ;;  %v990_v7 = vld [vmem:[%s1324_s1 + $0x1f0] ss:$8 sps:$4 sm:$0xff]   ;;  %v99_v8 = vld [vmem:[%s1326_s2 + $0x28] sm:$0xff] }
  0x19   :  { %627 = vmatprep.subr.bf16.mxu0 %v933_v26  ;;  %v991_v9 = vld [vmem:[%s1325_s0] ss:$16 sps:$4 sm:$0xff]   ;;  %v994_v10 = vld [vmem:[%s1325_s0 + $0x8] ss:$16 sps:$4 sm:$0xff]   ;;  %v997_v12 = vld [vmem:[%s1325_s0 + $0x24] ss:$16 sps:$4 sm:$0xff]  }
  0x1a   :  { %119 = vperm.xlu1 %894, %v97_v2   ;;  %v100_v11 = vld [vmem:[%s1326_s2 + $0x30] sm:$0xff]  ;;  %v999_v13 = vld [vmem:[%s1325_s0 + $0x2c] ss:$16 sps:$4 sm:$0xff]   ;;  %v1002_v16 = vld [vmem:[%s1325_s0 + $0x28] ss:$16 sps:$4 sm:$0xff]  }
  0x1b   :  { %555 = vmatpush1.bf16.msra.mxu1 %v935_v27  ;;  %109 = vperm.xlu0 %893, %v95_v63   ;;  %v101_v14 = vld [vmem:[%s1326_s2 + $0x38] sm:$0xff]  ;;  %v1001_v15 = vld [vmem:[%s1325_s0 + $0x20] ss:$16 sps:$4 sm:$0xff]   ;;  %v1003_v17 = vld [vmem:[%s1325_s0 + $0x44] ss:$16 sps:$4 sm:$0xff]  }
  0x1c   :  { %628 = vmatpush1.bf16.msra.mxu0 %v936_v28  ;;  %556 = vmatprep.subr.bf16.mxu1 %v937_v29  ;;  %v1005_v18 = vld [vmem:[%s1325_s0 + $0x4c] ss:$16 sps:$4 sm:$0xff]   ;;  %v1007_v19 = vld [vmem:[%s1325_s0 + $0x40] ss:$16 sps:$4 sm:$0xff]   ;;  %v1008_v20 = vld [vmem:[%s1325_s0 + $0x48] ss:$16 sps:$4 sm:$0xff]  }
  0x1d   :  { %629 = vmatprep.subr.bf16.mxu0 %v939_v30  ;;  %v1009_v21 = vld [vmem:[%s1325_s0 + $0x64] ss:$16 sps:$4 sm:$0xff]   ;;  %v1011_v22 = vld [vmem:[%s1325_s0 + $0x6c] ss:$16 sps:$4 sm:$0xff]   ;;  %v1013_v23 = vld [vmem:[%s1325_s0 + $0x60] ss:$16 sps:$4 sm:$0xff]  }
  0x1e   :  { %129 = vperm.xlu1 %894, %v99_v8   ;;  %v1014_v24 = vld [vmem:[%s1325_s0 + $0x68] ss:$16 sps:$4 sm:$0xff]  }
  0x1f   :  { %557 = vmatpush1.bf16.msra.mxu1 %v941_v31  ;;  %124 = vperm.xlu0 %893, %v98_v5  }
  0x20   :  { %630 = vmatpush1.bf16.msra.mxu0 %v942_v32  ;;  %558 = vmatprep.subr.bf16.mxu1 %v943_v33 }
  0x21   :  { %631 = vmatprep.subr.bf16.mxu0 %v945_v34 }
  0x22   :  { %139 = vperm.xlu1 %894, %v101_v14  }
  0x23   :  { %559 = vmatpush1.bf16.msra.mxu1 %v947_v35  ;;  %134 = vperm.xlu0 %893, %v100_v11  }
  0x24   :  { %632 = vmatpush1.bf16.msra.mxu0 %v948_v36  ;;  %560 = vmatprep.subr.bf16.mxu1 %v949_v37 }
  0x25   :  { %633 = vmatprep.subr.bf16.mxu0 %v951_v38 }
  0x27   :  { %561 = vmatpush1.bf16.msra.mxu1 %v953_v39 }
  0x28   :  { %634 = vmatpush1.bf16.msra.mxu0 %v954_v40  ;;  %562 = vmatprep.subr.bf16.mxu1 %v955_v41 }
  0x29   :  { %635 = vmatprep.subr.bf16.mxu0 %v957_v42 }
  0x2b   :  { %563 = vmatpush1.bf16.msra.mxu1 %v959_v43 }
  0x2c   :  { %636 = vmatpush1.bf16.msra.mxu0 %v960_v44  ;;  %564 = vmatprep.subr.bf16.mxu1 %v961_v45 }
  0x2d   :  { %637 = vmatprep.subr.bf16.mxu0 %v963_v46 }
  0x2f   :  { %565 = vmatpush1.bf16.msra.mxu1 %v965_v47 }
  0x30   :  { %638 = vmatpush1.bf16.msra.mxu0 %v966_v48  ;;  %566 = vmatprep.subr.bf16.mxu1 %v967_v49 }
  0x31   :  { %639 = vmatprep.subr.bf16.mxu0 %v969_v51 }
  0x33   :  { %567 = vmatpush1.bf16.msra.mxu1 %v971_v53 }
  0x34   :  { %640 = vmatpush1.bf16.msra.mxu0 %v972_v54  ;;  %568 = vmatprep.subr.bf16.mxu1 %v973_v55 }
  0x35   :  { %641 = vmatprep.subr.bf16.mxu0 %v975_v56 }
  0x37   :  { %569 = vmatpush1.bf16.msra.mxu1 %v977_v57 }
  0x38   :  { %642 = vmatpush1.bf16.msra.mxu0 %v978_v58  ;;  %570 = vmatprep.subr.bf16.mxu1 %v979_v59 }
  0x39   :  { %643 = vmatprep.subr.bf16.mxu0 %v981_v60 }
  0x3b   :  { %571 = vmatpush1.bf16.msra.mxu1 %v983_v0 }
  0x3c   :  { %644 = vmatpush1.bf16.msra.mxu0 %v984_v1  ;;  %572 = vmatprep.subr.bf16.mxu1 %v985_v3 }
  0x3d   :  { %645 = vmatprep.subr.bf16.mxu0 %v987_v4 }
  0x3f   :  { %573 = vmatpush1.bf16.msra.mxu1 %v989_v6 }
  0x40   :  { %646 = vmatpush1.bf16.msra.mxu0 %v990_v7 }
  0x42   :  { %575 = vmatmul.mubr.bf16.vlgmr.msra.gmra.mrb[0].mxu1 %v991_v9 }
  0x43   :  { %648 = vmatmul.mubr.bf16.vlgmr.msra.gmra.mrb[0].mxu0 %v994_v10  ;;  %584 = vmatprep.mubr.bf16.mxu1 %v997_v12 }
  0x44   :  { %657 = vmatprep.mubr.bf16.mxu0 %v999_v13 }
  0x4a   :  { %585 = vmatmul.mubr.bf16.gmra.mrb[4].mxu1 %v1001_v15 }
  0x4b   :  { %658 = vmatmul.mubr.bf16.gmra.mrb[4].mxu0 %v1002_v16  ;;  %594 = vmatprep.mubr.bf16.mxu1 %v1003_v17 }
  0x4c   :  { %667 = vmatprep.mubr.bf16.mxu0 %v1005_v18 }
  0x52   :  { %595 = vmatmul.mubr.bf16.gmra.mrb[8].mxu1 %v1007_v19 }
  0x53   :  { %668 = vmatmul.mubr.bf16.gmra.mrb[8].mxu0 %v1008_v20  ;;  %604 = vmatprep.mubr.bf16.mxu1 %v1009_v21 }
  0x54   :  { %677 = vmatprep.mubr.bf16.mxu0 %v1011_v22 }
  0x5a   :  { %605 = vmatmul.mubr.bf16.gmra.mrb[12].mxu1 %v1013_v23 }
  0x5b   :  { %678 = vmatmul.mubr.bf16.gmra.mrb[12].mxu0 %v1014_v24 }
  0x95   :  { %v115_v27 = vpop.permute.xlu1 %114 }
  0x96   :  { %v105_v25 = vpop.permute.xlu0 %104 }
  0x99   :  { %v120_v47 = vpop.permute.xlu1 %119 }
  0x9a   :  { %v110_v26 = vpop.permute.xlu0 %109 }
  0x9d   :  { %v130_v6 = vpop.permute.xlu1 %129 }
  0x9e   :  { %v125_v7 = vpop.permute.xlu0 %124 }
 0x115   :  { %v576_v28 = vpop.f32.mrb[0].mxu1 }
 0x116   :  { %v649_v29 = vpop.f32.mrb[0].mxu0  ;;  %v577_v30 = vadd.f32 %v576_v28, %v105_v25  ;;  %v578_v31 = vpop.f32.mrb[1].mxu1 }
 0x117   :  { %v651_v32 = vpop.f32.mrb[1].mxu0  ;;  %v579_v33 = vadd.f32 %v578_v31, %v105_v25  ;;  %v580_v34 = vpop.f32.mrb[2].mxu1 }
 0x118   :  { %v653_v35 = vpop.f32.mrb[2].mxu0  ;;  %v650_v36 = vadd.f32 %v649_v29, %v577_v30  ;;  %v581_v37 = vadd.f32 %v580_v34, %v110_v26  ;;  %v582_v38 = vpop.f32.mrb[3].mxu1 }
 0x119   :  { %v655_v39 = vpop.f32.mrb[3].mxu0  ;;  %v652_v40 = vadd.f32 %v651_v32, %v579_v33  ;;  %v583_v41 = vadd.f32 %v582_v38, %v110_v26  ;;  %v140_v29 = vpop.permute.xlu1 %139 }
 0x11a   :  { %v688_v42 = vmax.f32 %v650_v36, 0.0  ;;  %v654_v43 = vadd.f32 %v653_v35, %v581_v37  ;;  %v135_v30 = vpop.permute.xlu0 %134 }
 0x11b   :  { %v689_v44 = vmax.f32 %v652_v40, 0.0  ;;  %v656_v45 = vadd.f32 %v655_v39, %v583_v41 }
 0x11c   :  { %v690_v46 = vmax.f32 %v654_v43, 0.0 }
 0x11d   :  { %v852_v48 = vpack.c.bf16 %v689_v44, %v688_v42  ;;  %v691_v49 = vmax.f32 %v656_v45, 0.0  ;;  %v586_v50 = vpop.f32.mrb[4].mxu1 }
 0x11e   :  { %v659_v51 = vpop.f32.mrb[4].mxu0  ;;  %v587_v52 = vadd.f32 %v586_v50, %v115_v27  ;;  %v588_v53 = vpop.f32.mrb[5].mxu1 }
 0x11f   :  { %v661_v54 = vpop.f32.mrb[5].mxu0  ;;  %752 = vst [vmem:[%s1327_s3] sm:$0xff] %v852_v48  ;;  %v853_v55 = vpack.c.bf16 %v691_v49, %v690_v46  ;;  %v589_v56 = vadd.f32 %v588_v53, %v115_v27  ;;  %v590_v57 = vpop.f32.mrb[6].mxu1 }
 0x120   :  { %v663_v58 = vpop.f32.mrb[6].mxu0  ;;  %v660_v59 = vadd.f32 %v659_v51, %v587_v52  ;;  %v591_v60 = vadd.f32 %v590_v57, %v120_v47  ;;  %v592_v61 = vpop.f32.mrb[7].mxu1 }
 0x121   :  { %v665_v62 = vpop.f32.mrb[7].mxu0  ;;  %753 = vst [vmem:[%s1327_s3 + $0x8] sm:$0xff] %v853_v55  ;;  %v662_v63 = vadd.f32 %v661_v54, %v589_v56  ;;  %v593_v0 = vadd.f32 %v592_v61, %v120_v47 }
 0x122   :  { %v692_v1 = vmax.f32 %v660_v59, 0.0  ;;  %v664_v2 = vadd.f32 %v663_v58, %v591_v60 }
 0x123   :  { %v693_v3 = vmax.f32 %v662_v63, 0.0  ;;  %v666_v4 = vadd.f32 %v665_v62, %v593_v0 }
 0x124   :  { %v694_v5 = vmax.f32 %v664_v2, 0.0 }
 0x125   :  { %v854_v8 = vpack.c.bf16 %v693_v3, %v692_v1  ;;  %v695_v9 = vmax.f32 %v666_v4, 0.0  ;;  %v596_v10 = vpop.f32.mrb[8].mxu1 }
 0x126   :  { %v669_v11 = vpop.f32.mrb[8].mxu0  ;;  %v597_v12 = vadd.f32 %v596_v10, %v125_v7  ;;  %v598_v13 = vpop.f32.mrb[9].mxu1 }
 0x127   :  { %v671_v14 = vpop.f32.mrb[9].mxu0  ;;  %754 = vst [vmem:[%s1327_s3 + $0x10] sm:$0xff] %v854_v8  ;;  %v855_v15 = vpack.c.bf16 %v695_v9, %v694_v5  ;;  %v599_v16 = vadd.f32 %v598_v13, %v125_v7  ;;  %v600_v17 = vpop.f32.mrb[10].mxu1 }
 0x128   :  { %v673_v18 = vpop.f32.mrb[10].mxu0  ;;  %v670_v19 = vadd.f32 %v669_v11, %v597_v12  ;;  %v601_v20 = vadd.f32 %v600_v17, %v130_v6  ;;  %v602_v21 = vpop.f32.mrb[11].mxu1 }
 0x129   :  { %v675_v22 = vpop.f32.mrb[11].mxu0  ;;  %755 = vst [vmem:[%s1327_s3 + $0x18] sm:$0xff] %v855_v15  ;;  %v672_v23 = vadd.f32 %v671_v14, %v599_v16  ;;  %v603_v24 = vadd.f32 %v602_v21, %v130_v6 }
 0x12a   :  { %v696_v25 = vmax.f32 %v670_v19, 0.0  ;;  %v674_v26 = vadd.f32 %v673_v18, %v601_v20 }
 0x12b   :  { %v697_v27 = vmax.f32 %v672_v23, 0.0  ;;  %v676_v28 = vadd.f32 %v675_v22, %v603_v24 }
 0x12c   :  { %v698_v31 = vmax.f32 %v674_v26, 0.0 }
 0x12d   :  { %v856_v32 = vpack.c.bf16 %v697_v27, %v696_v25  ;;  %v699_v33 = vmax.f32 %v676_v28, 0.0  ;;  %v606_v34 = vpop.f32.mrb[12].mxu1 }
 0x12e   :  { %v679_v35 = vpop.f32.mrb[12].mxu0  ;;  %v607_v36 = vadd.f32 %v606_v34, %v135_v30  ;;  %v608_v37 = vpop.f32.mrb[13].mxu1 }
 0x12f   :  { %v681_v38 = vpop.f32.mrb[13].mxu0  ;;  %756 = vst [vmem:[%s1327_s3 + $0x20] sm:$0xff] %v856_v32  ;;  %v857_v39 = vpack.c.bf16 %v699_v33, %v698_v31  ;;  %v609_v40 = vadd.f32 %v608_v37, %v135_v30  ;;  %v610_v41 = vpop.f32.mrb[14].mxu1 }
 0x130   :  { %v683_v42 = vpop.f32.mrb[14].mxu0  ;;  %v680_v43 = vadd.f32 %v679_v35, %v607_v36  ;;  %v611_v44 = vadd.f32 %v610_v41, %v140_v29  ;;  %v612_v45 = vpop.f32.mrb[15].mxu1 }
 0x131   :  { %v685_v46 = vpop.f32.mrb[15].mxu0  ;;  %757 = vst [vmem:[%s1327_s3 + $0x28] sm:$0xff] %v857_v39  ;;  %v682_v47 = vadd.f32 %v681_v38, %v609_v40  ;;  %v613_v48 = vadd.f32 %v612_v45, %v140_v29 }
 0x132   :  { %v700_v49 = vmax.f32 %v680_v43, 0.0  ;;  %v684_v50 = vadd.f32 %v683_v42, %v611_v44 }
 0x133   :  { %v701_v51 = vmax.f32 %v682_v47, 0.0  ;;  %v686_v52 = vadd.f32 %v685_v46, %v613_v48 }
 0x134   :  { %v702_v53 = vmax.f32 %v684_v50, 0.0 }
 0x135   :  { %v858_v54 = vpack.c.bf16 %v701_v51, %v700_v49  ;;  %v703_v55 = vmax.f32 %v686_v52, 0.0 }
 0x137   :  { %758 = vst [vmem:[%s1327_s3 + $0x30] sm:$0xff] %v858_v54  ;;  %v859_v56 = vpack.c.bf16 %v703_v55, %v702_v53 }
 0x139   :  { %759 = vst [vmem:[%s1327_s3 + $0x38] sm:$0xff] %v859_v56 }

// kernel: dqn_forward.6
= control target key start
LH: loop header
LB: loop body
LE: loop exit
PB: predicated region body
PF: predicated region fallthrough
CT: control target
= control target key end

     0   :  { %v1060_v1 = vmov 0   ;;  %s1300_s1 = inlined_call_operand.vmem [shape: bf16[640,128], index: 1, kind: input, shape index: {}]   ;;  %s1301_s0 = inlined_call_operand.vmem [shape: bf16[64,640], index: 0, kind: input, shape index: {}]   ;;  %s1302_s2 = inlined_call_operand.vmem [shape: f32[64,1], index: 2, kind: input, shape index: {}]   ;;  %s1303_s3 = inlined_call_operand.vmem [shape: bf16[64,128], index: 3, kind: output, shape index: {}]  }
   0x1   :  { %v992_v0 = vld [vmem:[%s1300_s1 + $0x40] sm:$0xff]   ;;  %990 = vset.pattern.permute.xlu0 %v1060_v1  ;;  %991 = vset.pattern.permute.xlu1 %v1060_v1  ;;  %v996_v5 = vld [vmem:[%s1300_s1 + $0x48] sm:$0xff]   ;;  %v1000_v9 = vld [vmem:[%s1300_s1 + $0x50] sm:$0xff]  }
   0x2   :  { %v993_v2 = vld [vmem:[%s1300_s1 + $0xc0] sm:$0xff]   ;;  %857 = vmatprep.subr.bf16.mxu0 %v992_v0  ;;  %v997_v6 = vld [vmem:[%s1300_s1 + $0xc8] sm:$0xff]   ;;  %v1001_v10 = vld [vmem:[%s1300_s1 + $0xd0] sm:$0xff]  }
   0x3   :  { %v994_v3 = vld [vmem:[%s1300_s1] sm:$0xff]   ;;  %897 = vmatprep.subr.bf16.mxu1 %v993_v2  ;;  %v998_v7 = vld [vmem:[%s1300_s1 + $0x8] sm:$0xff]   ;;  %v1002_v11 = vld [vmem:[%s1300_s1 + $0x10] sm:$0xff]  }
   0x4   :  { %v995_v4 = vld [vmem:[%s1300_s1 + $0x80] sm:$0xff]   ;;  %858 = vmatpush3.bf16.msra.mxu0 %v994_v3  ;;  %v999_v8 = vld [vmem:[%s1300_s1 + $0x88] sm:$0xff]   ;;  %v1003_v12 = vld [vmem:[%s1300_s1 + $0x90] sm:$0xff]  }
   0x5   :  { %898 = vmatpush3.bf16.msra.mxu1 %v995_v4  ;;  %859 = vmatprep.subr.bf16.mxu0 %v996_v5  ;;  %v1004_v13 = vld [vmem:[%s1300_s1 + $0x58] sm:$0xff]   ;;  %v1008_v17 = vld [vmem:[%s1300_s1 + $0x60] sm:$0xff]   ;;  %v1012_v21 = vld [vmem:[%s1300_s1 + $0x68] sm:$0xff]  }
   0x6   :  { %899 = vmatprep.subr.bf16.mxu1 %v997_v6  ;;  %v1005_v14 = vld [vmem:[%s1300_s1 + $0xd8] sm:$0xff]   ;;  %v1009_v18 = vld [vmem:[%s1300_s1 + $0xe0] sm:$0xff]   ;;  %v1013_v22 = vld [vmem:[%s1300_s1 + $0xe8] sm:$0xff]  }
   0x7   :  { %v1006_v15 = vld [vmem:[%s1300_s1 + $0x18] sm:$0xff]   ;;  %v1010_v19 = vld [vmem:[%s1300_s1 + $0x20] sm:$0xff]   ;;  %v1014_v23 = vld [vmem:[%s1300_s1 + $0x28] sm:$0xff]  }
   0x8   :  { %860 = vmatpush3.bf16.msra.mxu0 %v998_v7  ;;  %v1007_v16 = vld [vmem:[%s1300_s1 + $0x98] sm:$0xff]   ;;  %v1011_v20 = vld [vmem:[%s1300_s1 + $0xa0] sm:$0xff]   ;;  %v1015_v24 = vld [vmem:[%s1300_s1 + $0xa8] sm:$0xff]  }
   0x9   :  { %900 = vmatpush3.bf16.msra.mxu1 %v999_v8  ;;  %861 = vmatprep.subr.bf16.mxu0 %v1000_v9  ;;  %v1016_v25 = vld [vmem:[%s1300_s1 + $0x70] sm:$0xff]   ;;  %v1020_v29 = vld [vmem:[%s1300_s1 + $0x78] sm:$0xff]   ;;  %v1029_v36 = vld [vmem:[%s1301_s0 + $0xc] ss:$20 sps:$4 sm:$0xff]  }
   0xa   :  { %901 = vmatprep.subr.bf16.mxu1 %v1001_v10  ;;  %v1017_v26 = vld [vmem:[%s1300_s1 + $0xf0] sm:$0xff]   ;;  %v1021_v30 = vld [vmem:[%s1300_s1 + $0xf8] sm:$0xff]   ;;  %v1030_v37 = vld [vmem:[%s1300_s1 + $0x100] sm:$0xff]   ;;  %608 = vmatprep.mubr.bf16.mxu1 %v1029_v36 }
   0xb   :  { %v1018_v27 = vld [vmem:[%s1300_s1 + $0x30] sm:$0xff]   ;;  %v1022_v31 = vld [vmem:[%s1300_s1 + $0x38] sm:$0xff]   ;;  %v1031_v38 = vld [vmem:[%s1300_s1 + $0x108] sm:$0xff]  }
   0xc   :  { %862 = vmatpush3.bf16.msra.mxu0 %v1002_v11  ;;  %v1019_v28 = vld [vmem:[%s1300_s1 + $0xb0] sm:$0xff]   ;;  %v1023_v32 = vld [vmem:[%s1300_s1 + $0xb8] sm:$0xff]   ;;  %v1032_v39 = vld [vmem:[%s1301_s0 + $0x2c] ss:$20 sps:$4 sm:$0xff]  }
   0xd   :  { %902 = vmatpush3.bf16.msra.mxu1 %v1003_v12  ;;  %863 = vmatprep.subr.bf16.mxu0 %v1004_v13  ;;  %v1024_v33 = vld [vmem:[%s1301_s0] ss:$20 sps:$4 sm:$0xff]   ;;  %v1026_v34 = vld [vmem:[%s1301_s0 + $0x4] ss:$20 sps:$4 sm:$0xff]   ;;  %v1027_v35 = vld [vmem:[%s1301_s0 + $0x8] ss:$20 sps:$4 sm:$0xff]  }
   0xe   :  { %903 = vmatprep.subr.bf16.mxu1 %v1005_v14  ;;  %543 = vmatprep.mubr.bf16.mxu0 %v1026_v34  ;;  %v1034_v40 = vld [vmem:[%s1301_s0 + $0x34] ss:$20 sps:$4 sm:$0xff]   ;;  %v1037_v43 = vld [vmem:[%s1301_s0 + $0x30] ss:$20 sps:$4 sm:$0xff]   ;;  %v1039_v45 = vld [vmem:[%s1300_s1 + $0x118] sm:$0xff]  }
   0xf   :  { %v1036_v41 = vld [vmem:[%s1301_s0 + $0x28] ss:$20 sps:$4 sm:$0xff]   ;;  %v1038_v42 = vld [vmem:[%s1300_s1 + $0x110] sm:$0xff]   ;;  %v1046_v47 = vld [vmem:[%s1300_s1 + $0x120] sm:$0xff]  }
  0x10   :  { %864 = vmatpush3.bf16.msra.mxu0 %v1006_v15  ;;  %v1040_v44 = vld [vmem:[%s1301_s0 + $0x54] ss:$20 sps:$4 sm:$0xff]   ;;  %v1042_v46 = vld [vmem:[%s1301_s0 + $0x5c] ss:$20 sps:$4 sm:$0xff]   ;;  %v1045_v49 = vld [vmem:[%s1301_s0 + $0x58] ss:$20 sps:$4 sm:$0xff]  }
  0x11   :  { %904 = vmatpush3.bf16.msra.mxu1 %v1007_v16  ;;  %865 = vmatprep.subr.bf16.mxu0 %v1008_v17  ;;  %v1044_v48 = vld [vmem:[%s1301_s0 + $0x50] ss:$20 sps:$4 sm:$0xff]   ;;  %v1047_v52 = vld [vmem:[%s1300_s1 + $0x128] sm:$0xff]   ;;  %v1053_v57 = vld [vmem:[%s1301_s0 + $0x80] ss:$20 sps:$4 sm:$0xff]  }
  0x12   :  { %905 = vmatprep.subr.bf16.mxu1 %v1009_v18  ;;  %v1048_v50 = vld [vmem:[%s1301_s0 + $0x7c] ss:$20 sps:$4 sm:$0xff]   ;;  %v1050_v51 = vld [vmem:[%s1301_s0 + $0x84] ss:$20 sps:$4 sm:$0xff]   ;;  %v1057_v59 = vld [vmem:[%s1301_s0 + $0x60] ss:$20 sps:$4 sm:$0xff]  }
  0x13   :  { %v119_v53 = vld [vmem:[%s1302_s2] sm:$0xff]  ;;  %v1054_v54 = vld [vmem:[%s1300_s1 + $0x130] sm:$0xff]   ;;  %v1052_v56 = vld [vmem:[%s1301_s0 + $0x78] ss:$20 sps:$4 sm:$0xff]  }
  0x14   :  { %866 = vmatpush3.bf16.msra.mxu0 %v1010_v19  ;;  %v121_v55 = vld [vmem:[%s1302_s2 + $0x10] sm:$0xff]  ;;  %129 = vperm.xlu0 %990, %v119_v53   ;;  %v1055_v60 = vld [vmem:[%s1300_s1 + $0x138] sm:$0xff]   ;;  %v120_v61 = vld [vmem:[%s1302_s2 + $0x8] sm:$0xff] }
  0x15   :  { %906 = vmatpush3.bf16.msra.mxu1 %v1011_v20  ;;  %867 = vmatprep.subr.bf16.mxu0 %v1012_v21  ;;  %v1056_v58 = vld [vmem:[%s1301_s0 + $0x10] ss:$20 sps:$4 sm:$0xff]   ;;  %v122_v62 = vld [vmem:[%s1302_s2 + $0x18] sm:$0xff]  ;;  %v124_v2 = vld [vmem:[%s1302_s2 + $0x28] sm:$0xff] }
  0x16   :  { %907 = vmatprep.subr.bf16.mxu1 %v1013_v22  ;;  %139 = vperm.xlu1 %991, %v121_v55   ;;  %v1058_v63 = vld [vmem:[%s1301_s0 + $0x38] ss:$20 sps:$4 sm:$0xff]   ;;  %v123_v0 = vld [vmem:[%s1302_s2 + $0x20] sm:$0xff]  ;;  %v1059_v1 = vld [vmem:[%s1301_s0 + $0x88] ss:$20 sps:$4 sm:$0xff]  }
  0x17   :  { %v125_v3 = vld [vmem:[%s1302_s2 + $0x30] sm:$0xff]  ;;  %v126_v4 = vld [vmem:[%s1302_s2 + $0x38] sm:$0xff] }
  0x18   :  { %868 = vmatpush3.bf16.msra.mxu0 %v1014_v23  ;;  %134 = vperm.xlu0 %990, %v120_v61  }
  0x19   :  { %908 = vmatpush3.bf16.msra.mxu1 %v1015_v24  ;;  %869 = vmatprep.subr.bf16.mxu0 %v1016_v25 }
  0x1a   :  { %909 = vmatprep.subr.bf16.mxu1 %v1017_v26  ;;  %144 = vperm.xlu1 %991, %v122_v62  }
  0x1c   :  { %870 = vmatpush3.bf16.msra.mxu0 %v1018_v27  ;;  %149 = vperm.xlu0 %990, %v123_v0  }
  0x1d   :  { %910 = vmatpush3.bf16.msra.mxu1 %v1019_v28  ;;  %871 = vmatprep.subr.bf16.mxu0 %v1020_v29 }
  0x1e   :  { %911 = vmatprep.subr.bf16.mxu1 %v1021_v30  ;;  %154 = vperm.xlu1 %991, %v124_v2  }
  0x20   :  { %872 = vmatpush3.bf16.msra.mxu0 %v1022_v31  ;;  %159 = vperm.xlu0 %990, %v125_v3  }
  0x21   :  { %912 = vmatpush3.bf16.msra.mxu1 %v1023_v32  ;;  %949 = vmatprep.subr.bf16.mxu0 %v1030_v37 }
  0x22   :  { %973 = vmatprep.subr.bf16.mxu1 %v1030_v37  ;;  %164 = vperm.xlu1 %991, %v126_v4  }
  0x23   :  { %544 = vmatmul.mubr.bf16.vlgmr.msra.gmra.mrb[0].mxu0 %v1024_v33 }
  0x24   :  { %609 = vmatmul.mubr.bf16.vlgmr.msra.gmra.mrb[0].mxu1 %v1027_v35  ;;  %950 = vmatpush3.bf16.msra.mxu0 %v1030_v37 }
  0x25   :  { %981 = vmatpush3.bf16.msra.mxu1 %v1030_v37  ;;  %951 = vmatprep.subr.bf16.mxu0 %v1031_v38 }
  0x26   :  { %974 = vmatprep.subr.bf16.mxu1 %v1031_v38  ;;  %551 = vmatprep.mubr.bf16.mxu0 %v1032_v39 }
  0x27   :  { %616 = vmatprep.mubr.bf16.mxu1 %v1034_v40 }
  0x28   :  { %952 = vmatpush3.bf16.msra.mxu0 %v1031_v38 }
  0x29   :  { %982 = vmatpush3.bf16.msra.mxu1 %v1031_v38  ;;  %953 = vmatprep.subr.bf16.mxu0 %v1038_v42 }
  0x2a   :  { %975 = vmatprep.subr.bf16.mxu1 %v1038_v42 }
  0x2b   :  { %552 = vmatmul.mubr.bf16.gmra.mrb[4].mxu0 %v1036_v41 }
  0x2c   :  { %617 = vmatmul.mubr.bf16.gmra.mrb[4].mxu1 %v1037_v43  ;;  %559 = vmatprep.mubr.bf16.mxu0 %v1040_v44 }
  0x2d   :  { %954 = vmatpush3.bf16.msra.mxu0 %v1038_v42  ;;  %624 = vmatprep.mubr.bf16.mxu1 %v1042_v46 }
  0x2e   :  { %983 = vmatpush3.bf16.msra.mxu1 %v1038_v42  ;;  %955 = vmatprep.subr.bf16.mxu0 %v1039_v45 }
  0x2f   :  { %976 = vmatprep.subr.bf16.mxu1 %v1039_v45 }
  0x31   :  { %956 = vmatpush3.bf16.msra.mxu0 %v1039_v45 }
  0x32   :  { %984 = vmatpush3.bf16.msra.mxu1 %v1039_v45  ;;  %957 = vmatprep.subr.bf16.mxu0 %v1046_v47 }
  0x33   :  { %560 = vmatmul.mubr.bf16.gmra.mrb[8].mxu0 %v1044_v48  ;;  %977 = vmatprep.subr.bf16.mxu1 %v1046_v47 }
  0x34   :  { %625 = vmatmul.mubr.bf16.gmra.mrb[8].mxu1 %v1045_v49  ;;  %567 = vmatprep.mubr.bf16.mxu0 %v1048_v50 }
  0x35   :  { %958 = vmatpush3.bf16.msra.mxu0 %v1046_v47  ;;  %632 = vmatprep.mubr.bf16.mxu1 %v1050_v51 }
  0x36   :  { %985 = vmatpush3.bf16.msra.mxu1 %v1046_v47  ;;  %959 = vmatprep.subr.bf16.mxu0 %v1047_v52 }
  0x37   :  { %978 = vmatprep.subr.bf16.mxu1 %v1047_v52 }
  0x39   :  { %960 = vmatpush3.bf16.msra.mxu0 %v1047_v52 }
  0x3a   :  { %986 = vmatpush3.bf16.msra.mxu1 %v1047_v52  ;;  %961 = vmatprep.subr.bf16.mxu0 %v1054_v54 }
  0x3b   :  { %568 = vmatmul.mubr.bf16.gmra.mrb[12].mxu0 %v1052_v56  ;;  %979 = vmatprep.subr.bf16.mxu1 %v1054_v54 }
  0x3c   :  { %633 = vmatmul.mubr.bf16.gmra.mrb[12].mxu1 %v1053_v57  ;;  %965 = vmatprep.mubr.bf16.mxu0 %v1056_v58 }
  0x3d   :  { %962 = vmatpush3.bf16.msra.mxu0 %v1054_v54  ;;  %969 = vmatprep.mubr.bf16.mxu1 %v1057_v59 }
  0x3e   :  { %987 = vmatpush3.bf16.msra.mxu1 %v1054_v54  ;;  %963 = vmatprep.subr.bf16.mxu0 %v1055_v60 }
  0x3f   :  { %980 = vmatprep.subr.bf16.mxu1 %v1055_v60 }
  0x41   :  { %964 = vmatpush3.bf16.msra.mxu0 %v1055_v60 }
  0x42   :  { %988 = vmatpush3.bf16.msra.mxu1 %v1055_v60 }
  0x44   :  { %966 = vmatmul.mubr.bf16.vlgmr.msra.gmra.mrb[16].mxu0 %v1058_v63 }
  0x45   :  { %970 = vmatmul.mubr.bf16.vlgmr.msra.gmra.mrb[16].mxu1 %v1059_v1 }
  0x93   :  { %v130_v5 = vpop.permute.xlu0 %129 }
  0x95   :  { %v140_v22 = vpop.permute.xlu1 %139 }
  0x97   :  { %v135_v7 = vpop.permute.xlu0 %134 }
  0x99   :  { %v145_v37 = vpop.permute.xlu1 %144 }
  0x9b   :  { %v150_v40 = vpop.permute.xlu0 %149 }
  0x9d   :  { %v155_v54 = vpop.permute.xlu1 %154 }
  0x9f   :  { %v160_v58 = vpop.permute.xlu0 %159 }
  0xf6   :  { %v873_v6 = vpop.f32.mrb[0].mxu0 }
  0xf7   :  { %v913_v8 = vpop.f32.mrb[0].mxu1  ;;  %v874_v9 = vpop.f32.mrb[1].mxu0 }
  0xf8   :  { %v875_v10 = vadd.f32 %v874_v9, %v873_v6  ;;  %v914_v11 = vpop.f32.mrb[1].mxu1  ;;  %v876_v12 = vpop.f32.mrb[2].mxu0 }
  0xf9   :  { %v915_v13 = vadd.f32 %v914_v11, %v913_v8  ;;  %v916_v14 = vpop.f32.mrb[2].mxu1  ;;  %v877_v15 = vpop.f32.mrb[3].mxu0 }
  0xfa   :  { %v546_v16 = vadd.f32 %v875_v10, %v130_v5  ;;  %v878_v17 = vadd.f32 %v877_v15, %v876_v12  ;;  %v917_v18 = vpop.f32.mrb[3].mxu1  ;;  %v165_v8 = vpop.permute.xlu1 %164 }
  0xfb   :  { %v918_v19 = vadd.f32 %v917_v18, %v916_v14 }
  0xfc   :  { %v549_v20 = vadd.f32 %v878_v17, %v135_v7  ;;  %v611_v21 = vadd.f32 %v915_v13, %v546_v16 }
  0xfe   :  { %v879_v23 = vpop.f32.mrb[4].mxu0  ;;  %v1285_v24 = vadd.f32 %v918_v19, %v549_v20 }
  0xff   :  { %v919_v25 = vpop.f32.mrb[4].mxu1  ;;  %v880_v26 = vpop.f32.mrb[5].mxu0 }
 0x100   :  { %v881_v27 = vadd.f32 %v880_v26, %v879_v23  ;;  %v920_v28 = vpop.f32.mrb[5].mxu1  ;;  %v882_v29 = vpop.f32.mrb[6].mxu0 }
 0x101   :  { %v921_v30 = vadd.f32 %v920_v28, %v919_v25  ;;  %v922_v31 = vpop.f32.mrb[6].mxu1  ;;  %v883_v32 = vpop.f32.mrb[7].mxu0 }
 0x102   :  { %v554_v33 = vadd.f32 %v881_v27, %v140_v22  ;;  %v884_v34 = vadd.f32 %v883_v32, %v882_v29  ;;  %v923_v35 = vpop.f32.mrb[7].mxu1 }
 0x103   :  { %v924_v36 = vadd.f32 %v923_v35, %v922_v31 }
 0x104   :  { %v557_v38 = vadd.f32 %v884_v34, %v145_v37  ;;  %v619_v39 = vadd.f32 %v921_v30, %v554_v33 }
 0x106   :  { %v885_v41 = vpop.f32.mrb[8].mxu0  ;;  %v622_v42 = vadd.f32 %v924_v36, %v557_v38 }
 0x107   :  { %v925_v43 = vpop.f32.mrb[8].mxu1  ;;  %v886_v44 = vpop.f32.mrb[9].mxu0 }
 0x108   :  { %v887_v45 = vadd.f32 %v886_v44, %v885_v41  ;;  %v926_v46 = vpop.f32.mrb[9].mxu1  ;;  %v888_v47 = vpop.f32.mrb[10].mxu0 }
 0x109   :  { %v927_v48 = vadd.f32 %v926_v46, %v925_v43  ;;  %v928_v49 = vpop.f32.mrb[10].mxu1  ;;  %v889_v50 = vpop.f32.mrb[11].mxu0 }
 0x10a   :  { %v562_v51 = vadd.f32 %v887_v45, %v150_v40  ;;  %v890_v52 = vadd.f32 %v889_v50, %v888_v47  ;;  %v929_v53 = vpop.f32.mrb[11].mxu1 }
 0x10b   :  { %v930_v55 = vadd.f32 %v929_v53, %v928_v49 }
 0x10c   :  { %v565_v56 = vadd.f32 %v890_v52, %v155_v54  ;;  %v627_v57 = vadd.f32 %v927_v48, %v562_v51 }
 0x10e   :  { %v891_v59 = vpop.f32.mrb[12].mxu0  ;;  %v630_v60 = vadd.f32 %v930_v55, %v565_v56 }
 0x10f   :  { %v931_v61 = vpop.f32.mrb[12].mxu1  ;;  %v892_v62 = vpop.f32.mrb[13].mxu0 }
 0x110   :  { %v893_v63 = vadd.f32 %v892_v62, %v891_v59  ;;  %v932_v0 = vpop.f32.mrb[13].mxu1  ;;  %v894_v1 = vpop.f32.mrb[14].mxu0 }
 0x111   :  { %v933_v2 = vadd.f32 %v932_v0, %v931_v61  ;;  %v934_v3 = vpop.f32.mrb[14].mxu1  ;;  %v895_v4 = vpop.f32.mrb[15].mxu0 }
 0x112   :  { %v570_v5 = vadd.f32 %v893_v63, %v160_v58  ;;  %v896_v6 = vadd.f32 %v895_v4, %v894_v1  ;;  %v935_v7 = vpop.f32.mrb[15].mxu1 }
 0x113   :  { %v936_v9 = vadd.f32 %v935_v7, %v934_v3 }
 0x114   :  { %v573_v10 = vadd.f32 %v896_v6, %v165_v8  ;;  %v635_v11 = vadd.f32 %v933_v2, %v570_v5 }
 0x116   :  { %v638_v12 = vadd.f32 %v936_v9, %v573_v10 }
 0x117   :  { %v967_v13 = vpop.f32.mrb[16].mxu0 }
 0x118   :  { %v684_v14 = vadd.f32 %v967_v13, %v619_v39  ;;  %v971_v15 = vpop.f32.mrb[16].mxu1  ;;  %v675_v16 = vpop.f32.mrb[17].mxu0 }
 0x119   :  { %v700_v17 = vadd.f32 %v971_v15, %v635_v11  ;;  %v676_v18 = vadd.f32 %v675_v16, %v611_v21  ;;  %v691_v19 = vpop.f32.mrb[17].mxu1  ;;  %v968_v20 = vpop.f32.mrb[18].mxu0 }
 0x11a   :  { %v692_v22 = vadd.f32 %v691_v19, %v627_v57  ;;  %v687_v23 = vadd.f32 %v968_v20, %v622_v42  ;;  %v972_v25 = vpop.f32.mrb[18].mxu1  ;;  %v678_v26 = vpop.f32.mrb[19].mxu0  ;;  %v708_v30 = vmax.f32 %v684_v14, 0.0 }
 0x11b   :  { %v703_v27 = vadd.f32 %v972_v25, %v638_v12  ;;  %v679_v28 = vadd.f32 %v678_v26, %v1285_v24  ;;  %v694_v29 = vpop.f32.mrb[19].mxu1  ;;  %v712_v33 = vmax.f32 %v700_v17, 0.0  ;;  %v706_v34 = vmax.f32 %v676_v18, 0.0 }
 0x11c   :  { %v709_v31 = vmax.f32 %v687_v23, 0.0  ;;  %v695_v32 = vadd.f32 %v694_v29, %v630_v60  ;;  %v710_v37 = vmax.f32 %v692_v22, 0.0 }
 0x11d   :  { %v713_v35 = vmax.f32 %v703_v27, 0.0  ;;  %v707_v36 = vmax.f32 %v679_v28, 0.0 }
 0x11e   :  { %v842_v38 = vpack.c.bf16 %v709_v31, %v708_v30  ;;  %v711_v21 = vmax.f32 %v695_v32, 0.0 }
 0x11f   :  { %v852_v39 = vpack.c.bf16 %v713_v35, %v712_v33  ;;  %v837_v40 = vpack.c.bf16 %v707_v36, %v706_v34 }
 0x120   :  { %854 = vst [vmem:[%s1303_s3 + $0x8] sm:$0xff] %v842_v38   ;;  %v847_v41 = vpack.c.bf16 %v711_v21, %v710_v37 }
 0x121   :  { %856 = vst [vmem:[%s1303_s3 + $0x18] sm:$0xff] %v852_v39   ;;  %838 = vst [vmem:[%s1303_s3] sm:$0xff] %v837_v40  }
 0x122   :  { %855 = vst [vmem:[%s1303_s3 + $0x10] sm:$0xff] %v847_v41  }

// kernel: dqn_forward.7
= control target key start
LH: loop header
LB: loop body
LE: loop exit
PB: predicated region body
PF: predicated region fallthrough
CT: control target
= control target key end

     0   :  { %10 = vsyncpa [#allocation4], 0  ;;  %s5295_s18 = smov 0   ;;  %s5297_s19 = smov 0   ;;  %s5966_s0 = inlined_call_operand.vmem [shape: bf16[2,3328], index: 0, kind: input, shape index: {}]   ;;  %s5967_s1 = inlined_call_operand.vmem [shape: bf16[3328,512], index: 1, kind: input, shape index: {}]   ;;  %s5968_s2 = inlined_call_operand.vmem [shape: f32[1,512], index: 2, kind: input, shape index: {}]   ;;  %s5969_s3 = inlined_call_operand.vmem [shape: bf16[512,128], index: 3, kind: input, shape index: {}]   ;;  %s5970_s4 = inlined_call_operand.vmem [shape: f32[1,128], index: 4, kind: input, shape index: {}]   ;;  %s5971_s5 = inlined_call_operand.hbm [shape: f32[2,128], index: 5, kind: output, shape index: {}]  }
   0x1   :  { %s5299_s20 = smov 0  }
   0x2 LB: > { %s3959_s21 = sadd.s32 4294967295, %s5258_s20   ;;  %s25_s22 = sadd.s32 1, %s5254_s19  ;;  %s5258_s20 = sphi %s5299_s20, %s16_s20   ;;  %s5254_s19 = sphi %s5297_s19, %s5974_s19   ;;  %s5250_s18 = sphi %s5295_s18, %s5973_s18  }
   0x3   : > { %p26_p0 = scmp.ge.s32.totalorder %s25_s22, 2  ;;  %p3962_p1 = scmp.ge.s32.totalorder %s5258_s20, 1 }
   0x4   : > { %p218_p2 = scmp.lt.s32.totalorder %s5258_s20, 3 }
   0x5   : > { %s5976_s22 = smov (%p26_p0, %s25_s22), 0 }
   0x6   : > { %p219_p3 = pnand %p3962_p1, %p218_p2 }
   0x7   : > { %s250_s23 = smul.u32 (!%p219_p3), 13, %s5250_s18  ;;  %p3965_p6 = scmp.ne.s32.totalorder (!%p219_p3), %s5250_s18, 0 }
   0x8   : > { %222 = sbr.rel (%p219_p3) target bundleno = 926 (0x39e), region = 40 }
   0x9   : > { %s259_s24 = smul.u32 (!%p219_p3), 208, %s5250_s18  ;;  %p253_p4 = scmp.lt.s32.totalorder (!%p219_p3), %s250_s23, 25 }
   0xb   : > { %p260_p5 = scmp.lt.s32.totalorder (!%p219_p3), %s259_s24, 415 }
   0xf   : > { %s5978_s23 = smov (!%p253_p4, %s250_s23), 25  ;;  %s5980_s24 = smov (!%p260_p5, %s259_s24), 415 }
  0x10   : > { %s5321_s27 = scalar_lea.vmem %s5966_s0, %s5978_s23  ;;  %s4420_s28 = sshll.u32 %s5980_s24, 4  ;;  %v5260_v0 = vmov (!%p3965_p6), 0.0  }
  0x11   : > { %s5326_s6 = scalar_lea.vmem %s5967_s1, %s4420_s28  ;;  %270 = sbr.rel (%p3965_p6) target bundleno = 24 (0x18), region = 44  ;;  %271 = vst [vmem:[#allocation2] sm:$0xff] (!%p3965_p6), %v5260_v0 }
  0x18 PF: > { %v4548_v1 = vld [vmem:[%s5326_s6 + $0x4] ss:$16 sps:$4 sm:$0xff]   ;;  %v4550_v2 = vld [vmem:[%s5326_s6 + $0xc] ss:$16 sps:$4 sm:$0xff]   ;;  %v4552_v3 = vld [vmem:[%s5326_s6] ss:$16 sps:$4 sm:$0xff]   ;;  %v697_v39 = vlaneseq }
  0x19   : > { %2874 = vmatprep.subr.bf16.mxu0 %v4548_v1  ;;  %v4553_v4 = vld [vmem:[%s5326_s6 + $0x8] ss:$16 sps:$4 sm:$0xff]   ;;  %3161 = vmatprep.subr.bf16.mxu1 %v4550_v2  ;;  %v4554_v5 = vld [vmem:[%s5326_s6 + $0x24] ss:$16 sps:$4 sm:$0xff]   ;;  %v4556_v6 = vld [vmem:[%s5326_s6 + $0x2c] ss:$16 sps:$4 sm:$0xff]  }
  0x1a   : > { %2875 = vmatpush1.bf16.msra.mxu0 %v4552_v3  ;;  %3162 = vmatpush1.bf16.msra.mxu1 %v4553_v4  ;;  %v4558_v7 = vld [vmem:[%s5326_s6 + $0x20] ss:$16 sps:$4 sm:$0xff]   ;;  %v4559_v8 = vld [vmem:[%s5326_s6 + $0x28] ss:$16 sps:$4 sm:$0xff]   ;;  %v4560_v9 = vld [vmem:[%s5326_s6 + $0x44] ss:$16 sps:$4 sm:$0xff]  }
  0x1b   : > { %2876 = vmatprep.subr.bf16.mxu0 %v4554_v5  ;;  %3163 = vmatprep.subr.bf16.mxu1 %v4556_v6  ;;  %v4562_v10 = vld [vmem:[%s5326_s6 + $0x4c] ss:$16 sps:$4 sm:$0xff]   ;;  %v4564_v11 = vld [vmem:[%s5326_s6 + $0x40] ss:$16 sps:$4 sm:$0xff]   ;;  %v4565_v12 = vld [vmem:[%s5326_s6 + $0x48] ss:$16 sps:$4 sm:$0xff]  }
  0x1c   : > { %v4566_v13 = vld [vmem:[%s5326_s6 + $0x64] ss:$16 sps:$4 sm:$0xff]   ;;  %v4568_v14 = vld [vmem:[%s5326_s6 + $0x6c] ss:$16 sps:$4 sm:$0xff]   ;;  %v4570_v15 = vld [vmem:[%s5326_s6 + $0x60] ss:$16 sps:$4 sm:$0xff]  }
  0x1d   : > { %v4571_v16 = vld [vmem:[%s5326_s6 + $0x68] ss:$16 sps:$4 sm:$0xff]   ;;  %v4572_v17 = vld [vmem:[%s5326_s6 + $0x84] ss:$16 sps:$4 sm:$0xff]   ;;  %v4574_v18 = vld [vmem:[%s5326_s6 + $0x8c] ss:$16 sps:$4 sm:$0xff]  }
  0x1e   : > { %2877 = vmatpush1.bf16.msra.mxu0 %v4558_v7  ;;  %3164 = vmatpush1.bf16.msra.mxu1 %v4559_v8  ;;  %v4576_v19 = vld [vmem:[%s5326_s6 + $0x80] ss:$16 sps:$4 sm:$0xff]   ;;  %v4577_v20 = vld [vmem:[%s5326_s6 + $0x88] ss:$16 sps:$4 sm:$0xff]   ;;  %v4578_v21 = vld [vmem:[%s5326_s6 + $0xa4] ss:$16 sps:$4 sm:$0xff]  }
  0x1f   : > { %2878 = vmatprep.subr.bf16.mxu0 %v4560_v9  ;;  %3165 = vmatprep.subr.bf16.mxu1 %v4562_v10  ;;  %v4580_v22 = vld [vmem:[%s5326_s6 + $0xac] ss:$16 sps:$4 sm:$0xff]   ;;  %v4582_v23 = vld [vmem:[%s5326_s6 + $0xa0] ss:$16 sps:$4 sm:$0xff]   ;;  %v4583_v24 = vld [vmem:[%s5326_s6 + $0xa8] ss:$16 sps:$4 sm:$0xff]  }
  0x20   : > { %v4584_v25 = vld [vmem:[%s5326_s6 + $0xc4] ss:$16 sps:$4 sm:$0xff]   ;;  %v4586_v26 = vld [vmem:[%s5326_s6 + $0xcc] ss:$16 sps:$4 sm:$0xff]   ;;  %v4588_v27 = vld [vmem:[%s5326_s6 + $0xc0] ss:$16 sps:$4 sm:$0xff]  }
  0x21   : > { %v4589_v28 = vld [vmem:[%s5326_s6 + $0xc8] ss:$16 sps:$4 sm:$0xff]   ;;  %v4590_v29 = vld [vmem:[%s5326_s6 + $0xe4] ss:$16 sps:$4 sm:$0xff]   ;;  %v4592_v30 = vld [vmem:[%s5326_s6 + $0xec] ss:$16 sps:$4 sm:$0xff]  }
  0x22   : > { %2879 = vmatpush1.bf16.msra.mxu0 %v4564_v11  ;;  %3166 = vmatpush1.bf16.msra.mxu1 %v4565_v12  ;;  %v4594_v31 = vld [vmem:[%s5326_s6 + $0xe0] ss:$16 sps:$4 sm:$0xff]   ;;  %v4595_v32 = vld [vmem:[%s5326_s6 + $0xe8] ss:$16 sps:$4 sm:$0xff]   ;;  %v4596_v33 = vld [vmem:[%s5326_s6 + $0x104] ss:$16 sps:$4 sm:$0xff]  }
  0x23   : > { %2880 = vmatprep.subr.bf16.mxu0 %v4566_v13  ;;  %3167 = vmatprep.subr.bf16.mxu1 %v4568_v14  ;;  %v4598_v34 = vld [vmem:[%s5326_s6 + $0x10c] ss:$16 sps:$4 sm:$0xff]   ;;  %v4600_v35 = vld [vmem:[%s5326_s6 + $0x100] ss:$16 sps:$4 sm:$0xff]   ;;  %v4601_v36 = vld [vmem:[%s5326_s6 + $0x108] ss:$16 sps:$4 sm:$0xff]  }
  0x24   : > { %v5261_v37 = vmov 1966171168   ;;  %v4602_v40 = vld [vmem:[%s5326_s6 + $0x124] ss:$16 sps:$4 sm:$0xff]   ;;  %v4604_v41 = vld [vmem:[%s5326_s6 + $0x12c] ss:$16 sps:$4 sm:$0xff]  }
  0x25   : > { %v695_v38 = vunpack.c.l.s4 %v5261_v37  ;;  %v4606_v42 = vld [vmem:[%s5326_s6 + $0x120] ss:$16 sps:$4 sm:$0xff]   ;;  %v5368_v44 = vshrl.u32 %v697_v39, 7  ;;  %v4607_v45 = vld [vmem:[%s5326_s6 + $0x128] ss:$16 sps:$4 sm:$0xff]   ;;  %p4382_p7 = scmp.ne.s32.totalorder %s5250_s18, 1 }
  0x26   : > { %2881 = vmatpush1.bf16.msra.mxu0 %v4570_v15  ;;  %3168 = vmatpush1.bf16.msra.mxu1 %v4571_v16  ;;  %v4608_v46 = vld [vmem:[%s5326_s6 + $0x144] ss:$16 sps:$4 sm:$0xff]   ;;  %v4610_v47 = vld [vmem:[%s5326_s6 + $0x14c] ss:$16 sps:$4 sm:$0xff]   ;;  %v4612_v48 = vld [vmem:[%s5326_s6 + $0x140] ss:$16 sps:$4 sm:$0xff]  }
  0x27   : > { %2882 = vmatprep.subr.bf16.mxu0 %v4572_v17  ;;  %3169 = vmatprep.subr.bf16.mxu1 %v4574_v18  ;;  %v696_v43 = vunpack.c.0.s8 %v695_v38  ;;  %v4613_v49 = vld [vmem:[%s5326_s6 + $0x148] ss:$16 sps:$4 sm:$0xff]   ;;  %v4614_v51 = vld [vmem:[%s5326_s6 + $0x164] ss:$16 sps:$4 sm:$0xff]   ;;  %v4616_v52 = vld [vmem:[%s5326_s6 + $0x16c] ss:$16 sps:$4 sm:$0xff]  }
  0x28   : > { %v5381_v53 = vld [vmem:[%s5321_s27] sm:$0xff]  ;;  %v4619_v56 = vld [vmem:[%s5326_s6 + $0x168] ss:$16 sps:$4 sm:$0xff]   ;;  %v4622_v58 = vld [vmem:[%s5326_s6 + $0x18c] ss:$16 sps:$4 sm:$0xff]  }
  0x29   : > { %v5376_v50 = vsub.s32 %v696_v43, %v5368_v44  ;;  %v4618_v54 = vld [vmem:[%s5326_s6 + $0x160] ss:$16 sps:$4 sm:$0xff]   ;;  %v4620_v57 = vld [vmem:[%s5326_s6 + $0x184] ss:$16 sps:$4 sm:$0xff]   ;;  %v4625_v62 = vld [vmem:[%s5326_s6 + $0x188] ss:$16 sps:$4 sm:$0xff]  }
  0x2a   : > { %2883 = vmatpush1.bf16.msra.mxu0 %v4576_v19  ;;  %3170 = vmatpush1.bf16.msra.mxu1 %v4577_v20  ;;  %v4624_v60 = vld [vmem:[%s5326_s6 + $0x180] ss:$16 sps:$4 sm:$0xff]   ;;  %v4626_v63 = vld [vmem:[%s5326_s6 + $0x1a4] ss:$16 sps:$4 sm:$0xff]   ;;  %v4628_v0 = vld [vmem:[%s5326_s6 + $0x1ac] ss:$16 sps:$4 sm:$0xff]  }
  0x2b   : > { %2884 = vmatprep.subr.bf16.mxu0 %v4578_v21  ;;  %3171 = vmatprep.subr.bf16.mxu1 %v4580_v22  ;;  %v700_v55 = vrot.slane %v5381_v53, %v5376_v50  ;;  %v4630_v1 = vld [vmem:[%s5326_s6 + $0x1a0] ss:$16 sps:$4 sm:$0xff]   ;;  %v4631_v2 = vld [vmem:[%s5326_s6 + $0x1a8] ss:$16 sps:$4 sm:$0xff]   ;;  %v4632_v3 = vld [vmem:[%s5326_s6 + $0x1c4] ss:$16 sps:$4 sm:$0xff]  }
  0x2c   : > { %v4634_v4 = vld [vmem:[%s5326_s6 + $0x1cc] ss:$16 sps:$4 sm:$0xff]   ;;  %v4636_v5 = vld [vmem:[%s5326_s6 + $0x1c0] ss:$16 sps:$4 sm:$0xff]   ;;  %v4637_v6 = vld [vmem:[%s5326_s6 + $0x1c8] ss:$16 sps:$4 sm:$0xff]  }
  0x2d   : > { %v708_v59 = vcombine.high %v700_v55, %v700_v55  ;;  %v4638_v7 = vld [vmem:[%s5326_s6 + $0x1e4] ss:$16 sps:$4 sm:$0xff]   ;;  %v4640_v8 = vld [vmem:[%s5326_s6 + $0x1ec] ss:$16 sps:$4 sm:$0xff]   ;;  %v4642_v9 = vld [vmem:[%s5326_s6 + $0x1e0] ss:$16 sps:$4 sm:$0xff]   ;;  %v5408_v14 = vrot.slane %v700_v55, %v5376_v50 }
  0x2e   : > { %2885 = vmatpush1.bf16.msra.mxu0 %v4582_v23  ;;  %3172 = vmatpush1.bf16.msra.mxu1 %v4583_v24  ;;  %v4643_v10 = vld [vmem:[%s5326_s6 + $0x1e8] ss:$16 sps:$4 sm:$0xff]   ;;  %v4646_v11 = vld [vmem:[%s5326_s6 + $0x204] ss:$16 sps:$4 sm:$0xff]   ;;  %v4649_v12 = vld [vmem:[%s5326_s6 + $0x20c] ss:$16 sps:$4 sm:$0xff]  }
  0x2f   : > { %2886 = vmatprep.subr.bf16.mxu0 %v4584_v25  ;;  %3173 = vmatprep.subr.bf16.mxu1 %v4586_v26  ;;  %v730_v61 = vrot.slane %v708_v59, %v5376_v50  ;;  %v4644_v13 = vld [vmem:[%s5326_s6 + $0x200] ss:$16 sps:$4 sm:$0xff]   ;;  %v4647_v15 = vld [vmem:[%s5326_s6 + $0x208] ss:$16 sps:$4 sm:$0xff]   ;;  %v4652_v16 = vld [vmem:[%s5326_s6 + $0x224] ss:$16 sps:$4 sm:$0xff]  }
  0x30   : > { %v4655_v17 = vld [vmem:[%s5326_s6 + $0x22c] ss:$16 sps:$4 sm:$0xff]   ;;  %v4650_v19 = vld [vmem:[%s5326_s6 + $0x220] ss:$16 sps:$4 sm:$0xff]   ;;  %v4653_v20 = vld [vmem:[%s5326_s6 + $0x228] ss:$16 sps:$4 sm:$0xff]  }
  0x31   : > { %2906 = vmatprep.mubr.bf16.mxu0 %v730_v61  ;;  %3193 = vmatprep.mubr.bf16.mxu1 %v730_v61  ;;  %v740_v18 = vcombine.high %v730_v61, %v730_v61  ;;  %v4658_v21 = vld [vmem:[%s5326_s6 + $0x244] ss:$16 sps:$4 sm:$0xff]   ;;  %v4661_v22 = vld [vmem:[%s5326_s6 + $0x24c] ss:$16 sps:$4 sm:$0xff]   ;;  %v4656_v23 = vld [vmem:[%s5326_s6 + $0x240] ss:$16 sps:$4 sm:$0xff]  }
  0x32   : > { %2887 = vmatpush1.bf16.msra.mxu0 %v4588_v27  ;;  %3174 = vmatpush1.bf16.msra.mxu1 %v4589_v28  ;;  %v4659_v24 = vld [vmem:[%s5326_s6 + $0x248] ss:$16 sps:$4 sm:$0xff]   ;;  %v4664_v25 = vld [vmem:[%s5326_s6 + $0x264] ss:$16 sps:$4 sm:$0xff]   ;;  %v4667_v26 = vld [vmem:[%s5326_s6 + $0x26c] ss:$16 sps:$4 sm:$0xff]  }
  0x33   : > { %2888 = vmatprep.subr.bf16.mxu0 %v4590_v29  ;;  %3175 = vmatprep.subr.bf16.mxu1 %v4592_v30  ;;  %v4662_v27 = vld [vmem:[%s5326_s6 + $0x260] ss:$16 sps:$4 sm:$0xff]   ;;  %v4665_v28 = vld [vmem:[%s5326_s6 + $0x268] ss:$16 sps:$4 sm:$0xff]   ;;  %v4670_v29 = vld [vmem:[%s5326_s6 + $0x284] ss:$16 sps:$4 sm:$0xff]  }
  0x34   : > { %v4673_v30 = vld [vmem:[%s5326_s6 + $0x28c] ss:$16 sps:$4 sm:$0xff]   ;;  %v4682_v37 = vld [vmem:[%s5326_s6 + $0x2c4] ss:$16 sps:$4 sm:$0xff]   ;;  %v4680_v39 = vld [vmem:[%s5326_s6 + $0x2c0] ss:$16 sps:$4 sm:$0xff]  }
  0x35   : > { %v4685_v38 = vld [vmem:[%s5326_s6 + $0x2cc] ss:$16 sps:$4 sm:$0xff]   ;;  %v4686_v43 = vld [vmem:[%s5326_s6 + $0x2e0] ss:$16 sps:$4 sm:$0xff]   ;;  %v4701_v55 = vld [vmem:[%s5326_s6 + $0x328] ss:$16 sps:$4 sm:$0xff]  }
  0x36   : > { %2889 = vmatpush1.bf16.msra.mxu0 %v4594_v31  ;;  %3176 = vmatpush1.bf16.msra.mxu1 %v4595_v32  ;;  %v4668_v31 = vld [vmem:[%s5326_s6 + $0x280] ss:$16 sps:$4 sm:$0xff]   ;;  %v4671_v32 = vld [vmem:[%s5326_s6 + $0x288] ss:$16 sps:$4 sm:$0xff]   ;;  %v4715_v61 = vld [vmem:[%s5326_s6 + $0x36c] ss:$16 sps:$4 sm:$0xff]  }
  0x37   : > { %2890 = vmatprep.subr.bf16.mxu0 %v4596_v33  ;;  %3177 = vmatprep.subr.bf16.mxu1 %v4598_v34  ;;  %v4676_v33 = vld [vmem:[%s5326_s6 + $0x2a4] ss:$16 sps:$4 sm:$0xff]   ;;  %v4679_v34 = vld [vmem:[%s5326_s6 + $0x2ac] ss:$16 sps:$4 sm:$0xff]   ;;  %v4707_v59 = vld [vmem:[%s5326_s6 + $0x348] ss:$16 sps:$4 sm:$0xff]  }
  0x3a   : > { %2891 = vmatpush1.bf16.msra.mxu0 %v4600_v35  ;;  %3178 = vmatpush1.bf16.msra.mxu1 %v4601_v36  ;;  %v4674_v35 = vld [vmem:[%s5326_s6 + $0x2a0] ss:$16 sps:$4 sm:$0xff]   ;;  %v4677_v36 = vld [vmem:[%s5326_s6 + $0x2a8] ss:$16 sps:$4 sm:$0xff]  }
  0x3b   : > { %2892 = vmatprep.subr.bf16.mxu0 %v4602_v40  ;;  %3179 = vmatprep.subr.bf16.mxu1 %v4604_v41  ;;  %v4683_v40 = vld [vmem:[%s5326_s6 + $0x2c8] ss:$16 sps:$4 sm:$0xff]   ;;  %v4688_v41 = vld [vmem:[%s5326_s6 + $0x2e4] ss:$16 sps:$4 sm:$0xff]  }
  0x3e   : > { %2893 = vmatpush1.bf16.msra.mxu0 %v4606_v42  ;;  %3180 = vmatpush1.bf16.msra.mxu1 %v4607_v45  ;;  %v4691_v42 = vld [vmem:[%s5326_s6 + $0x2ec] ss:$16 sps:$4 sm:$0xff]   ;;  %v4689_v45 = vld [vmem:[%s5326_s6 + $0x2e8] ss:$16 sps:$4 sm:$0xff]  }
  0x3f   : > { %2894 = vmatprep.subr.bf16.mxu0 %v4608_v46  ;;  %3181 = vmatprep.subr.bf16.mxu1 %v4610_v47  ;;  %v4694_v46 = vld [vmem:[%s5326_s6 + $0x304] ss:$16 sps:$4 sm:$0xff]   ;;  %v4697_v47 = vld [vmem:[%s5326_s6 + $0x30c] ss:$16 sps:$4 sm:$0xff]  }
  0x42   : > { %2895 = vmatpush1.bf16.msra.mxu0 %v4612_v48  ;;  %3182 = vmatpush1.bf16.msra.mxu1 %v4613_v49  ;;  %v4692_v48 = vld [vmem:[%s5326_s6 + $0x300] ss:$16 sps:$4 sm:$0xff]   ;;  %v4695_v49 = vld [vmem:[%s5326_s6 + $0x308] ss:$16 sps:$4 sm:$0xff]  }
  0x43   : > { %2896 = vmatprep.subr.bf16.mxu0 %v4614_v51  ;;  %3183 = vmatprep.subr.bf16.mxu1 %v4616_v52  ;;  %v4700_v51 = vld [vmem:[%s5326_s6 + $0x324] ss:$16 sps:$4 sm:$0xff]   ;;  %v4703_v52 = vld [vmem:[%s5326_s6 + $0x32c] ss:$16 sps:$4 sm:$0xff]  }
  0x46   : > { %2897 = vmatpush1.bf16.msra.mxu0 %v4618_v54  ;;  %3184 = vmatpush1.bf16.msra.mxu1 %v4619_v56  ;;  %v4698_v54 = vld [vmem:[%s5326_s6 + $0x320] ss:$16 sps:$4 sm:$0xff]   ;;  %v4706_v56 = vld [vmem:[%s5326_s6 + $0x344] ss:$16 sps:$4 sm:$0xff]  }
  0x47   : > { %2898 = vmatprep.subr.bf16.mxu0 %v4620_v57  ;;  %3185 = vmatprep.subr.bf16.mxu1 %v4622_v58  ;;  %v4709_v57 = vld [vmem:[%s5326_s6 + $0x34c] ss:$16 sps:$4 sm:$0xff]   ;;  %v4704_v58 = vld [vmem:[%s5326_s6 + $0x340] ss:$16 sps:$4 sm:$0xff]  }
  0x4a   : > { %2899 = vmatpush1.bf16.msra.mxu0 %v4624_v60  ;;  %3186 = vmatpush1.bf16.msra.mxu1 %v4625_v62  ;;  %v4712_v60 = vld [vmem:[%s5326_s6 + $0x364] ss:$16 sps:$4 sm:$0xff]   ;;  %v4710_v62 = vld [vmem:[%s5326_s6 + $0x360] ss:$16 sps:$4 sm:$0xff]  }
  0x4b   : > { %2900 = vmatprep.subr.bf16.mxu0 %v4626_v63  ;;  %3187 = vmatprep.subr.bf16.mxu1 %v4628_v0  ;;  %v4713_v63 = vld [vmem:[%s5326_s6 + $0x368] ss:$16 sps:$4 sm:$0xff]   ;;  %v4718_v0 = vld [vmem:[%s5326_s6 + $0x384] ss:$16 sps:$4 sm:$0xff]  }
  0x4e   : > { %2901 = vmatpush1.bf16.msra.mxu0 %v4630_v1  ;;  %3188 = vmatpush1.bf16.msra.mxu1 %v4631_v2  ;;  %v4721_v1 = vld [vmem:[%s5326_s6 + $0x38c] ss:$16 sps:$4 sm:$0xff]   ;;  %v4716_v2 = vld [vmem:[%s5326_s6 + $0x380] ss:$16 sps:$4 sm:$0xff]  }
  0x4f   : > { %2902 = vmatprep.subr.bf16.mxu0 %v4632_v3  ;;  %3189 = vmatprep.subr.bf16.mxu1 %v4634_v4  ;;  %v4719_v3 = vld [vmem:[%s5326_s6 + $0x388] ss:$16 sps:$4 sm:$0xff]   ;;  %v4724_v4 = vld [vmem:[%s5326_s6 + $0x3a4] ss:$16 sps:$4 sm:$0xff]  }
  0x52   : > { %2903 = vmatpush1.bf16.msra.mxu0 %v4636_v5  ;;  %3190 = vmatpush1.bf16.msra.mxu1 %v4637_v6  ;;  %v4727_v5 = vld [vmem:[%s5326_s6 + $0x3ac] ss:$16 sps:$4 sm:$0xff]   ;;  %v4722_v6 = vld [vmem:[%s5326_s6 + $0x3a0] ss:$16 sps:$4 sm:$0xff]  }
  0x53   : > { %2904 = vmatprep.subr.bf16.mxu0 %v4638_v7  ;;  %3191 = vmatprep.subr.bf16.mxu1 %v4640_v8  ;;  %v4725_v7 = vld [vmem:[%s5326_s6 + $0x3a8] ss:$16 sps:$4 sm:$0xff]   ;;  %v4730_v8 = vld [vmem:[%s5326_s6 + $0x3c4] ss:$16 sps:$4 sm:$0xff]  }
  0x56   : > { %2905 = vmatpush1.bf16.msra.mxu0 %v4642_v9  ;;  %3192 = vmatpush1.bf16.msra.mxu1 %v4643_v10  ;;  %v4733_v9 = vld [vmem:[%s5326_s6 + $0x3cc] ss:$16 sps:$4 sm:$0xff]   ;;  %v693_v10 = vcombine.high %v5381_v53, %v5381_v53  ;;  %v4737_v53 = vld [vmem:[%s5326_s6 + $0x3e8] ss:$16 sps:$4 sm:$0xff]  }
  0x57   : > { %2915 = vmatprep.subr.bf16.mxu0 %v4646_v11  ;;  %3202 = vmatprep.subr.bf16.mxu1 %v4649_v12  ;;  %v4728_v11 = vld [vmem:[%s5326_s6 + $0x3c0] ss:$16 sps:$4 sm:$0xff]   ;;  %v4731_v12 = vld [vmem:[%s5326_s6 + $0x3c8] ss:$16 sps:$4 sm:$0xff]  }
  0x59   : > { %2907 = vmatmul.mubr.bf16.vlgmr.msra.gmra.mrb[0].mxu0 %v5408_v14  ;;  %3194 = vmatmul.mubr.bf16.vlgmr.msra.gmra.mrb[0].mxu1 %v5408_v14 }
  0x5a   : > { %2916 = vmatpush1.bf16.msra.mxu0 %v4644_v13  ;;  %3203 = vmatpush1.bf16.msra.mxu1 %v4647_v15  ;;  %v4736_v13 = vld [vmem:[%s5326_s6 + $0x3e4] ss:$16 sps:$4 sm:$0xff]   ;;  %v4739_v15 = vld [vmem:[%s5326_s6 + $0x3ec] ss:$16 sps:$4 sm:$0xff]  }
  0x5b   : > { %2917 = vmatprep.subr.bf16.mxu0 %v4652_v16  ;;  %3204 = vmatprep.subr.bf16.mxu1 %v4655_v17  ;;  %v5474_v16 = vrot.slane %v693_v10, %v5376_v50  ;;  %v4734_v17 = vld [vmem:[%s5326_s6 + $0x3e0] ss:$16 sps:$4 sm:$0xff]   ;;  %v4815_v10 = vld [vmem:[%s5326_s6 + $0x588] ss:$16 sps:$4 sm:$0xff]  }
  0x5c   : > { %2947 = vmatprep.mubr.bf16.mxu0 %v740_v18  ;;  %3234 = vmatprep.mubr.bf16.mxu1 %v740_v18  ;;  %v4742_v18 = vld [vmem:[%s5326_s6 + $0x404] ss:$16 sps:$4 sm:$0xff]  }
  0x5e   : > { %2918 = vmatpush1.bf16.msra.mxu0 %v4650_v19  ;;  %3205 = vmatpush1.bf16.msra.mxu1 %v4653_v20  ;;  %v4745_v19 = vld [vmem:[%s5326_s6 + $0x40c] ss:$16 sps:$4 sm:$0xff]   ;;  %v709_v20 = vcombine.high %v5474_v16, %v5474_v16 }
  0x5f   : > { %2919 = vmatprep.subr.bf16.mxu0 %v4658_v21  ;;  %3206 = vmatprep.subr.bf16.mxu1 %v4661_v22  ;;  %v4740_v21 = vld [vmem:[%s5326_s6 + $0x400] ss:$16 sps:$4 sm:$0xff]   ;;  %v738_v22 = vcombine.high %v5408_v14, %v5408_v14  ;;  %v4749_v14 = vld [vmem:[%s5326_s6 + $0x428] ss:$16 sps:$4 sm:$0xff]  }
  0x62   : > { %2920 = vmatpush1.bf16.msra.mxu0 %v4656_v23  ;;  %3207 = vmatpush1.bf16.msra.mxu1 %v4659_v24  ;;  %v4743_v23 = vld [vmem:[%s5326_s6 + $0x408] ss:$16 sps:$4 sm:$0xff]   ;;  %v4748_v24 = vld [vmem:[%s5326_s6 + $0x424] ss:$16 sps:$4 sm:$0xff]  }
  0x63   : > { %2921 = vmatprep.subr.bf16.mxu0 %v4664_v25  ;;  %3208 = vmatprep.subr.bf16.mxu1 %v4667_v26  ;;  %v4751_v25 = vld [vmem:[%s5326_s6 + $0x42c] ss:$16 sps:$4 sm:$0xff]   ;;  %v5489_v26 = vrot.slane %v709_v20, %v5376_v50  ;;  %v4832_v20 = vld [vmem:[%s5326_s6 + $0x5e4] ss:$16 sps:$4 sm:$0xff]  }
  0x66   : > { %2922 = vmatpush1.bf16.msra.mxu0 %v4662_v27  ;;  %3209 = vmatpush1.bf16.msra.mxu1 %v4665_v28  ;;  %v4746_v27 = vld [vmem:[%s5326_s6 + $0x420] ss:$16 sps:$4 sm:$0xff]   ;;  %v4754_v28 = vld [vmem:[%s5326_s6 + $0x444] ss:$16 sps:$4 sm:$0xff]  }
  0x67   : > { %2923 = vmatprep.subr.bf16.mxu0 %v4670_v29  ;;  %3210 = vmatprep.subr.bf16.mxu1 %v4673_v30  ;;  %v4757_v29 = vld [vmem:[%s5326_s6 + $0x44c] ss:$16 sps:$4 sm:$0xff]   ;;  %v4752_v30 = vld [vmem:[%s5326_s6 + $0x440] ss:$16 sps:$4 sm:$0xff]  }
  0x6a   : > { %2924 = vmatpush1.bf16.msra.mxu0 %v4668_v31  ;;  %3211 = vmatpush1.bf16.msra.mxu1 %v4671_v32  ;;  %v4755_v31 = vld [vmem:[%s5326_s6 + $0x448] ss:$16 sps:$4 sm:$0xff]   ;;  %v4760_v32 = vld [vmem:[%s5326_s6 + $0x464] ss:$16 sps:$4 sm:$0xff]  }
  0x6b   : > { %2925 = vmatprep.subr.bf16.mxu0 %v4676_v33  ;;  %3212 = vmatprep.subr.bf16.mxu1 %v4679_v34  ;;  %v4763_v33 = vld [vmem:[%s5326_s6 + $0x46c] ss:$16 sps:$4 sm:$0xff]   ;;  %v4758_v34 = vld [vmem:[%s5326_s6 + $0x460] ss:$16 sps:$4 sm:$0xff]  }
  0x6e   : > { %2926 = vmatpush1.bf16.msra.mxu0 %v4674_v35  ;;  %3213 = vmatpush1.bf16.msra.mxu1 %v4677_v36  ;;  %v4761_v35 = vld [vmem:[%s5326_s6 + $0x468] ss:$16 sps:$4 sm:$0xff]   ;;  %v4766_v36 = vld [vmem:[%s5326_s6 + $0x484] ss:$16 sps:$4 sm:$0xff]  }
  0x6f   : > { %2927 = vmatprep.subr.bf16.mxu0 %v4682_v37  ;;  %3214 = vmatprep.subr.bf16.mxu1 %v4685_v38  ;;  %v4769_v37 = vld [vmem:[%s5326_s6 + $0x48c] ss:$16 sps:$4 sm:$0xff]   ;;  %v4764_v38 = vld [vmem:[%s5326_s6 + $0x480] ss:$16 sps:$4 sm:$0xff]  }
  0x72   : > { %2928 = vmatpush1.bf16.msra.mxu0 %v4680_v39  ;;  %3215 = vmatpush1.bf16.msra.mxu1 %v4683_v40  ;;  %v4767_v39 = vld [vmem:[%s5326_s6 + $0x488] ss:$16 sps:$4 sm:$0xff]   ;;  %v4772_v40 = vld [vmem:[%s5326_s6 + $0x4a4] ss:$16 sps:$4 sm:$0xff]  }
  0x73   : > { %2929 = vmatprep.subr.bf16.mxu0 %v4688_v41  ;;  %3216 = vmatprep.subr.bf16.mxu1 %v4691_v42  ;;  %v4775_v41 = vld [vmem:[%s5326_s6 + $0x4ac] ss:$16 sps:$4 sm:$0xff]   ;;  %v4770_v42 = vld [vmem:[%s5326_s6 + $0x4a0] ss:$16 sps:$4 sm:$0xff]  }
  0x76   : > { %2930 = vmatpush1.bf16.msra.mxu0 %v4686_v43  ;;  %3217 = vmatpush1.bf16.msra.mxu1 %v4689_v45  ;;  %v4773_v43 = vld [vmem:[%s5326_s6 + $0x4a8] ss:$16 sps:$4 sm:$0xff]   ;;  %v4778_v45 = vld [vmem:[%s5326_s6 + $0x4c4] ss:$16 sps:$4 sm:$0xff]  }
  0x77   : > { %2931 = vmatprep.subr.bf16.mxu0 %v4694_v46  ;;  %3218 = vmatprep.subr.bf16.mxu1 %v4697_v47  ;;  %v4781_v46 = vld [vmem:[%s5326_s6 + $0x4cc] ss:$16 sps:$4 sm:$0xff]   ;;  %v4776_v47 = vld [vmem:[%s5326_s6 + $0x4c0] ss:$16 sps:$4 sm:$0xff]  }
  0x7a   : > { %2932 = vmatpush1.bf16.msra.mxu0 %v4692_v48  ;;  %3219 = vmatpush1.bf16.msra.mxu1 %v4695_v49  ;;  %v4779_v48 = vld [vmem:[%s5326_s6 + $0x4c8] ss:$16 sps:$4 sm:$0xff]   ;;  %v4784_v49 = vld [vmem:[%s5326_s6 + $0x4e4] ss:$16 sps:$4 sm:$0xff]  }
  0x7b   : > { %2933 = vmatprep.subr.bf16.mxu0 %v4700_v51  ;;  %3220 = vmatprep.subr.bf16.mxu1 %v4703_v52  ;;  %v4787_v51 = vld [vmem:[%s5326_s6 + $0x4ec] ss:$16 sps:$4 sm:$0xff]   ;;  %v4782_v52 = vld [vmem:[%s5326_s6 + $0x4e0] ss:$16 sps:$4 sm:$0xff]  }
  0x7e   : > { %2934 = vmatpush1.bf16.msra.mxu0 %v4698_v54  ;;  %3221 = vmatpush1.bf16.msra.mxu1 %v4701_v55  ;;  %v4785_v54 = vld [vmem:[%s5326_s6 + $0x4e8] ss:$16 sps:$4 sm:$0xff]   ;;  %v4790_v55 = vld [vmem:[%s5326_s6 + $0x504] ss:$16 sps:$4 sm:$0xff]  }
  0x7f   : > { %2935 = vmatprep.subr.bf16.mxu0 %v4706_v56  ;;  %3222 = vmatprep.subr.bf16.mxu1 %v4709_v57  ;;  %v4793_v56 = vld [vmem:[%s5326_s6 + $0x50c] ss:$16 sps:$4 sm:$0xff]   ;;  %v4788_v57 = vld [vmem:[%s5326_s6 + $0x500] ss:$16 sps:$4 sm:$0xff]  }
  0x82   : > { %2936 = vmatpush1.bf16.msra.mxu0 %v4704_v58  ;;  %3223 = vmatpush1.bf16.msra.mxu1 %v4707_v59  ;;  %v4791_v58 = vld [vmem:[%s5326_s6 + $0x508] ss:$16 sps:$4 sm:$0xff]   ;;  %v4796_v59 = vld [vmem:[%s5326_s6 + $0x524] ss:$16 sps:$4 sm:$0xff]  }
  0x83   : > { %2937 = vmatprep.subr.bf16.mxu0 %v4712_v60  ;;  %3224 = vmatprep.subr.bf16.mxu1 %v4715_v61  ;;  %v4799_v60 = vld [vmem:[%s5326_s6 + $0x52c] ss:$16 sps:$4 sm:$0xff]   ;;  %v4794_v61 = vld [vmem:[%s5326_s6 + $0x520] ss:$16 sps:$4 sm:$0xff]  }
  0x86   : > { %2938 = vmatpush1.bf16.msra.mxu0 %v4710_v62  ;;  %3225 = vmatpush1.bf16.msra.mxu1 %v4713_v63  ;;  %v4797_v62 = vld [vmem:[%s5326_s6 + $0x528] ss:$16 sps:$4 sm:$0xff]   ;;  %v4802_v63 = vld [vmem:[%s5326_s6 + $0x544] ss:$16 sps:$4 sm:$0xff]  }
  0x87   : > { %2939 = vmatprep.subr.bf16.mxu0 %v4718_v0  ;;  %3226 = vmatprep.subr.bf16.mxu1 %v4721_v1  ;;  %v4805_v0 = vld [vmem:[%s5326_s6 + $0x54c] ss:$16 sps:$4 sm:$0xff]   ;;  %v4800_v1 = vld [vmem:[%s5326_s6 + $0x540] ss:$16 sps:$4 sm:$0xff]  }
  0x8a   : > { %2940 = vmatpush1.bf16.msra.mxu0 %v4716_v2  ;;  %3227 = vmatpush1.bf16.msra.mxu1 %v4719_v3  ;;  %v4803_v2 = vld [vmem:[%s5326_s6 + $0x548] ss:$16 sps:$4 sm:$0xff]   ;;  %v4808_v3 = vld [vmem:[%s5326_s6 + $0x564] ss:$16 sps:$4 sm:$0xff]  }
  0x8b   : > { %2941 = vmatprep.subr.bf16.mxu0 %v4724_v4  ;;  %3228 = vmatprep.subr.bf16.mxu1 %v4727_v5  ;;  %v4811_v4 = vld [vmem:[%s5326_s6 + $0x56c] ss:$16 sps:$4 sm:$0xff]   ;;  %v4806_v5 = vld [vmem:[%s5326_s6 + $0x560] ss:$16 sps:$4 sm:$0xff]  }
  0x8e   : > { %2942 = vmatpush1.bf16.msra.mxu0 %v4722_v6  ;;  %3229 = vmatpush1.bf16.msra.mxu1 %v4725_v7  ;;  %v4809_v6 = vld [vmem:[%s5326_s6 + $0x568] ss:$16 sps:$4 sm:$0xff]   ;;  %v4814_v7 = vld [vmem:[%s5326_s6 + $0x584] ss:$16 sps:$4 sm:$0xff]  }
  0x8f   : > { %2943 = vmatprep.subr.bf16.mxu0 %v4730_v8  ;;  %3230 = vmatprep.subr.bf16.mxu1 %v4733_v9  ;;  %v4817_v8 = vld [vmem:[%s5326_s6 + $0x58c] ss:$16 sps:$4 sm:$0xff]   ;;  %v4812_v9 = vld [vmem:[%s5326_s6 + $0x580] ss:$16 sps:$4 sm:$0xff]  }
  0x92   : > { %2944 = vmatpush1.bf16.msra.mxu0 %v4728_v11  ;;  %3231 = vmatpush1.bf16.msra.mxu1 %v4731_v12  ;;  %v4820_v11 = vld [vmem:[%s5326_s6 + $0x5a4] ss:$16 sps:$4 sm:$0xff]   ;;  %v4823_v12 = vld [vmem:[%s5326_s6 + $0x5ac] ss:$16 sps:$4 sm:$0xff]  }
  0x93   : > { %2945 = vmatprep.subr.bf16.mxu0 %v4736_v13  ;;  %3232 = vmatprep.subr.bf16.mxu1 %v4739_v15  ;;  %v4818_v13 = vld [vmem:[%s5326_s6 + $0x5a0] ss:$16 sps:$4 sm:$0xff]   ;;  %v4821_v15 = vld [vmem:[%s5326_s6 + $0x5a8] ss:$16 sps:$4 sm:$0xff]  }
  0x96   : > { %2946 = vmatpush1.bf16.msra.mxu0 %v4734_v17  ;;  %3233 = vmatpush1.bf16.msra.mxu1 %v4737_v53  ;;  %v4826_v17 = vld [vmem:[%s5326_s6 + $0x5c4] ss:$16 sps:$4 sm:$0xff]   ;;  %v4829_v53 = vld [vmem:[%s5326_s6 + $0x5cc] ss:$16 sps:$4 sm:$0xff]  }
  0x97   : > { %2956 = vmatprep.subr.bf16.mxu0 %v4742_v18  ;;  %3243 = vmatprep.subr.bf16.mxu1 %v4745_v19  ;;  %v4824_v18 = vld [vmem:[%s5326_s6 + $0x5c0] ss:$16 sps:$4 sm:$0xff]   ;;  %v4827_v19 = vld [vmem:[%s5326_s6 + $0x5c8] ss:$16 sps:$4 sm:$0xff]  }
  0x99   : > { %2948 = vmatmul.mubr.bf16.vlgmr.msra.gmra.mrb[0].mxu0 %v738_v22  ;;  %3235 = vmatmul.mubr.bf16.vlgmr.msra.gmra.mrb[0].mxu1 %v738_v22  ;;  %v4830_v22 = vld [vmem:[%s5326_s6 + $0x5e0] ss:$16 sps:$4 sm:$0xff]  }
  0x9a   : > { %2957 = vmatpush1.bf16.msra.mxu0 %v4740_v21  ;;  %3244 = vmatpush1.bf16.msra.mxu1 %v4743_v23  ;;  %v4835_v21 = vld [vmem:[%s5326_s6 + $0x5ec] ss:$16 sps:$4 sm:$0xff]   ;;  %v4833_v23 = vld [vmem:[%s5326_s6 + $0x5e8] ss:$16 sps:$4 sm:$0xff]  }
  0x9b   : > { %2958 = vmatprep.subr.bf16.mxu0 %v4748_v24  ;;  %3245 = vmatprep.subr.bf16.mxu1 %v4751_v25  ;;  %v4839_v24 = vld [vmem:[%s5326_s6 + $0x604] ss:$16 sps:$4 sm:$0xff]   ;;  %v4842_v25 = vld [vmem:[%s5326_s6 + $0x60c] ss:$16 sps:$4 sm:$0xff]  }
  0x9c   : > { %2988 = vmatprep.mubr.bf16.mxu0 %v5489_v26  ;;  %3275 = vmatprep.mubr.bf16.mxu1 %v5489_v26 }
  0x9e   : > { %2959 = vmatpush1.bf16.msra.mxu0 %v4746_v27  ;;  %3246 = vmatpush1.bf16.msra.mxu1 %v4749_v14  ;;  %v4837_v27 = vld [vmem:[%s5326_s6 + $0x600] ss:$16 sps:$4 sm:$0xff]   ;;  %v5556_v14 = vrot.slane %v5474_v16, %v5376_v50 }
  0x9f   : > { %2960 = vmatprep.subr.bf16.mxu0 %v4754_v28  ;;  %3247 = vmatprep.subr.bf16.mxu1 %v4757_v29  ;;  %v4840_v28 = vld [vmem:[%s5326_s6 + $0x608] ss:$16 sps:$4 sm:$0xff]   ;;  %v4845_v29 = vld [vmem:[%s5326_s6 + $0x624] ss:$16 sps:$4 sm:$0xff]   ;;  %v4843_v16 = vld [vmem:[%s5326_s6 + $0x620] ss:$16 sps:$4 sm:$0xff]  }
  0xa2   : > { %2961 = vmatpush1.bf16.msra.mxu0 %v4752_v30  ;;  %3248 = vmatpush1.bf16.msra.mxu1 %v4755_v31  ;;  %v4848_v30 = vld [vmem:[%s5326_s6 + $0x62c] ss:$16 sps:$4 sm:$0xff]   ;;  %v741_v31 = vcombine.high %v5489_v26, %v5489_v26  ;;  %v4849_v26 = vld [vmem:[%s5326_s6 + $0x640] ss:$16 sps:$4 sm:$0xff]  }
  0xa3   : > { %2962 = vmatprep.subr.bf16.mxu0 %v4760_v32  ;;  %3249 = vmatprep.subr.bf16.mxu1 %v4763_v33  ;;  %v4846_v32 = vld [vmem:[%s5326_s6 + $0x628] ss:$16 sps:$4 sm:$0xff]   ;;  %v4851_v33 = vld [vmem:[%s5326_s6 + $0x644] ss:$16 sps:$4 sm:$0xff]  }
  0xa6   : > { %2963 = vmatpush1.bf16.msra.mxu0 %v4758_v34  ;;  %3250 = vmatpush1.bf16.msra.mxu1 %v4761_v35  ;;  %v4854_v34 = vld [vmem:[%s5326_s6 + $0x64c] ss:$16 sps:$4 sm:$0xff]   ;;  %v4852_v35 = vld [vmem:[%s5326_s6 + $0x648] ss:$16 sps:$4 sm:$0xff]  }
  0xa7   : > { %2964 = vmatprep.subr.bf16.mxu0 %v4766_v36  ;;  %3251 = vmatprep.subr.bf16.mxu1 %v4769_v37  ;;  %v4857_v36 = vld [vmem:[%s5326_s6 + $0x664] ss:$16 sps:$4 sm:$0xff]   ;;  %v4860_v37 = vld [vmem:[%s5326_s6 + $0x66c] ss:$16 sps:$4 sm:$0xff]  }
  0xaa   : > { %2965 = vmatpush1.bf16.msra.mxu0 %v4764_v38  ;;  %3252 = vmatpush1.bf16.msra.mxu1 %v4767_v39  ;;  %v4855_v38 = vld [vmem:[%s5326_s6 + $0x660] ss:$16 sps:$4 sm:$0xff]   ;;  %v4858_v39 = vld [vmem:[%s5326_s6 + $0x668] ss:$16 sps:$4 sm:$0xff]  }
  0xab   : > { %2966 = vmatprep.subr.bf16.mxu0 %v4772_v40  ;;  %3253 = vmatprep.subr.bf16.mxu1 %v4775_v41  ;;  %v4863_v40 = vld [vmem:[%s5326_s6 + $0x684] ss:$16 sps:$4 sm:$0xff]   ;;  %v4866_v41 = vld [vmem:[%s5326_s6 + $0x68c] ss:$16 sps:$4 sm:$0xff]  }
  0xae   : > { %2967 = vmatpush1.bf16.msra.mxu0 %v4770_v42  ;;  %3254 = vmatpush1.bf16.msra.mxu1 %v4773_v43  ;;  %v4861_v42 = vld [vmem:[%s5326_s6 + $0x680] ss:$16 sps:$4 sm:$0xff]   ;;  %v4864_v43 = vld [vmem:[%s5326_s6 + $0x688] ss:$16 sps:$4 sm:$0xff]  }
  0xaf   : > { %2968 = vmatprep.subr.bf16.mxu0 %v4778_v45  ;;  %3255 = vmatprep.subr.bf16.mxu1 %v4781_v46  ;;  %v4869_v45 = vld [vmem:[%s5326_s6 + $0x6a4] ss:$16 sps:$4 sm:$0xff]   ;;  %v4872_v46 = vld [vmem:[%s5326_s6 + $0x6ac] ss:$16 sps:$4 sm:$0xff]  }
  0xb2   : > { %2969 = vmatpush1.bf16.msra.mxu0 %v4776_v47  ;;  %3256 = vmatpush1.bf16.msra.mxu1 %v4779_v48  ;;  %v4867_v47 = vld [vmem:[%s5326_s6 + $0x6a0] ss:$16 sps:$4 sm:$0xff]   ;;  %v4870_v48 = vld [vmem:[%s5326_s6 + $0x6a8] ss:$16 sps:$4 sm:$0xff]  }
  0xb3   : > { %2970 = vmatprep.subr.bf16.mxu0 %v4784_v49  ;;  %3257 = vmatprep.subr.bf16.mxu1 %v4787_v51  ;;  %v4875_v49 = vld [vmem:[%s5326_s6 + $0x6c4] ss:$16 sps:$4 sm:$0xff]   ;;  %v4878_v51 = vld [vmem:[%s5326_s6 + $0x6cc] ss:$16 sps:$4 sm:$0xff]  }
  0xb6   : > { %2971 = vmatpush1.bf16.msra.mxu0 %v4782_v52  ;;  %3258 = vmatpush1.bf16.msra.mxu1 %v4785_v54  ;;  %v4873_v52 = vld [vmem:[%s5326_s6 + $0x6c0] ss:$16 sps:$4 sm:$0xff]   ;;  %v4876_v54 = vld [vmem:[%s5326_s6 + $0x6c8] ss:$16 sps:$4 sm:$0xff]  }
  0xb7   : > { %2972 = vmatprep.subr.bf16.mxu0 %v4790_v55  ;;  %3259 = vmatprep.subr.bf16.mxu1 %v4793_v56  ;;  %v4881_v55 = vld [vmem:[%s5326_s6 + $0x6e4] ss:$16 sps:$4 sm:$0xff]   ;;  %v4884_v56 = vld [vmem:[%s5326_s6 + $0x6ec] ss:$16 sps:$4 sm:$0xff]  }
  0xba   : > { %2973 = vmatpush1.bf16.msra.mxu0 %v4788_v57  ;;  %3260 = vmatpush1.bf16.msra.mxu1 %v4791_v58  ;;  %v4879_v57 = vld [vmem:[%s5326_s6 + $0x6e0] ss:$16 sps:$4 sm:$0xff]   ;;  %v4882_v58 = vld [vmem:[%s5326_s6 + $0x6e8] ss:$16 sps:$4 sm:$0xff]  }
  0xbb   : > { %2974 = vmatprep.subr.bf16.mxu0 %v4796_v59  ;;  %3261 = vmatprep.subr.bf16.mxu1 %v4799_v60  ;;  %v4887_v59 = vld [vmem:[%s5326_s6 + $0x704] ss:$16 sps:$4 sm:$0xff]   ;;  %v4890_v60 = vld [vmem:[%s5326_s6 + $0x70c] ss:$16 sps:$4 sm:$0xff]  }
  0xbe   : > { %2975 = vmatpush1.bf16.msra.mxu0 %v4794_v61  ;;  %3262 = vmatpush1.bf16.msra.mxu1 %v4797_v62  ;;  %v4885_v61 = vld [vmem:[%s5326_s6 + $0x700] ss:$16 sps:$4 sm:$0xff]   ;;  %v4888_v62 = vld [vmem:[%s5326_s6 + $0x708] ss:$16 sps:$4 sm:$0xff]  }
  0xbf   : > { %2976 = vmatprep.subr.bf16.mxu0 %v4802_v63  ;;  %3263 = vmatprep.subr.bf16.mxu1 %v4805_v0  ;;  %v4893_v63 = vld [vmem:[%s5326_s6 + $0x724] ss:$16 sps:$4 sm:$0xff]   ;;  %v4896_v0 = vld [vmem:[%s5326_s6 + $0x72c] ss:$16 sps:$4 sm:$0xff]  }
  0xc2   : > { %2977 = vmatpush1.bf16.msra.mxu0 %v4800_v1  ;;  %3264 = vmatpush1.bf16.msra.mxu1 %v4803_v2  ;;  %v4891_v1 = vld [vmem:[%s5326_s6 + $0x720] ss:$16 sps:$4 sm:$0xff]   ;;  %v4894_v2 = vld [vmem:[%s5326_s6 + $0x728] ss:$16 sps:$4 sm:$0xff]  }
  0xc3   : > { %2978 = vmatprep.subr.bf16.mxu0 %v4808_v3  ;;  %3265 = vmatprep.subr.bf16.mxu1 %v4811_v4  ;;  %v4899_v3 = vld [vmem:[%s5326_s6 + $0x744] ss:$16 sps:$4 sm:$0xff]   ;;  %v4902_v4 = vld [vmem:[%s5326_s6 + $0x74c] ss:$16 sps:$4 sm:$0xff]  }
  0xc6   : > { %2979 = vmatpush1.bf16.msra.mxu0 %v4806_v5  ;;  %3266 = vmatpush1.bf16.msra.mxu1 %v4809_v6  ;;  %v4897_v5 = vld [vmem:[%s5326_s6 + $0x740] ss:$16 sps:$4 sm:$0xff]   ;;  %v4900_v6 = vld [vmem:[%s5326_s6 + $0x748] ss:$16 sps:$4 sm:$0xff]  }
  0xc7   : > { %2980 = vmatprep.subr.bf16.mxu0 %v4814_v7  ;;  %3267 = vmatprep.subr.bf16.mxu1 %v4817_v8  ;;  %v4905_v7 = vld [vmem:[%s5326_s6 + $0x764] ss:$16 sps:$4 sm:$0xff]   ;;  %v4908_v8 = vld [vmem:[%s5326_s6 + $0x76c] ss:$16 sps:$4 sm:$0xff]  }
  0xca   : > { %2981 = vmatpush1.bf16.msra.mxu0 %v4812_v9  ;;  %3268 = vmatpush1.bf16.msra.mxu1 %v4815_v10  ;;  %v4903_v9 = vld [vmem:[%s5326_s6 + $0x760] ss:$16 sps:$4 sm:$0xff]   ;;  %v4906_v10 = vld [vmem:[%s5326_s6 + $0x768] ss:$16 sps:$4 sm:$0xff]  }
  0xcb   : > { %2982 = vmatprep.subr.bf16.mxu0 %v4820_v11  ;;  %3269 = vmatprep.subr.bf16.mxu1 %v4823_v12  ;;  %v4911_v11 = vld [vmem:[%s5326_s6 + $0x784] ss:$16 sps:$4 sm:$0xff]   ;;  %v4914_v12 = vld [vmem:[%s5326_s6 + $0x78c] ss:$16 sps:$4 sm:$0xff]  }
  0xce   : > { %2983 = vmatpush1.bf16.msra.mxu0 %v4818_v13  ;;  %3270 = vmatpush1.bf16.msra.mxu1 %v4821_v15  ;;  %v4909_v13 = vld [vmem:[%s5326_s6 + $0x780] ss:$16 sps:$4 sm:$0xff]   ;;  %v4912_v15 = vld [vmem:[%s5326_s6 + $0x788] ss:$16 sps:$4 sm:$0xff]  }
  0xcf   : > { %2984 = vmatprep.subr.bf16.mxu0 %v4826_v17  ;;  %3271 = vmatprep.subr.bf16.mxu1 %v4829_v53  ;;  %v4917_v17 = vld [vmem:[%s5326_s6 + $0x7a4] ss:$16 sps:$4 sm:$0xff]   ;;  %v4920_v53 = vld [vmem:[%s5326_s6 + $0x7ac] ss:$16 sps:$4 sm:$0xff]  }
  0xd2   : > { %2985 = vmatpush1.bf16.msra.mxu0 %v4824_v18  ;;  %3272 = vmatpush1.bf16.msra.mxu1 %v4827_v19  ;;  %v4915_v18 = vld [vmem:[%s5326_s6 + $0x7a0] ss:$16 sps:$4 sm:$0xff]   ;;  %v4918_v19 = vld [vmem:[%s5326_s6 + $0x7a8] ss:$16 sps:$4 sm:$0xff]  }
  0xd3   : > { %2986 = vmatprep.subr.bf16.mxu0 %v4832_v20  ;;  %3273 = vmatprep.subr.bf16.mxu1 %v4835_v21  ;;  %v4923_v20 = vld [vmem:[%s5326_s6 + $0x7c4] ss:$16 sps:$4 sm:$0xff]   ;;  %v4926_v21 = vld [vmem:[%s5326_s6 + $0x7cc] ss:$16 sps:$4 sm:$0xff]  }
  0xd6   : > { %2987 = vmatpush1.bf16.msra.mxu0 %v4830_v22  ;;  %3274 = vmatpush1.bf16.msra.mxu1 %v4833_v23  ;;  %v5618_v22 = vld [vmem:[%s5321_s27 + $0x8] sm:$0x1f]  ;;  %v4921_v23 = vld [vmem:[%s5326_s6 + $0x7c0] ss:$16 sps:$4 sm:$0xff]  }
  0xd7   : > { %2997 = vmatprep.subr.bf16.mxu0 %v4839_v24  ;;  %3284 = vmatprep.subr.bf16.mxu1 %v4842_v25  ;;  %v4924_v24 = vld [vmem:[%s5326_s6 + $0x7c8] ss:$16 sps:$4 sm:$0xff]   ;;  %v4929_v25 = vld [vmem:[%s5326_s6 + $0x7e4] ss:$16 sps:$4 sm:$0xff]  }
  0xd9   : > { %2989 = vmatmul.mubr.bf16.vlgmr.msra.gmra.mrb[0].mxu0 %v5556_v14  ;;  %3276 = vmatmul.mubr.bf16.vlgmr.msra.gmra.mrb[0].mxu1 %v5556_v14 }
  0xda   : > { %2998 = vmatpush1.bf16.msra.mxu0 %v4837_v27  ;;  %3285 = vmatpush1.bf16.msra.mxu1 %v4840_v28  ;;  %v4932_v27 = vld [vmem:[%s5326_s6 + $0x7ec] ss:$16 sps:$4 sm:$0xff]   ;;  %v5626_v28 = vrot.slane %v5618_v22, %v5376_v50 }
  0xdb   : > { %2999 = vmatprep.subr.bf16.mxu0 %v4845_v29  ;;  %3286 = vmatprep.subr.bf16.mxu1 %v4848_v30  ;;  %v4927_v29 = vld [vmem:[%s5326_s6 + $0x7e0] ss:$16 sps:$4 sm:$0xff]   ;;  %v4930_v30 = vld [vmem:[%s5326_s6 + $0x7e8] ss:$16 sps:$4 sm:$0xff]  }
  0xdc   : > { %3029 = vmatprep.mubr.bf16.mxu0 %v741_v31  ;;  %3316 = vmatprep.mubr.bf16.mxu1 %v741_v31  ;;  %v4935_v31 = vld [vmem:[%s5326_s6 + $0x804] ss:$16 sps:$4 sm:$0xff]  }
  0xde   : > { %3000 = vmatpush1.bf16.msra.mxu0 %v4843_v16  ;;  %3287 = vmatpush1.bf16.msra.mxu1 %v4846_v32  ;;  %v4938_v16 = vld [vmem:[%s5326_s6 + $0x80c] ss:$16 sps:$4 sm:$0xff]   ;;  %v757_v32 = vcombine.high %v5626_v28, %v5626_v28 }
  0xdf   : > { %3001 = vmatprep.subr.bf16.mxu0 %v4851_v33  ;;  %3288 = vmatprep.subr.bf16.mxu1 %v4854_v34  ;;  %v739_v33 = vcombine.high %v5556_v14, %v5556_v14  ;;  %v4933_v34 = vld [vmem:[%s5326_s6 + $0x800] ss:$16 sps:$4 sm:$0xff]  }
  0xe0   : > { %v4939_v14 = vld [vmem:[%s5326_s6 + $0x820] ss:$16 sps:$4 sm:$0xff]  }
  0xe2   : > { %3002 = vmatpush1.bf16.msra.mxu0 %v4849_v26  ;;  %3289 = vmatpush1.bf16.msra.mxu1 %v4852_v35  ;;  %v4936_v26 = vld [vmem:[%s5326_s6 + $0x808] ss:$16 sps:$4 sm:$0xff]   ;;  %v4941_v35 = vld [vmem:[%s5326_s6 + $0x824] ss:$16 sps:$4 sm:$0xff]  }
  0xe3   : > { %3003 = vmatprep.subr.bf16.mxu0 %v4857_v36  ;;  %3290 = vmatprep.subr.bf16.mxu1 %v4860_v37  ;;  %v4944_v36 = vld [vmem:[%s5326_s6 + $0x82c] ss:$16 sps:$4 sm:$0xff]   ;;  %v5641_v37 = vrot.slane %v757_v32, %v5376_v50  ;;  %v5020_v32 = vld [vmem:[%s5326_s6 + $0x9c8] ss:$16 sps:$4 sm:$0xff]  }
  0xe6   : > { %3004 = vmatpush1.bf16.msra.mxu0 %v4855_v38  ;;  %3291 = vmatpush1.bf16.msra.mxu1 %v4858_v39  ;;  %v4942_v38 = vld [vmem:[%s5326_s6 + $0x828] ss:$16 sps:$4 sm:$0xff]   ;;  %v4947_v39 = vld [vmem:[%s5326_s6 + $0x844] ss:$16 sps:$4 sm:$0xff]  }
  0xe7   : > { %3005 = vmatprep.subr.bf16.mxu0 %v4863_v40  ;;  %3292 = vmatprep.subr.bf16.mxu1 %v4866_v41  ;;  %v4950_v40 = vld [vmem:[%s5326_s6 + $0x84c] ss:$16 sps:$4 sm:$0xff]   ;;  %v4945_v41 = vld [vmem:[%s5326_s6 + $0x840] ss:$16 sps:$4 sm:$0xff]  }
  0xea   : > { %3006 = vmatpush1.bf16.msra.mxu0 %v4861_v42  ;;  %3293 = vmatpush1.bf16.msra.mxu1 %v4864_v43  ;;  %v4948_v42 = vld [vmem:[%s5326_s6 + $0x848] ss:$16 sps:$4 sm:$0xff]   ;;  %v4953_v43 = vld [vmem:[%s5326_s6 + $0x864] ss:$16 sps:$4 sm:$0xff]  }
  0xeb   : > { %3007 = vmatprep.subr.bf16.mxu0 %v4869_v45  ;;  %3294 = vmatprep.subr.bf16.mxu1 %v4872_v46  ;;  %v4956_v45 = vld [vmem:[%s5326_s6 + $0x86c] ss:$16 sps:$4 sm:$0xff]   ;;  %v4951_v46 = vld [vmem:[%s5326_s6 + $0x860] ss:$16 sps:$4 sm:$0xff]  }
  0xee   : > { %3008 = vmatpush1.bf16.msra.mxu0 %v4867_v47  ;;  %3295 = vmatpush1.bf16.msra.mxu1 %v4870_v48  ;;  %v4954_v47 = vld [vmem:[%s5326_s6 + $0x868] ss:$16 sps:$4 sm:$0xff]   ;;  %v4959_v48 = vld [vmem:[%s5326_s6 + $0x884] ss:$16 sps:$4 sm:$0xff]  }
  0xef   : > { %3009 = vmatprep.subr.bf16.mxu0 %v4875_v49  ;;  %3296 = vmatprep.subr.bf16.mxu1 %v4878_v51  ;;  %v4962_v49 = vld [vmem:[%s5326_s6 + $0x88c] ss:$16 sps:$4 sm:$0xff]   ;;  %v4957_v51 = vld [vmem:[%s5326_s6 + $0x880] ss:$16 sps:$4 sm:$0xff]  }
  0xf2   : > { %3010 = vmatpush1.bf16.msra.mxu0 %v4873_v52  ;;  %3297 = vmatpush1.bf16.msra.mxu1 %v4876_v54  ;;  %v4960_v52 = vld [vmem:[%s5326_s6 + $0x888] ss:$16 sps:$4 sm:$0xff]   ;;  %v4965_v54 = vld [vmem:[%s5326_s6 + $0x8a4] ss:$16 sps:$4 sm:$0xff]  }
  0xf3   : > { %3011 = vmatprep.subr.bf16.mxu0 %v4881_v55  ;;  %3298 = vmatprep.subr.bf16.mxu1 %v4884_v56  ;;  %v4968_v55 = vld [vmem:[%s5326_s6 + $0x8ac] ss:$16 sps:$4 sm:$0xff]   ;;  %v4963_v56 = vld [vmem:[%s5326_s6 + $0x8a0] ss:$16 sps:$4 sm:$0xff]  }
  0xf6   : > { %3012 = vmatpush1.bf16.msra.mxu0 %v4879_v57  ;;  %3299 = vmatpush1.bf16.msra.mxu1 %v4882_v58  ;;  %v4966_v57 = vld [vmem:[%s5326_s6 + $0x8a8] ss:$16 sps:$4 sm:$0xff]   ;;  %v4971_v58 = vld [vmem:[%s5326_s6 + $0x8c4] ss:$16 sps:$4 sm:$0xff]  }
  0xf7   : > { %3013 = vmatprep.subr.bf16.mxu0 %v4887_v59  ;;  %3300 = vmatprep.subr.bf16.mxu1 %v4890_v60  ;;  %v4974_v59 = vld [vmem:[%s5326_s6 + $0x8cc] ss:$16 sps:$4 sm:$0xff]   ;;  %v4969_v60 = vld [vmem:[%s5326_s6 + $0x8c0] ss:$16 sps:$4 sm:$0xff]  }
  0xfa   : > { %3014 = vmatpush1.bf16.msra.mxu0 %v4885_v61  ;;  %3301 = vmatpush1.bf16.msra.mxu1 %v4888_v62  ;;  %v4972_v61 = vld [vmem:[%s5326_s6 + $0x8c8] ss:$16 sps:$4 sm:$0xff]   ;;  %v4977_v62 = vld [vmem:[%s5326_s6 + $0x8e4] ss:$16 sps:$4 sm:$0xff]  }
  0xfb   : > { %3015 = vmatprep.subr.bf16.mxu0 %v4893_v63  ;;  %3302 = vmatprep.subr.bf16.mxu1 %v4896_v0  ;;  %v4980_v63 = vld [vmem:[%s5326_s6 + $0x8ec] ss:$16 sps:$4 sm:$0xff]   ;;  %v4975_v0 = vld [vmem:[%s5326_s6 + $0x8e0] ss:$16 sps:$4 sm:$0xff]  }
  0xfe   : > { %3016 = vmatpush1.bf16.msra.mxu0 %v4891_v1  ;;  %3303 = vmatpush1.bf16.msra.mxu1 %v4894_v2  ;;  %v4978_v1 = vld [vmem:[%s5326_s6 + $0x8e8] ss:$16 sps:$4 sm:$0xff]   ;;  %v4983_v2 = vld [vmem:[%s5326_s6 + $0x904] ss:$16 sps:$4 sm:$0xff]  }
  0xff   : > { %3017 = vmatprep.subr.bf16.mxu0 %v4899_v3  ;;  %3304 = vmatprep.subr.bf16.mxu1 %v4902_v4  ;;  %v4986_v3 = vld [vmem:[%s5326_s6 + $0x90c] ss:$16 sps:$4 sm:$0xff]   ;;  %v4981_v4 = vld [vmem:[%s5326_s6 + $0x900] ss:$16 sps:$4 sm:$0xff]  }
 0x102   : > { %3018 = vmatpush1.bf16.msra.mxu0 %v4897_v5  ;;  %3305 = vmatpush1.bf16.msra.mxu1 %v4900_v6  ;;  %v4984_v5 = vld [vmem:[%s5326_s6 + $0x908] ss:$16 sps:$4 sm:$0xff]   ;;  %v4989_v6 = vld [vmem:[%s5326_s6 + $0x924] ss:$16 sps:$4 sm:$0xff]  }
 0x103   : > { %3019 = vmatprep.subr.bf16.mxu0 %v4905_v7  ;;  %3306 = vmatprep.subr.bf16.mxu1 %v4908_v8  ;;  %v4992_v7 = vld [vmem:[%s5326_s6 + $0x92c] ss:$16 sps:$4 sm:$0xff]   ;;  %v4987_v8 = vld [vmem:[%s5326_s6 + $0x920] ss:$16 sps:$4 sm:$0xff]  }
 0x106   : > { %3020 = vmatpush1.bf16.msra.mxu0 %v4903_v9  ;;  %3307 = vmatpush1.bf16.msra.mxu1 %v4906_v10  ;;  %v4990_v9 = vld [vmem:[%s5326_s6 + $0x928] ss:$16 sps:$4 sm:$0xff]   ;;  %v4995_v10 = vld [vmem:[%s5326_s6 + $0x944] ss:$16 sps:$4 sm:$0xff]  }
 0x107   : > { %3021 = vmatprep.subr.bf16.mxu0 %v4911_v11  ;;  %3308 = vmatprep.subr.bf16.mxu1 %v4914_v12  ;;  %v4998_v11 = vld [vmem:[%s5326_s6 + $0x94c] ss:$16 sps:$4 sm:$0xff]   ;;  %v4993_v12 = vld [vmem:[%s5326_s6 + $0x940] ss:$16 sps:$4 sm:$0xff]  }
 0x10a   : > { %3022 = vmatpush1.bf16.msra.mxu0 %v4909_v13  ;;  %3309 = vmatpush1.bf16.msra.mxu1 %v4912_v15  ;;  %v4996_v13 = vld [vmem:[%s5326_s6 + $0x948] ss:$16 sps:$4 sm:$0xff]   ;;  %v5001_v15 = vld [vmem:[%s5326_s6 + $0x964] ss:$16 sps:$4 sm:$0xff]  }
 0x10b   : > { %3023 = vmatprep.subr.bf16.mxu0 %v4917_v17  ;;  %3310 = vmatprep.subr.bf16.mxu1 %v4920_v53  ;;  %v5004_v17 = vld [vmem:[%s5326_s6 + $0x96c] ss:$16 sps:$4 sm:$0xff]   ;;  %v4999_v53 = vld [vmem:[%s5326_s6 + $0x960] ss:$16 sps:$4 sm:$0xff]  }
 0x10e   : > { %3024 = vmatpush1.bf16.msra.mxu0 %v4915_v18  ;;  %3311 = vmatpush1.bf16.msra.mxu1 %v4918_v19  ;;  %v5002_v18 = vld [vmem:[%s5326_s6 + $0x968] ss:$16 sps:$4 sm:$0xff]   ;;  %v5007_v19 = vld [vmem:[%s5326_s6 + $0x984] ss:$16 sps:$4 sm:$0xff]  }
 0x10f   : > { %3025 = vmatprep.subr.bf16.mxu0 %v4923_v20  ;;  %3312 = vmatprep.subr.bf16.mxu1 %v4926_v21  ;;  %v5010_v20 = vld [vmem:[%s5326_s6 + $0x98c] ss:$16 sps:$4 sm:$0xff]   ;;  %v5005_v21 = vld [vmem:[%s5326_s6 + $0x980] ss:$16 sps:$4 sm:$0xff]  }
 0x112   : > { %3026 = vmatpush1.bf16.msra.mxu0 %v4921_v23  ;;  %3313 = vmatpush1.bf16.msra.mxu1 %v4924_v24  ;;  %v5008_v23 = vld [vmem:[%s5326_s6 + $0x988] ss:$16 sps:$4 sm:$0xff]   ;;  %v5013_v24 = vld [vmem:[%s5326_s6 + $0x9a4] ss:$16 sps:$4 sm:$0xff]  }
 0x113   : > { %3027 = vmatprep.subr.bf16.mxu0 %v4929_v25  ;;  %3314 = vmatprep.subr.bf16.mxu1 %v4932_v27  ;;  %v5016_v25 = vld [vmem:[%s5326_s6 + $0x9ac] ss:$16 sps:$4 sm:$0xff]   ;;  %v5011_v27 = vld [vmem:[%s5326_s6 + $0x9a0] ss:$16 sps:$4 sm:$0xff]  }
 0x116   : > { %3028 = vmatpush1.bf16.msra.mxu0 %v4927_v29  ;;  %3315 = vmatpush1.bf16.msra.mxu1 %v4930_v30  ;;  %v5014_v29 = vld [vmem:[%s5326_s6 + $0x9a8] ss:$16 sps:$4 sm:$0xff]   ;;  %v5019_v30 = vld [vmem:[%s5326_s6 + $0x9c4] ss:$16 sps:$4 sm:$0xff]  }
 0x117   : > { %3038 = vmatprep.subr.bf16.mxu0 %v4935_v31  ;;  %3325 = vmatprep.subr.bf16.mxu1 %v4938_v16  ;;  %v5022_v31 = vld [vmem:[%s5326_s6 + $0x9cc] ss:$16 sps:$4 sm:$0xff]   ;;  %v5017_v16 = vld [vmem:[%s5326_s6 + $0x9c0] ss:$16 sps:$4 sm:$0xff]  }
 0x119   : > { %3030 = vmatmul.mubr.bf16.vlgmr.msra.gmra.mrb[0].mxu0 %v739_v33  ;;  %3317 = vmatmul.mubr.bf16.vlgmr.msra.gmra.mrb[0].mxu1 %v739_v33  ;;  %v5025_v33 = vld [vmem:[%s5326_s6 + $0x9e4] ss:$16 sps:$4 sm:$0xff]  }
 0x11a   : > { %3039 = vmatpush1.bf16.msra.mxu0 %v4933_v34  ;;  %3326 = vmatpush1.bf16.msra.mxu1 %v4936_v26  ;;  %v5028_v34 = vld [vmem:[%s5326_s6 + $0x9ec] ss:$16 sps:$4 sm:$0xff]   ;;  %v5023_v26 = vld [vmem:[%s5326_s6 + $0x9e0] ss:$16 sps:$4 sm:$0xff]  }
 0x11b   : > { %3040 = vmatprep.subr.bf16.mxu0 %v4941_v35  ;;  %3327 = vmatprep.subr.bf16.mxu1 %v4944_v36  ;;  %v5026_v35 = vld [vmem:[%s5326_s6 + $0x9e8] ss:$16 sps:$4 sm:$0xff]   ;;  %v5032_v36 = vld [vmem:[%s5326_s6 + $0xa04] ss:$16 sps:$4 sm:$0xff]  }
 0x11c   : > { %3070 = vmatprep.mubr.bf16.mxu0 %v5641_v37  ;;  %3357 = vmatprep.mubr.bf16.mxu1 %v5641_v37 }
 0x11e   : > { %3041 = vmatpush1.bf16.msra.mxu0 %v4939_v14  ;;  %3328 = vmatpush1.bf16.msra.mxu1 %v4942_v38  ;;  %v5035_v14 = vld [vmem:[%s5326_s6 + $0xa0c] ss:$16 sps:$4 sm:$0xff]   ;;  %v5707_v38 = vrot.slane %v5626_v28, %v5376_v50  ;;  %v5036_v28 = vld [vmem:[%s5326_s6 + $0xa20] ss:$16 sps:$4 sm:$0xff]  }
 0x11f   : > { %3042 = vmatprep.subr.bf16.mxu0 %v4947_v39  ;;  %3329 = vmatprep.subr.bf16.mxu1 %v4950_v40  ;;  %v5030_v39 = vld [vmem:[%s5326_s6 + $0xa00] ss:$16 sps:$4 sm:$0xff]   ;;  %v5033_v40 = vld [vmem:[%s5326_s6 + $0xa08] ss:$16 sps:$4 sm:$0xff]  }
 0x122   : > { %3043 = vmatpush1.bf16.msra.mxu0 %v4945_v41  ;;  %3330 = vmatpush1.bf16.msra.mxu1 %v4948_v42  ;;  %v5038_v41 = vld [vmem:[%s5326_s6 + $0xa24] ss:$16 sps:$4 sm:$0xff]   ;;  %v5041_v42 = vld [vmem:[%s5326_s6 + $0xa2c] ss:$16 sps:$4 sm:$0xff]  }
 0x123   : > { %3044 = vmatprep.subr.bf16.mxu0 %v4953_v43  ;;  %3331 = vmatprep.subr.bf16.mxu1 %v4956_v45  ;;  %v780_v43 = vcombine.high %v5641_v37, %v5641_v37  ;;  %v5039_v45 = vld [vmem:[%s5326_s6 + $0xa28] ss:$16 sps:$4 sm:$0xff]   ;;  %v5042_v37 = vld [vmem:[%s5326_s6 + $0xa40] ss:$16 sps:$4 sm:$0xff]  }
 0x126   : > { %3045 = vmatpush1.bf16.msra.mxu0 %v4951_v46  ;;  %3332 = vmatpush1.bf16.msra.mxu1 %v4954_v47  ;;  %v5044_v46 = vld [vmem:[%s5326_s6 + $0xa44] ss:$16 sps:$4 sm:$0xff]   ;;  %v5047_v47 = vld [vmem:[%s5326_s6 + $0xa4c] ss:$16 sps:$4 sm:$0xff]  }
 0x127   : > { %3046 = vmatprep.subr.bf16.mxu0 %v4959_v48  ;;  %3333 = vmatprep.subr.bf16.mxu1 %v4962_v49  ;;  %v5045_v48 = vld [vmem:[%s5326_s6 + $0xa48] ss:$16 sps:$4 sm:$0xff]   ;;  %v5050_v49 = vld [vmem:[%s5326_s6 + $0xa64] ss:$16 sps:$4 sm:$0xff]  }
 0x12a   : > { %3047 = vmatpush1.bf16.msra.mxu0 %v4957_v51  ;;  %3334 = vmatpush1.bf16.msra.mxu1 %v4960_v52  ;;  %v5053_v51 = vld [vmem:[%s5326_s6 + $0xa6c] ss:$16 sps:$4 sm:$0xff]   ;;  %v5048_v52 = vld [vmem:[%s5326_s6 + $0xa60] ss:$16 sps:$4 sm:$0xff]  }
 0x12b   : > { %3048 = vmatprep.subr.bf16.mxu0 %v4965_v54  ;;  %3335 = vmatprep.subr.bf16.mxu1 %v4968_v55  ;;  %v5051_v54 = vld [vmem:[%s5326_s6 + $0xa68] ss:$16 sps:$4 sm:$0xff]   ;;  %v5056_v55 = vld [vmem:[%s5326_s6 + $0xa84] ss:$16 sps:$4 sm:$0xff]  }
 0x12e   : > { %3049 = vmatpush1.bf16.msra.mxu0 %v4963_v56  ;;  %3336 = vmatpush1.bf16.msra.mxu1 %v4966_v57  ;;  %v5059_v56 = vld [vmem:[%s5326_s6 + $0xa8c] ss:$16 sps:$4 sm:$0xff]   ;;  %v5054_v57 = vld [vmem:[%s5326_s6 + $0xa80] ss:$16 sps:$4 sm:$0xff]  }
 0x12f   : > { %3050 = vmatprep.subr.bf16.mxu0 %v4971_v58  ;;  %3337 = vmatprep.subr.bf16.mxu1 %v4974_v59  ;;  %v5057_v58 = vld [vmem:[%s5326_s6 + $0xa88] ss:$16 sps:$4 sm:$0xff]   ;;  %v5062_v59 = vld [vmem:[%s5326_s6 + $0xaa4] ss:$16 sps:$4 sm:$0xff]  }
 0x132   : > { %3051 = vmatpush1.bf16.msra.mxu0 %v4969_v60  ;;  %3338 = vmatpush1.bf16.msra.mxu1 %v4972_v61  ;;  %v5065_v60 = vld [vmem:[%s5326_s6 + $0xaac] ss:$16 sps:$4 sm:$0xff]   ;;  %v5060_v61 = vld [vmem:[%s5326_s6 + $0xaa0] ss:$16 sps:$4 sm:$0xff]  }
 0x133   : > { %3052 = vmatprep.subr.bf16.mxu0 %v4977_v62  ;;  %3339 = vmatprep.subr.bf16.mxu1 %v4980_v63  ;;  %v5063_v62 = vld [vmem:[%s5326_s6 + $0xaa8] ss:$16 sps:$4 sm:$0xff]   ;;  %v5068_v63 = vld [vmem:[%s5326_s6 + $0xac4] ss:$16 sps:$4 sm:$0xff]  }
 0x136   : > { %3053 = vmatpush1.bf16.msra.mxu0 %v4975_v0  ;;  %3340 = vmatpush1.bf16.msra.mxu1 %v4978_v1  ;;  %v5071_v0 = vld [vmem:[%s5326_s6 + $0xacc] ss:$16 sps:$4 sm:$0xff]   ;;  %v5066_v1 = vld [vmem:[%s5326_s6 + $0xac0] ss:$16 sps:$4 sm:$0xff]  }
 0x137   : > { %3054 = vmatprep.subr.bf16.mxu0 %v4983_v2  ;;  %3341 = vmatprep.subr.bf16.mxu1 %v4986_v3  ;;  %v5069_v2 = vld [vmem:[%s5326_s6 + $0xac8] ss:$16 sps:$4 sm:$0xff]   ;;  %v5074_v3 = vld [vmem:[%s5326_s6 + $0xae4] ss:$16 sps:$4 sm:$0xff]  }
 0x13a   : > { %3055 = vmatpush1.bf16.msra.mxu0 %v4981_v4  ;;  %3342 = vmatpush1.bf16.msra.mxu1 %v4984_v5  ;;  %v5077_v4 = vld [vmem:[%s5326_s6 + $0xaec] ss:$16 sps:$4 sm:$0xff]   ;;  %v5072_v5 = vld [vmem:[%s5326_s6 + $0xae0] ss:$16 sps:$4 sm:$0xff]  }
 0x13b   : > { %3056 = vmatprep.subr.bf16.mxu0 %v4989_v6  ;;  %3343 = vmatprep.subr.bf16.mxu1 %v4992_v7  ;;  %v5075_v6 = vld [vmem:[%s5326_s6 + $0xae8] ss:$16 sps:$4 sm:$0xff]   ;;  %v5080_v7 = vld [vmem:[%s5326_s6 + $0xb04] ss:$16 sps:$4 sm:$0xff]  }
 0x13e   : > { %3057 = vmatpush1.bf16.msra.mxu0 %v4987_v8  ;;  %3344 = vmatpush1.bf16.msra.mxu1 %v4990_v9  ;;  %v5083_v8 = vld [vmem:[%s5326_s6 + $0xb0c] ss:$16 sps:$4 sm:$0xff]   ;;  %v5078_v9 = vld [vmem:[%s5326_s6 + $0xb00] ss:$16 sps:$4 sm:$0xff]  }
 0x13f   : > { %3058 = vmatprep.subr.bf16.mxu0 %v4995_v10  ;;  %3345 = vmatprep.subr.bf16.mxu1 %v4998_v11  ;;  %v5081_v10 = vld [vmem:[%s5326_s6 + $0xb08] ss:$16 sps:$4 sm:$0xff]   ;;  %v5086_v11 = vld [vmem:[%s5326_s6 + $0xb24] ss:$16 sps:$4 sm:$0xff]  }
 0x142   : > { %3059 = vmatpush1.bf16.msra.mxu0 %v4993_v12  ;;  %3346 = vmatpush1.bf16.msra.mxu1 %v4996_v13  ;;  %v5089_v12 = vld [vmem:[%s5326_s6 + $0xb2c] ss:$16 sps:$4 sm:$0xff]   ;;  %v5084_v13 = vld [vmem:[%s5326_s6 + $0xb20] ss:$16 sps:$4 sm:$0xff]  }
 0x143   : > { %3060 = vmatprep.subr.bf16.mxu0 %v5001_v15  ;;  %3347 = vmatprep.subr.bf16.mxu1 %v5004_v17  ;;  %v5087_v15 = vld [vmem:[%s5326_s6 + $0xb28] ss:$16 sps:$4 sm:$0xff]   ;;  %v5092_v17 = vld [vmem:[%s5326_s6 + $0xb44] ss:$16 sps:$4 sm:$0xff]  }
 0x146   : > { %3061 = vmatpush1.bf16.msra.mxu0 %v4999_v53  ;;  %3348 = vmatpush1.bf16.msra.mxu1 %v5002_v18  ;;  %v5095_v53 = vld [vmem:[%s5326_s6 + $0xb4c] ss:$16 sps:$4 sm:$0xff]   ;;  %v5090_v18 = vld [vmem:[%s5326_s6 + $0xb40] ss:$16 sps:$4 sm:$0xff]  }
 0x147   : > { %3062 = vmatprep.subr.bf16.mxu0 %v5007_v19  ;;  %3349 = vmatprep.subr.bf16.mxu1 %v5010_v20  ;;  %v5093_v19 = vld [vmem:[%s5326_s6 + $0xb48] ss:$16 sps:$4 sm:$0xff]   ;;  %v5098_v20 = vld [vmem:[%s5326_s6 + $0xb64] ss:$16 sps:$4 sm:$0xff]  }
 0x14a   : > { %3063 = vmatpush1.bf16.msra.mxu0 %v5005_v21  ;;  %3350 = vmatpush1.bf16.msra.mxu1 %v5008_v23  ;;  %v5101_v21 = vld [vmem:[%s5326_s6 + $0xb6c] ss:$16 sps:$4 sm:$0xff]   ;;  %v5096_v23 = vld [vmem:[%s5326_s6 + $0xb60] ss:$16 sps:$4 sm:$0xff]  }
 0x14b   : > { %3064 = vmatprep.subr.bf16.mxu0 %v5013_v24  ;;  %3351 = vmatprep.subr.bf16.mxu1 %v5016_v25  ;;  %v5099_v24 = vld [vmem:[%s5326_s6 + $0xb68] ss:$16 sps:$4 sm:$0xff]   ;;  %v5104_v25 = vld [vmem:[%s5326_s6 + $0xb84] ss:$16 sps:$4 sm:$0xff]  }
 0x14e   : > { %3065 = vmatpush1.bf16.msra.mxu0 %v5011_v27  ;;  %3352 = vmatpush1.bf16.msra.mxu1 %v5014_v29  ;;  %v5107_v27 = vld [vmem:[%s5326_s6 + $0xb8c] ss:$16 sps:$4 sm:$0xff]   ;;  %v5102_v29 = vld [vmem:[%s5326_s6 + $0xb80] ss:$16 sps:$4 sm:$0xff]  }
 0x14f   : > { %3066 = vmatprep.subr.bf16.mxu0 %v5019_v30  ;;  %3353 = vmatprep.subr.bf16.mxu1 %v5022_v31  ;;  %v5105_v30 = vld [vmem:[%s5326_s6 + $0xb88] ss:$16 sps:$4 sm:$0xff]   ;;  %v5110_v31 = vld [vmem:[%s5326_s6 + $0xba4] ss:$16 sps:$4 sm:$0xff]  }
 0x152   : > { %3067 = vmatpush1.bf16.msra.mxu0 %v5017_v16  ;;  %3354 = vmatpush1.bf16.msra.mxu1 %v5020_v32  ;;  %v5113_v16 = vld [vmem:[%s5326_s6 + $0xbac] ss:$16 sps:$4 sm:$0xff]   ;;  %v5108_v32 = vld [vmem:[%s5326_s6 + $0xba0] ss:$16 sps:$4 sm:$0xff]  }
 0x153   : > { %3068 = vmatprep.subr.bf16.mxu0 %v5025_v33  ;;  %3355 = vmatprep.subr.bf16.mxu1 %v5028_v34  ;;  %v5111_v33 = vld [vmem:[%s5326_s6 + $0xba8] ss:$16 sps:$4 sm:$0xff]   ;;  %v5116_v34 = vld [vmem:[%s5326_s6 + $0xbc4] ss:$16 sps:$4 sm:$0xff]  }
 0x156   : > { %3069 = vmatpush1.bf16.msra.mxu0 %v5023_v26  ;;  %3356 = vmatpush1.bf16.msra.mxu1 %v5026_v35  ;;  %v5119_v26 = vld [vmem:[%s5326_s6 + $0xbcc] ss:$16 sps:$4 sm:$0xff]   ;;  %v5114_v35 = vld [vmem:[%s5326_s6 + $0xbc0] ss:$16 sps:$4 sm:$0xff]  }
 0x157   : > { %3079 = vmatprep.subr.bf16.mxu0 %v5032_v36  ;;  %3366 = vmatprep.subr.bf16.mxu1 %v5035_v14  ;;  %v5117_v36 = vld [vmem:[%s5326_s6 + $0xbc8] ss:$16 sps:$4 sm:$0xff]   ;;  %v5122_v14 = vld [vmem:[%s5326_s6 + $0xbe4] ss:$16 sps:$4 sm:$0xff]  }
 0x159   : > { %3071 = vmatmul.mubr.bf16.vlgmr.msra.gmra.mrb[0].mxu0 %v5707_v38  ;;  %3358 = vmatmul.mubr.bf16.vlgmr.msra.gmra.mrb[0].mxu1 %v5707_v38 }
 0x15a   : > { %3080 = vmatpush1.bf16.msra.mxu0 %v5030_v39  ;;  %3367 = vmatpush1.bf16.msra.mxu1 %v5033_v40  ;;  %v5125_v39 = vld [vmem:[%s5326_s6 + $0xbec] ss:$16 sps:$4 sm:$0xff]   ;;  %v5120_v40 = vld [vmem:[%s5326_s6 + $0xbe0] ss:$16 sps:$4 sm:$0xff]  }
 0x15b   : > { %3081 = vmatprep.subr.bf16.mxu0 %v5038_v41  ;;  %3368 = vmatprep.subr.bf16.mxu1 %v5041_v42  ;;  %v5123_v41 = vld [vmem:[%s5326_s6 + $0xbe8] ss:$16 sps:$4 sm:$0xff]   ;;  %v5128_v42 = vld [vmem:[%s5326_s6 + $0xc04] ss:$16 sps:$4 sm:$0xff]  }
 0x15c   : > { %3111 = vmatprep.mubr.bf16.mxu0 %v780_v43  ;;  %3398 = vmatprep.mubr.bf16.mxu1 %v780_v43  ;;  %v5131_v43 = vld [vmem:[%s5326_s6 + $0xc0c] ss:$16 sps:$4 sm:$0xff]  }
 0x15e   : > { %3082 = vmatpush1.bf16.msra.mxu0 %v5036_v28  ;;  %3369 = vmatpush1.bf16.msra.mxu1 %v5039_v45  ;;  %v779_v28 = vcombine.high %v5707_v38, %v5707_v38  ;;  %v5126_v45 = vld [vmem:[%s5326_s6 + $0xc00] ss:$16 sps:$4 sm:$0xff]   ;;  %v5135_v38 = vld [vmem:[%s5326_s6 + $0xc28] ss:$16 sps:$4 sm:$0xff]  }
 0x15f   : > { %3083 = vmatprep.subr.bf16.mxu0 %v5044_v46  ;;  %3370 = vmatprep.subr.bf16.mxu1 %v5047_v47  ;;  %v5129_v46 = vld [vmem:[%s5326_s6 + $0xc08] ss:$16 sps:$4 sm:$0xff]   ;;  %v5134_v47 = vld [vmem:[%s5326_s6 + $0xc24] ss:$16 sps:$4 sm:$0xff]  }
 0x162   : > { %3084 = vmatpush1.bf16.msra.mxu0 %v5042_v37  ;;  %3371 = vmatpush1.bf16.msra.mxu1 %v5045_v48  ;;  %v5137_v37 = vld [vmem:[%s5326_s6 + $0xc2c] ss:$16 sps:$4 sm:$0xff]   ;;  %v5132_v48 = vld [vmem:[%s5326_s6 + $0xc20] ss:$16 sps:$4 sm:$0xff]  }
 0x163   : > { %3085 = vmatprep.subr.bf16.mxu0 %v5050_v49  ;;  %3372 = vmatprep.subr.bf16.mxu1 %v5053_v51  ;;  %v5140_v49 = vld [vmem:[%s5326_s6 + $0xc44] ss:$16 sps:$4 sm:$0xff]   ;;  %v5143_v51 = vld [vmem:[%s5326_s6 + $0xc4c] ss:$16 sps:$4 sm:$0xff]  }
 0x166   : > { %3086 = vmatpush1.bf16.msra.mxu0 %v5048_v52  ;;  %3373 = vmatpush1.bf16.msra.mxu1 %v5051_v54  ;;  %v5262_v52 = vmov 0   ;;  %v5138_v54 = vld [vmem:[%s5326_s6 + $0xc40] ss:$16 sps:$4 sm:$0xff]  }
 0x167   : > { %3087 = vmatprep.subr.bf16.mxu0 %v5056_v55  ;;  %3374 = vmatprep.subr.bf16.mxu1 %v5059_v56  ;;  %v5141_v55 = vld [vmem:[%s5326_s6 + $0xc48] ss:$16 sps:$4 sm:$0xff]   ;;  %v5146_v56 = vld [vmem:[%s5326_s6 + $0xc64] ss:$16 sps:$4 sm:$0xff]  }
 0x16a   : > { %3088 = vmatpush1.bf16.msra.mxu0 %v5054_v57  ;;  %3375 = vmatpush1.bf16.msra.mxu1 %v5057_v58  ;;  %v5149_v57 = vld [vmem:[%s5326_s6 + $0xc6c] ss:$16 sps:$4 sm:$0xff]   ;;  %v5144_v58 = vld [vmem:[%s5326_s6 + $0xc60] ss:$16 sps:$4 sm:$0xff]  }
 0x16b   : > { %3089 = vmatprep.subr.bf16.mxu0 %v5062_v59  ;;  %3376 = vmatprep.subr.bf16.mxu1 %v5065_v60  ;;  %v5147_v59 = vld [vmem:[%s5326_s6 + $0xc68] ss:$16 sps:$4 sm:$0xff]   ;;  %v5152_v60 = vld [vmem:[%s5326_s6 + $0xc84] ss:$16 sps:$4 sm:$0xff]  }
 0x16e   : > { %3090 = vmatpush1.bf16.msra.mxu0 %v5060_v61  ;;  %3377 = vmatpush1.bf16.msra.mxu1 %v5063_v62  ;;  %v5155_v61 = vld [vmem:[%s5326_s6 + $0xc8c] ss:$16 sps:$4 sm:$0xff]   ;;  %v5150_v62 = vld [vmem:[%s5326_s6 + $0xc80] ss:$16 sps:$4 sm:$0xff]  }
 0x16f   : > { %3091 = vmatprep.subr.bf16.mxu0 %v5068_v63  ;;  %3378 = vmatprep.subr.bf16.mxu1 %v5071_v0  ;;  %v5153_v63 = vld [vmem:[%s5326_s6 + $0xc88] ss:$16 sps:$4 sm:$0xff]   ;;  %v5158_v0 = vld [vmem:[%s5326_s6 + $0xca4] ss:$16 sps:$4 sm:$0xff]  }
 0x172   : > { %3092 = vmatpush1.bf16.msra.mxu0 %v5066_v1  ;;  %3379 = vmatpush1.bf16.msra.mxu1 %v5069_v2  ;;  %v5161_v1 = vld [vmem:[%s5326_s6 + $0xcac] ss:$16 sps:$4 sm:$0xff]   ;;  %v5156_v2 = vld [vmem:[%s5326_s6 + $0xca0] ss:$16 sps:$4 sm:$0xff]  }
 0x173   : > { %3093 = vmatprep.subr.bf16.mxu0 %v5074_v3  ;;  %3380 = vmatprep.subr.bf16.mxu1 %v5077_v4  ;;  %v5159_v3 = vld [vmem:[%s5326_s6 + $0xca8] ss:$16 sps:$4 sm:$0xff]   ;;  %v5164_v4 = vld [vmem:[%s5326_s6 + $0xcc4] ss:$16 sps:$4 sm:$0xff]  }
 0x176   : > { %3094 = vmatpush1.bf16.msra.mxu0 %v5072_v5  ;;  %3381 = vmatpush1.bf16.msra.mxu1 %v5075_v6  ;;  %v5167_v5 = vld [vmem:[%s5326_s6 + $0xccc] ss:$16 sps:$4 sm:$0xff]   ;;  %v742_v6 = vcombine.high %v5618_v22, %v5618_v22  ;;  %v5263_v22 = vmov 1983009808  }
 0x177   : > { %3095 = vmatprep.subr.bf16.mxu0 %v5080_v7  ;;  %3382 = vmatprep.subr.bf16.mxu1 %v5083_v8  ;;  %v5162_v7 = vld [vmem:[%s5326_s6 + $0xcc0] ss:$16 sps:$4 sm:$0xff]   ;;  %v5165_v8 = vld [vmem:[%s5326_s6 + $0xcc8] ss:$16 sps:$4 sm:$0xff]  }
 0x17a   : > { %3096 = vmatpush1.bf16.msra.mxu0 %v5078_v9  ;;  %3383 = vmatpush1.bf16.msra.mxu1 %v5081_v10  ;;  %v5170_v9 = vld [vmem:[%s5326_s6 + $0xce4] ss:$16 sps:$4 sm:$0xff]   ;;  %v5173_v10 = vld [vmem:[%s5326_s6 + $0xcec] ss:$16 sps:$4 sm:$0xff]  }
 0x17b   : > { %3097 = vmatprep.subr.bf16.mxu0 %v5086_v11  ;;  %3384 = vmatprep.subr.bf16.mxu1 %v5089_v12  ;;  %v756_v11 = vrot.slane %v742_v6, %v5376_v50  ;;  %v5168_v12 = vld [vmem:[%s5326_s6 + $0xce0] ss:$16 sps:$4 sm:$0xff]   ;;  %v5205_v6 = vld [vmem:[%s5969_s3 + $0xb8] sm:$0xff] (!%p4382_p7)  }
 0x17e   : > { %3098 = vmatpush1.bf16.msra.mxu0 %v5084_v13  ;;  %3385 = vmatpush1.bf16.msra.mxu1 %v5087_v15  ;;  %v5171_v13 = vld [vmem:[%s5326_s6 + $0xce8] ss:$16 sps:$4 sm:$0xff]   ;;  %v771_v15 = vrot.slane %v756_v11, %v5376_v50 }
 0x17f   : > { %3099 = vmatprep.subr.bf16.mxu0 %v5092_v17  ;;  %3386 = vmatprep.subr.bf16.mxu1 %v5095_v53  ;;  %v3455_v17 = vunpack.c.l.s4 %v5263_v22 }
 0x181   : > { %v3456_v53 = vunpack.c.0.s8 %v3455_v17 }
 0x182   : > { %3100 = vmatpush1.bf16.msra.mxu0 %v5090_v18  ;;  %3387 = vmatpush1.bf16.msra.mxu1 %v5093_v19 }
 0x183   : > { %3101 = vmatprep.subr.bf16.mxu0 %v5098_v20  ;;  %3388 = vmatprep.subr.bf16.mxu1 %v5101_v21  ;;  %v5814_v20 = vsub.s32 %v3456_v53, %v5368_v44 }
 0x186   : > { %3102 = vmatpush1.bf16.msra.mxu0 %v5096_v23  ;;  %3389 = vmatpush1.bf16.msra.mxu1 %v5099_v24 }
 0x187   : > { %3103 = vmatprep.subr.bf16.mxu0 %v5104_v25  ;;  %3390 = vmatprep.subr.bf16.mxu1 %v5107_v27 }
 0x18a   : > { %3104 = vmatpush1.bf16.msra.mxu0 %v5102_v29  ;;  %3391 = vmatpush1.bf16.msra.mxu1 %v5105_v30 }
 0x18b   : > { %3105 = vmatprep.subr.bf16.mxu0 %v5110_v31  ;;  %3392 = vmatprep.subr.bf16.mxu1 %v5113_v16 }
 0x18e   : > { %3106 = vmatpush1.bf16.msra.mxu0 %v5108_v32  ;;  %3393 = vmatpush1.bf16.msra.mxu1 %v5111_v33  ;;  %v272_v32 = vld [vmem:[#allocation2] sm:$0xff] }
 0x18f   : > { %3107 = vmatprep.subr.bf16.mxu0 %v5116_v34  ;;  %3394 = vmatprep.subr.bf16.mxu1 %v5119_v26  ;;  %v5174_v26 = vld [vmem:[%s5969_s3 + $0x40] sm:$0xff] (!%p4382_p7)  }
 0x192   : > { %3108 = vmatpush1.bf16.msra.mxu0 %v5114_v35  ;;  %3395 = vmatpush1.bf16.msra.mxu1 %v5117_v36  ;;  %v5175_v35 = vld [vmem:[%s5969_s3 + $0xc0] sm:$0xff] (!%p4382_p7)  }
 0x193   : > { %3109 = vmatprep.subr.bf16.mxu0 %v5122_v14  ;;  %3396 = vmatprep.subr.bf16.mxu1 %v5125_v39  ;;  %v5176_v36 = vld [vmem:[%s5969_s3] sm:$0xff] (!%p4382_p7)   ;;  %v5178_v39 = vld [vmem:[%s5969_s3 + $0x48] sm:$0xff] (!%p4382_p7)  }
 0x194   : > { %v5177_v14 = vld [vmem:[%s5969_s3 + $0x80] sm:$0xff] (!%p4382_p7)  }
 0x196   : > { %3110 = vmatpush1.bf16.msra.mxu0 %v5120_v40  ;;  %3397 = vmatpush1.bf16.msra.mxu1 %v5123_v41  ;;  %v5179_v40 = vld [vmem:[%s5969_s3 + $0xc8] sm:$0xff] (!%p4382_p7)  }
 0x197   : > { %3120 = vmatprep.subr.bf16.mxu0 %v5128_v42  ;;  %3407 = vmatprep.subr.bf16.mxu1 %v5131_v43  ;;  %v5180_v41 = vld [vmem:[%s5969_s3 + $0x8] sm:$0xff] (!%p4382_p7)   ;;  %v5182_v43 = vld [vmem:[%s5969_s3 + $0x50] sm:$0xff] (!%p4382_p7)  }
 0x198   : > { %v5181_v42 = vld [vmem:[%s5969_s3 + $0x88] sm:$0xff] (!%p4382_p7)  }
 0x199   : > { %3112 = vmatmul.mubr.bf16.vlgmr.msra.gmra.mrb[0].mxu0 %v779_v28  ;;  %3399 = vmatmul.mubr.bf16.vlgmr.msra.gmra.mrb[0].mxu1 %v779_v28  ;;  %v5183_v28 = vld [vmem:[%s5969_s3 + $0xd0] sm:$0xff] (!%p4382_p7)  }
 0x19a   : > { %3121 = vmatpush1.bf16.msra.mxu0 %v5126_v45  ;;  %3408 = vmatpush1.bf16.msra.mxu1 %v5129_v46  ;;  %v5184_v45 = vld [vmem:[%s5969_s3 + $0x10] sm:$0xff] (!%p4382_p7)  }
 0x19b   : > { %3122 = vmatprep.subr.bf16.mxu0 %v5134_v47  ;;  %3409 = vmatprep.subr.bf16.mxu1 %v5137_v37  ;;  %v5185_v46 = vld [vmem:[%s5969_s3 + $0x90] sm:$0xff] (!%p4382_p7)   ;;  %v5186_v47 = vld [vmem:[%s5969_s3 + $0x58] sm:$0xff] (!%p4382_p7)  }
 0x19c   : > { %3152 = vmatprep.mubr.bf16.mxu0 %v5262_v52  ;;  %3439 = vmatprep.mubr.bf16.mxu1 %v5262_v52  ;;  %v5187_v37 = vld [vmem:[%s5969_s3 + $0xd8] sm:$0xff] (!%p4382_p7)   ;;  %v5192_v52 = vld [vmem:[%s5969_s3 + $0x20] sm:$0xff] (!%p4382_p7)  }
 0x19e   : > { %3123 = vmatpush1.bf16.msra.mxu0 %v5132_v48  ;;  %3410 = vmatpush1.bf16.msra.mxu1 %v5135_v38  ;;  %v5188_v48 = vld [vmem:[%s5969_s3 + $0x18] sm:$0xff] (!%p4382_p7)  }
 0x19f   : > { %3124 = vmatprep.subr.bf16.mxu0 %v5140_v49  ;;  %3411 = vmatprep.subr.bf16.mxu1 %v5143_v51  ;;  %v5189_v38 = vld [vmem:[%s5969_s3 + $0x98] sm:$0xff] (!%p4382_p7)   ;;  %v5190_v49 = vld [vmem:[%s5969_s3 + $0x60] sm:$0xff] (!%p4382_p7)  }
 0x1a0   : > { %v5191_v51 = vld [vmem:[%s5969_s3 + $0xe0] sm:$0xff] (!%p4382_p7)  }
 0x1a2   : > { %3125 = vmatpush1.bf16.msra.mxu0 %v5138_v54  ;;  %3412 = vmatpush1.bf16.msra.mxu1 %v5141_v55  ;;  %v5193_v54 = vld [vmem:[%s5969_s3 + $0xa0] sm:$0xff] (!%p4382_p7)   ;;  %v5194_v55 = vld [vmem:[%s5969_s3 + $0x68] sm:$0xff] (!%p4382_p7)  }
 0x1a3   : > { %3126 = vmatprep.subr.bf16.mxu0 %v5146_v56  ;;  %3413 = vmatprep.subr.bf16.mxu1 %v5149_v57  ;;  %v5195_v56 = vld [vmem:[%s5969_s3 + $0xe8] sm:$0xff] (!%p4382_p7)  }
 0x1a4   : > { %v5196_v57 = vld [vmem:[%s5969_s3 + $0x28] sm:$0xff] (!%p4382_p7)  }
 0x1a6   : > { %3127 = vmatpush1.bf16.msra.mxu0 %v5144_v58  ;;  %3414 = vmatpush1.bf16.msra.mxu1 %v5147_v59  ;;  %v5197_v58 = vld [vmem:[%s5969_s3 + $0xa8] sm:$0xff] (!%p4382_p7)   ;;  %v5198_v59 = vld [vmem:[%s5969_s3 + $0x70] sm:$0xff] (!%p4382_p7)  }
 0x1a7   : > { %3128 = vmatprep.subr.bf16.mxu0 %v5152_v60  ;;  %3415 = vmatprep.subr.bf16.mxu1 %v5155_v61  ;;  %v5199_v60 = vld [vmem:[%s5969_s3 + $0xf0] sm:$0xff] (!%p4382_p7)  }
 0x1a8   : > { %v5200_v61 = vld [vmem:[%s5969_s3 + $0x30] sm:$0xff] (!%p4382_p7)  }
 0x1aa   : > { %3129 = vmatpush1.bf16.msra.mxu0 %v5150_v62  ;;  %3416 = vmatpush1.bf16.msra.mxu1 %v5153_v63  ;;  %v3481_v62 = vsub.s32 (!%p4382_p7), 0, %v5368_v44  ;;  %v5201_v63 = vld [vmem:[%s5969_s3 + $0xb0] sm:$0xff] (!%p4382_p7)  }
 0x1ab   : > { %3130 = vmatprep.subr.bf16.mxu0 %v5158_v0  ;;  %3417 = vmatprep.subr.bf16.mxu1 %v5161_v1  ;;  %v3485_v0 = vsub.s32 (!%p4382_p7), 1, %v5368_v44  ;;  %v5202_v1 = vld [vmem:[%s5969_s3 + $0x78] sm:$0xff] (!%p4382_p7)  }
 0x1ae   : > { %3131 = vmatpush1.bf16.msra.mxu0 %v5156_v2  ;;  %3418 = vmatpush1.bf16.msra.mxu1 %v5159_v3  ;;  %v3489_v2 = vsub.s32 (!%p4382_p7), 2, %v5368_v44  ;;  %v5203_v3 = vld [vmem:[%s5969_s3 + $0xf8] sm:$0xff] (!%p4382_p7)  }
 0x1af   : > { %3132 = vmatprep.subr.bf16.mxu0 %v5164_v4  ;;  %3419 = vmatprep.subr.bf16.mxu1 %v5167_v5  ;;  %v3493_v4 = vsub.s32 (!%p4382_p7), 3, %v5368_v44  ;;  %v5204_v5 = vld [vmem:[%s5969_s3 + $0x38] sm:$0xff] (!%p4382_p7)  }
 0x1b2   : > { %3133 = vmatpush1.bf16.msra.mxu0 %v5162_v7  ;;  %3420 = vmatpush1.bf16.msra.mxu1 %v5165_v8  ;;  %v3477_v7 = vld [vmem:[%s5968_s2] sm:$0xf] (!%p4382_p7) }
 0x1b3   : > { %3134 = vmatprep.subr.bf16.mxu0 %v5170_v9  ;;  %3421 = vmatprep.subr.bf16.mxu1 %v5173_v10  ;;  %v3482_v8 = vrot.slane (!%p4382_p7), %v3477_v7, %v3481_v62  ;;  %v3486_v9 = vrot.slane (!%p4382_p7), %v3477_v7, %v3485_v0  ;;  %v3490_v10 = vrot.slane (!%p4382_p7), %v3477_v7, %v3489_v2 }
 0x1b4   : > { %v3494_v44 = vrot.slane (!%p4382_p7), %v3477_v7, %v3493_v4 }
 0x1b5   : > { %v3495_v11 = vcombine.low (!%p4382_p7), %v3482_v8, %v3486_v9 }
 0x1b6   : > { %3135 = vmatpush1.bf16.msra.mxu0 %v5168_v12  ;;  %3422 = vmatpush1.bf16.msra.mxu1 %v5171_v13  ;;  %v3496_v12 = vcombine.low (!%p4382_p7), %v3490_v10, %v3494_v44 }
 0x1b7   : > { %4421 = vmatprep.subr.bf16.mxu0 (!%p4382_p7), %v5174_v26  ;;  %4443 = vmatprep.subr.bf16.mxu1 (!%p4382_p7), %v5175_v35  ;;  %v3503_v13 = vrot.slane (!%p4382_p7), %v3495_v11, %v5814_v20 }
 0x1b9   : > { %3153 = vmatmul.mubr.bf16.vlgmr.msra.gmra.mrb[0].mxu0 %v771_v15  ;;  %3440 = vmatmul.mubr.bf16.vlgmr.msra.gmra.mrb[0].mxu1 %v771_v15  ;;  %v3510_v15 = vrot.slane (!%p4382_p7), %v3496_v12, %v5814_v20 }
 0x1ba   : > { %4422 = vmatpush3.bf16.msra.mxu0 (!%p4382_p7), %v5176_v36  ;;  %4444 = vmatpush3.bf16.msra.mxu1 (!%p4382_p7), %v5177_v14 }
 0x1bb   : > { %4423 = vmatprep.subr.bf16.mxu0 (!%p4382_p7), %v5178_v39  ;;  %4445 = vmatprep.subr.bf16.mxu1 (!%p4382_p7), %v5179_v40  ;;  %v3511_v17 = vcombine.low (!%p4382_p7), %v3503_v13, %v3510_v15 }
 0x1be   : > { %4424 = vmatpush3.bf16.msra.mxu0 (!%p4382_p7), %v5180_v41  ;;  %4446 = vmatpush3.bf16.msra.mxu1 (!%p4382_p7), %v5181_v42 }
 0x1bf   : > { %4425 = vmatprep.subr.bf16.mxu0 (!%p4382_p7), %v5182_v43  ;;  %4447 = vmatprep.subr.bf16.mxu1 (!%p4382_p7), %v5183_v28 }
 0x1c2   : > { %4426 = vmatpush3.bf16.msra.mxu0 (!%p4382_p7), %v5184_v45  ;;  %4448 = vmatpush3.bf16.msra.mxu1 (!%p4382_p7), %v5185_v46 }
 0x1c3   : > { %4427 = vmatprep.subr.bf16.mxu0 (!%p4382_p7), %v5186_v47  ;;  %4449 = vmatprep.subr.bf16.mxu1 (!%p4382_p7), %v5187_v37 }
 0x1c6   : > { %4428 = vmatpush3.bf16.msra.mxu0 (!%p4382_p7), %v5188_v48  ;;  %4450 = vmatpush3.bf16.msra.mxu1 (!%p4382_p7), %v5189_v38 }
 0x1c7   : > { %4429 = vmatprep.subr.bf16.mxu0 (!%p4382_p7), %v5190_v49  ;;  %4451 = vmatprep.subr.bf16.mxu1 (!%p4382_p7), %v5191_v51 }
 0x1ca   : > { %4430 = vmatpush3.bf16.msra.mxu0 (!%p4382_p7), %v5192_v52  ;;  %4452 = vmatpush3.bf16.msra.mxu1 (!%p4382_p7), %v5193_v54 }
 0x1cb   : > { %4431 = vmatprep.subr.bf16.mxu0 (!%p4382_p7), %v5194_v55  ;;  %4453 = vmatprep.subr.bf16.mxu1 (!%p4382_p7), %v5195_v56 }
 0x1ce   : > { %4432 = vmatpush3.bf16.msra.mxu0 (!%p4382_p7), %v5196_v57  ;;  %4454 = vmatpush3.bf16.msra.mxu1 (!%p4382_p7), %v5197_v58 }
 0x1cf   : > { %4433 = vmatprep.subr.bf16.mxu0 (!%p4382_p7), %v5198_v59  ;;  %4455 = vmatprep.subr.bf16.mxu1 (!%p4382_p7), %v5199_v60 }
 0x1d2   : > { %4434 = vmatpush3.bf16.msra.mxu0 (!%p4382_p7), %v5200_v61  ;;  %4456 = vmatpush3.bf16.msra.mxu1 (!%p4382_p7), %v5201_v63 }
 0x1d3   : > { %4435 = vmatprep.subr.bf16.mxu0 (!%p4382_p7), %v5202_v1  ;;  %4457 = vmatprep.subr.bf16.mxu1 (!%p4382_p7), %v5203_v3 }
 0x1d6   : > { %4436 = vmatpush3.bf16.msra.mxu0 (!%p4382_p7), %v5204_v5  ;;  %4458 = vmatpush3.bf16.msra.mxu1 (!%p4382_p7), %v5205_v6 }
 0x28c   : > { %v3154_v18 = vpop.f32.mrb[0].mxu0  ;;  %v3441_v19 = vpop.f32.mrb[0].mxu1 }
 0x28d   : > { %v3156_v21 = vpop.f32.mrb[1].mxu0  ;;  %v3443_v23 = vpop.f32.mrb[1].mxu1 }
 0x28e   : > { %v3452_v24 = vcombine.low %v3154_v18, %v3156_v21  ;;  %v3453_v25 = vcombine.low %v3441_v19, %v3443_v23  ;;  %v3158_v27 = vpop.f32.mrb[2].mxu0  ;;  %v3445_v29 = vpop.f32.mrb[2].mxu1 }
 0x28f   : > { %v3159_v30 = vpop.f32.mrb[3].mxu0  ;;  %v3446_v50 = vpop.f32.mrb[3].mxu1 }
 0x290   : > { %v3460_v31 = vrot.slane %v3452_v24, %v5814_v20  ;;  %v3467_v16 = vrot.slane %v3453_v25, %v5814_v20  ;;  %3475 = sbr.rel (%p4382_p7) target bundleno = 901 (0x385), region = 48 }
 0x292   : > { %v3468_v33 = vcombine.low %v3460_v31, %v3467_v16  ;;  %v4383_v16 = vld [vmem:[%s5970_s4] ss:$0 sm:$0xff] (!%p4382_p7) }
 0x294   : > { %v3470_v34 = vadd.f32 %v3468_v33, %v272_v32 }
 0x296   : > { %3471 = vst [vmem:[#allocation2] sm:$0xff] %v3470_v34 }
 0x29d   : > { %v3476_v22 = vld [vmem:[#allocation2] sm:$0xff] }
 0x29e   : > { %v3513_v53 = vadd.f32 %v3511_v17, %v3476_v22 }
 0x2a0   : > { %v3514_v18 = vmax.f32 %v3513_v53, 0.0 }
 0x2a2   : > { %v3523_v19 = vrot.slane %v3514_v18, %v5814_v20  ;;  %v3516_v21 = vcombine.high %v3514_v18, %v3514_v18 }
 0x2a4   : > { %v3531_v23 = vcombine.high %v3523_v19, %v3523_v19  ;;  %v3530_v24 = vrot.slane %v3516_v21, %v5814_v20  ;;  %v3537_v25 = vpack.c.bf16 %v3523_v19, %v3523_v19 }
 0x2a6   : > { %v3538_v27 = vpack.c.bf16 %v3531_v23, %v3531_v23  ;;  %v3532_v29 = vcombine.high %v3530_v24, %v3530_v24  ;;  %v3539_v30 = vpack.c.bf16 %v3530_v24, %v3530_v24 }
 0x2a8   : > { %3836 = vmatprep.mubr.bf16.mxu0 %v3538_v27  ;;  %v3540_v50 = vpack.c.bf16 %v3532_v29, %v3532_v29 }
 0x2a9   : > { %3837 = vmatmul.mubr.bf16.vlgmr.msra.gmra.mrb[0].mxu0 %v3537_v25 }
 0x2aa   : > { %3876 = vmatprep.mubr.bf16.mxu1 %v3540_v50 }
 0x2ab   : > { %3877 = vmatmul.mubr.bf16.vlgmr.msra.gmra.mrb[0].mxu1 %v3539_v30 }
 0x37c   : > { %v4437_v31 = vpop.f32.mrb[0].mxu0 }
 0x37d   : > { %v4438_v32 = vpop.f32.mrb[1].mxu0 }
 0x37e   : > { %v4459_v33 = vpop.f32.mrb[0].mxu1  ;;  %v4439_v34 = vadd.f32 %v4438_v32, %v4437_v31  ;;  %v4440_v26 = vpop.f32.mrb[2].mxu0 }
 0x37f   : > { %v4460_v35 = vpop.f32.mrb[1].mxu1  ;;  %v4441_v20 = vpop.f32.mrb[3].mxu0 }
 0x380   : > { %v3839_v36 = vadd.f32 %v4439_v34, %v4383_v16  ;;  %v4461_v14 = vadd.f32 %v4460_v35, %v4459_v33  ;;  %v4462_v39 = vpop.f32.mrb[2].mxu1 }
 0x381   : > { %v4463_v40 = vpop.f32.mrb[3].mxu1 }
 0x382   : > { %v3879_v41 = vadd.f32 %v4461_v14, %v3839_v36 }
 0x384   : > { %3884 = vst [vmem:[#allocation3] sm:$0x3] %v3879_v41 }
 0x385 PF: > { %p5931_p8 = scmp.eq.s32.totalorder %s3959_s21, 1  ;;  %s5264_s13 = smov [#allocation3]  }
 0x386   : > { %s3894_s14 = sshll.u32 %s5264_s13, 4  ;;  %s3895_s14 = int_to_ptr.vmem [resolvable:$true] %s3894_s14 }
 0x387   : > { %s5206_s15 = scalar_lea.vmem %s3895_s14, 32  ;;  %p5213_p12 = scmp.lt.s32.totalorder %s3895_s14, %s3895_s14 }
 0x388   : > { %p5207_p9 = scmp.ne.s32.totalorder %s3895_s14, %s5206_s15  ;;  %p5214_p13 = scmp.lt.s32.totalorder %s5206_s15, %s5206_s15 }
 0x38a   : > { %p5208_p10 = pnand %p5207_p9, %p5931_p8  ;;  %p5215_p0 = por %p5214_p13, %p5213_p12 }
 0x38c   : > { %p5209_p11 = pneg %p5208_p10 }
 0x38e   : > { %p5216_p1 = pnand %p5215_p0, %p5209_p11 }
 0x390   : > { %5219 = shalt.err (!%p5216_p1)
}
 0x391   : > { %s5220_s21 = scalar_lea.hbm %s5971_s5, 32 }
 0x392   : > { %p5221_p2 = scmp.ne.s32.totalorder %s5971_s5, %s5220_s21  ;;  %p5226_p5 = scmp.lt.u32.totalorder %s5220_s21, %s5971_s5 }
 0x394   : > { %p5222_p3 = pnand %p5221_p2, %p5931_p8 }
 0x396   : > { %p5223_p4 = pneg %p5222_p3 }
 0x398   : > { %p5228_p6 = pnand %p5226_p5, %p5223_p4 }
 0x39a   : > { %5231 = shalt.err (!%p5228_p6)
}
 0x39b   : > { %4514 = dma.vmem_to_hbm [thread:$0]  (%p5931_p8), %s3895_s14, 32, %s5971_s5, [#allocation4]  }
 0x39c   : > { %5245 = dma.done.wait (%p5931_p8), [#allocation4], 32  }
 0x39d   : > { %5247 = vsyncadd (%p5931_p8), [#allocation4], 4294967264 }
 0x39e PF: > { %s16_s20 = sadd.s32 1, %s5258_s20   ;;  %s5973_s18 = smov %s5254_s19 }
 0x39f   : > { %p13_p7 = scmp.ge.s32.totalorder %s16_s20, 4   ;;  %s5974_s19 = smov %s5976_s22 }
 0x3a1   :  { %15 = sbr.rel (!%p13_p7) target bundleno = 2 (0x2), region = 79 }
 0x3a8   :  { %3907 = vsyncpa [#allocation4], 1 }
 0x3a9   :  { %3909 = vsyncpa [#allocation4 + $0x1], 1 }

</bundles_post_ra>
